<compile_context>
chip_gen: v7x
topology: tpu7x:2x2x1
jax: 0.10.0
libtpu: 0.0.40
codegen_flags: <defaults>
</compile_context>

<pallas_src>
import functools

import jax
import jax.numpy as jnp
from jax.experimental import pallas as pl
from jax.experimental.pallas import tpu as pltpu


def _round_up(x, m):
    return (x + m - 1) // m * m


# -----------------------------------------------------------------------------
# Pallas kernel: one (TILE_M, K) x (K, Coutp) tile of the im2col matmul,
# + bias, optionally fused LeakyReLU(0.2).  Single output.
# -----------------------------------------------------------------------------
def _matmul_bias_act_kernel(p_ref, w_ref, b_ref, o_ref, *, apply_lrelu):
    acc = jnp.dot(p_ref[...], w_ref[...], preferred_element_type=jnp.float32)
    acc = acc + b_ref[...]
    if apply_lrelu:
        acc = jnp.where(acc >= 0.0, acc, 0.2 * acc)
    o_ref[...] = acc.astype(o_ref.dtype)


# -----------------------------------------------------------------------------
# One layer: ReflectionPad2d(1) + Conv2d(3x3, stride) [+ fused LeakyReLU(0.2)]
# -----------------------------------------------------------------------------
def _conv2d_3x3_layer(x_nhwc, w_eff, bias, stride, *, apply_lrelu,
                      tile_m_max=1024):
    """x_nhwc: (N,H,W,Cin) f32; w_eff: (Cout,Cin,3,3); bias: (Cout,).
    Returns NHWC f32 conv output (activated iff apply_lrelu)."""
    N, H, W, Cin = x_nhwc.shape
    Cout = w_eff.shape[0]

    # ---- glue: reflection pad + im2col gather (stays fused in the jit) ----
    xb = x_nhwc.astype(jnp.bfloat16)                       # bf16 feeds the MXU
    xp = jnp.pad(xb, ((0, 0), (1, 1), (1, 1), (0, 0)), mode="reflect")
    Hp, Wp = H + 2, W + 2
    Ho = (Hp - 3) // stride + 1
    Wo = (Wp - 3) // stride + 1

    # 9 taps -> (N*Ho*Wo, 9*Cin); column index = (dy*3+dx)*Cin + ci.
    # TODO(synk): build patches inside the kernel from a haloed x row tile
    # (manual DMA) to remove the remaining 9x HBM read amplification of im2col.
    cols = []
    for dy in range(3):
        for dx in range(3):
            cols.append(
                xp[:, dy:dy + (Ho - 1) * stride + 1:stride,
                      dx:dx + (Wo - 1) * stride + 1:stride, :])
    patches = jnp.concatenate(cols, axis=-1).reshape(N * Ho * Wo, 9 * Cin)

    # Weight -> (9*Cin, Cout) matching the patch column order; bf16 for MXU.
    w2 = jnp.transpose(w_eff, (2, 3, 1, 0)).reshape(9 * Cin, Cout)
    w2 = w2.astype(jnp.bfloat16)
    b2 = bias.reshape(1, Cout).astype(jnp.float32)

    M, K = patches.shape

    # Padding for lane/sublane-dense layout and M tiling.
    Coutp = _round_up(Cout, 128)          # lane-dense output -> unmasked stores
    Kp = _round_up(K, 16)                 # bf16 sublane packing friendly
    Mp = _round_up(M, 256)
    tile_m = min(tile_m_max, Mp)          # per-step VMEM (bf16, double-buffered)
    Mp = _round_up(Mp, tile_m)            # stays well under v7x's 64 MiB VMEM

    patches = jnp.pad(patches, ((0, Mp - M), (0, Kp - K)))
    w2 = jnp.pad(w2, ((0, Kp - K), (0, Coutp - Cout)))
    b2 = jnp.pad(b2, ((0, 0), (0, Coutp - Cout)))

    grid_m = Mp // tile_m
    flops = 2 * Mp * Kp * Coutp
    bytes_accessed = (Mp * Kp * 2          # bf16 patch tiles
                      + Kp * Coutp * 2     # bf16 weight (resident)
                      + Coutp * 4          # bias
                      + Mp * Coutp * 4)    # f32 output

    out_flat = pl.pallas_call(
        functools.partial(_matmul_bias_act_kernel, apply_lrelu=apply_lrelu),
        grid=(grid_m,),
        in_specs=[
            pl.BlockSpec((tile_m, Kp), lambda i: (i, 0)),   # patch row tile
            pl.BlockSpec((Kp, Coutp), lambda i: (0, 0)),    # weight, resident
            pl.BlockSpec((1, Coutp), lambda i: (0, 0)),     # bias, resident
        ],
        out_specs=pl.BlockSpec((tile_m, Coutp), lambda i: (i, 0)),
        out_shape=jax.ShapeDtypeStruct((Mp, Coutp), jnp.float32),
        compiler_params=pltpu.CompilerParams(
            dimension_semantics=("parallel",),   # shard M tiles across TCs (v7x)
            vmem_limit_bytes=48 * 1024 * 1024,
        ),
        cost_estimate=pl.CostEstimate(
            flops=flops, transcendentals=0, bytes_accessed=bytes_accessed),
    )(patches, w2, b2)

    out = out_flat[:M, :Cout].reshape(N, Ho, Wo, Cout)
    return out


# -----------------------------------------------------------------------------
# DiscriminatorR forward
# -----------------------------------------------------------------------------
_STRIDES = (1, 2, 1, 2, 1, 2, 1)


def discriminator_r_forward(x_nchw, params):
    """params: list of 7 (w_eff (Cout,Cin,3,3), bias (Cout,)) tuples.
    Returns (x, hiddens[:-1]) in NCHW, matching the PyTorch module (including
    the in-place LeakyReLU aliasing of the hidden activations)."""
    cur = jnp.transpose(x_nchw, (0, 2, 3, 1))   # NCHW -> NHWC (kernel layout)
    hiddens = []
    out = None
    n_layers = len(params)
    for i, (w, b) in enumerate(params):
        last = (i == n_layers - 1)
        y = _conv2d_3x3_layer(cur, w, b, _STRIDES[i], apply_lrelu=not last)
        if not last:
            hiddens.append(y)   # post-LeakyReLU, as PyTorch's inplace op yields
            cur = y
        else:
            out = y             # final layer: raw conv output, no activation
    out_nchw = jnp.transpose(out, (0, 3, 1, 2))
    hiddens_nchw = [jnp.transpose(h, (0, 3, 1, 2)) for h in hiddens]
    return out_nchw, hiddens_nchw


# -----------------------------------------------------------------------------
# Deterministic parameter construction (synthetic; mirrors module __init__)
# -----------------------------------------------------------------------------
def init_params(key, in_channels, hidden_channels):
    h = hidden_channels
    chans = [in_channels, h // 32, h // 16, h // 8, h // 4, h // 2, h, 1]
    params = []
    for i in range(7):
        cin, cout = chans[i], chans[i + 1]
        key, kv, kb = jax.random.split(key, 3)
        v = jax.random.normal(kv, (cout, cin, 3, 3), jnp.float32) * 0.1
        v_norm = jnp.sqrt(jnp.sum(v * v, axis=(1, 2, 3), keepdims=True)) + 1e-12
        g = jnp.sqrt(jnp.sum(v * v, axis=(1, 2, 3), keepdims=True))  # init: g=||v||
        w_eff = g * v / v_norm
        b = jax.random.normal(kb, (cout,), jnp.float32) * 0.01
        params.append((w_eff, b))
    return params


if __name__ == "__main__":
    key = jax.random.PRNGKey(0)
    k_x, k_p = jax.random.split(key)

    in_channels = 4
    hidden_channels = 32          # small stand-in for the default 512
    x = jax.random.normal(k_x, (2, in_channels, 16, 16), jnp.float32)  # NCHW
    params = init_params(k_p, in_channels, hidden_channels)

    fwd = jax.jit(functools.partial(discriminator_r_forward, params=params))
    out, hiddens = fwd(x)
    jax.block_until_ready(out)
    for hdn in hiddens:
        jax.block_until_ready(hdn)

    # Sanity: 7 layers, strides (1,2,1,2,1,2,1) => final spatial 2x2, 1 channel.
    assert out.shape == (2, 1, 2, 2), out.shape
    assert len(hiddens) == 6
    print("KERNEL_OK")
</pallas_src>

<mosaic_0001>
module attributes {stable_mosaic.version = 11 : i64} {
  func.func @_matmul_bias_act_kernel(%arg0: i32, %arg1: memref<512x48xbf16, #tpu.memory_space<vmem>>, %arg2: memref<48x128xbf16, #tpu.memory_space<vmem>>, %arg3: memref<1x128xf32, #tpu.memory_space<vmem>>, %arg4: memref<512x128xf32, #tpu.memory_space<vmem>>) attributes {dimension_semantics = [#tpu.dimension_semantics<parallel>], iteration_bounds = array<i64: 1>, scalar_prefetch = 0 : i64, scratch_operands = 0 : i64, tpu.core_type = #tpu.core_type<tc>, window_params = [{transform_indices = @transform_0, window_bounds = array<i64: 512, 48>}, {pipeline_mode = #tpu.pipeline_mode<synchronous>, transform_indices = @transform_1, window_bounds = array<i64: 48, 128>}, {pipeline_mode = #tpu.pipeline_mode<synchronous>, transform_indices = @transform_2, window_bounds = array<i64: 1, 128>}, {transform_indices = @transform_3, window_bounds = array<i64: 512, 128>}]} {
    %c0 = arith.constant 0 : index
    %c0_0 = arith.constant 0 : index
    %0 = vector.load %arg1[%c0, %c0_0] : memref<512x48xbf16, #tpu.memory_space<vmem>>, vector<512x48xbf16>
    %c0_1 = arith.constant 0 : index
    %c0_2 = arith.constant 0 : index
    %1 = vector.load %arg2[%c0_1, %c0_2] : memref<48x128xbf16, #tpu.memory_space<vmem>>, vector<48x128xbf16>
    %cst = arith.constant dense<0.000000e+00> : vector<512x128xf32>
    %2 = tpu.matmul %0, %1, %cst {dimension_numbers = #tpu.dot_dimension_numbers<[1], [0], [0], [1], [0, 0, 1, 1], [], []>} : vector<512x48xbf16>, vector<48x128xbf16>, vector<512x128xf32> -> vector<512x128xf32>
    %c0_3 = arith.constant 0 : index
    %c0_4 = arith.constant 0 : index
    %3 = vector.load %arg3[%c0_3, %c0_4] : memref<1x128xf32, #tpu.memory_space<vmem>>, vector<1x128xf32>
    %4 = vector.broadcast %3 : vector<1x128xf32> to vector<512x128xf32>
    %5 = arith.addf %2, %4 : vector<512x128xf32>
    %cst_5 = arith.constant 0.000000e+00 : f32
    %6 = vector.broadcast %cst_5 : f32 to vector<512x128xf32>
    %7 = arith.cmpf oge, %5, %6 : vector<512x128xf32>
    %cst_6 = arith.constant 2.000000e-01 : f32
    %8 = vector.broadcast %cst_6 : f32 to vector<512x128xf32>
    %9 = arith.mulf %8, %5 : vector<512x128xf32>
    %10 = arith.select %7, %5, %9 : vector<512x128xi1>, vector<512x128xf32>
    %c0_7 = arith.constant 0 : index
    %c0_8 = arith.constant 0 : index
    %11 = vector.load %arg4[%c0_7, %c0_8] : memref<512x128xf32, #tpu.memory_space<vmem>>, vector<512x128xf32>
    tpu.vector_store %arg4[%c0_7, %c0_8], %10 {strides = array<i32>} : memref<512x128xf32, #tpu.memory_space<vmem>>, vector<512x128xf32>,
    return
  }
  func.func @transform_0(%arg0: i32) -> (i32, i32) {
    %c0_i32 = arith.constant 0 : i32
    %c0_i32_0 = arith.constant 0 : i32
    return %arg0, %c0_i32 : i32, i32
  }
  func.func @transform_1(%arg0: i32) -> (i32, i32) {
    %c0_i32 = arith.constant 0 : i32
    %c0_i32_0 = arith.constant 0 : i32
    %c0_i32_1 = arith.constant 0 : i32
    return %c0_i32, %c0_i32_0 : i32, i32
  }
  func.func @transform_2(%arg0: i32) -> (i32, i32) {
    %c0_i32 = arith.constant 0 : i32
    %c0_i32_0 = arith.constant 0 : i32
    %c0_i32_1 = arith.constant 0 : i32
    return %c0_i32, %c0_i32_0 : i32, i32
  }
  func.func @transform_3(%arg0: i32) -> (i32, i32) {
    %c0_i32 = arith.constant 0 : i32
    %c0_i32_0 = arith.constant 0 : i32
    return %arg0, %c0_i32 : i32, i32
  }
}

module attributes {stable_mosaic.version = 11 : i64} {
  func.func @_matmul_bias_act_kernel(%arg0: i32, %arg1: memref<256x16xbf16, #tpu.memory_space<vmem>>, %arg2: memref<16x128xbf16, #tpu.memory_space<vmem>>, %arg3: memref<1x128xf32, #tpu.memory_space<vmem>>, %arg4: memref<256x128xf32, #tpu.memory_space<vmem>>) attributes {dimension_semantics = [#tpu.dimension_semantics<parallel>], iteration_bounds = array<i64: 1>, scalar_prefetch = 0 : i64, scratch_operands = 0 : i64, tpu.core_type = #tpu.core_type<tc>, window_params = [{transform_indices = @transform_0, window_bounds = array<i64: 256, 16>}, {pipeline_mode = #tpu.pipeline_mode<synchronous>, transform_indices = @transform_1, window_bounds = array<i64: 16, 128>}, {pipeline_mode = #tpu.pipeline_mode<synchronous>, transform_indices = @transform_2, window_bounds = array<i64: 1, 128>}, {transform_indices = @transform_3, window_bounds = array<i64: 256, 128>}]} {
    %c0 = arith.constant 0 : index
    %c0_0 = arith.constant 0 : index
    %0 = vector.load %arg1[%c0, %c0_0] : memref<256x16xbf16, #tpu.memory_space<vmem>>, vector<256x16xbf16>
    %c0_1 = arith.constant 0 : index
    %c0_2 = arith.constant 0 : index
    %1 = vector.load %arg2[%c0_1, %c0_2] : memref<16x128xbf16, #tpu.memory_space<vmem>>, vector<16x128xbf16>
    %cst = arith.constant dense<0.000000e+00> : vector<256x128xf32>
    %2 = tpu.matmul %0, %1, %cst {dimension_numbers = #tpu.dot_dimension_numbers<[1], [0], [0], [1], [0, 0, 1, 1], [], []>} : vector<256x16xbf16>, vector<16x128xbf16>, vector<256x128xf32> -> vector<256x128xf32>
    %c0_3 = arith.constant 0 : index
    %c0_4 = arith.constant 0 : index
    %3 = vector.load %arg3[%c0_3, %c0_4] : memref<1x128xf32, #tpu.memory_space<vmem>>, vector<1x128xf32>
    %4 = vector.broadcast %3 : vector<1x128xf32> to vector<256x128xf32>
    %5 = arith.addf %2, %4 : vector<256x128xf32>
    %cst_5 = arith.constant 0.000000e+00 : f32
    %6 = vector.broadcast %cst_5 : f32 to vector<256x128xf32>
    %7 = arith.cmpf oge, %5, %6 : vector<256x128xf32>
    %cst_6 = arith.constant 2.000000e-01 : f32
    %8 = vector.broadcast %cst_6 : f32 to vector<256x128xf32>
    %9 = arith.mulf %8, %5 : vector<256x128xf32>
    %10 = arith.select %7, %5, %9 : vector<256x128xi1>, vector<256x128xf32>
    %c0_7 = arith.constant 0 : index
    %c0_8 = arith.constant 0 : index
    %11 = vector.load %arg4[%c0_7, %c0_8] : memref<256x128xf32, #tpu.memory_space<vmem>>, vector<256x128xf32>
    tpu.vector_store %arg4[%c0_7, %c0_8], %10 {strides = array<i32>} : memref<256x128xf32, #tpu.memory_space<vmem>>, vector<256x128xf32>,
    return
  }
  func.func @transform_0(%arg0: i32) -> (i32, i32) {
    %c0_i32 = arith.constant 0 : i32
    %c0_i32_0 = arith.constant 0 : i32
    return %arg0, %c0_i32 : i32, i32
  }
  func.func @transform_1(%arg0: i32) -> (i32, i32) {
    %c0_i32 = arith.constant 0 : i32
    %c0_i32_0 = arith.constant 0 : i32
    %c0_i32_1 = arith.constant 0 : i32
    return %c0_i32, %c0_i32_0 : i32, i32
  }
  func.func @transform_2(%arg0: i32) -> (i32, i32) {
    %c0_i32 = arith.constant 0 : i32
    %c0_i32_0 = arith.constant 0 : i32
    %c0_i32_1 = arith.constant 0 : i32
    return %c0_i32, %c0_i32_0 : i32, i32
  }
  func.func @transform_3(%arg0: i32) -> (i32, i32) {
    %c0_i32 = arith.constant 0 : i32
    %c0_i32_0 = arith.constant 0 : i32
    return %arg0, %c0_i32 : i32, i32
  }
}

module attributes {stable_mosaic.version = 11 : i64} {
  func.func @_matmul_bias_act_kernel(%arg0: i32, %arg1: memref<256x32xbf16, #tpu.memory_space<vmem>>, %arg2: memref<32x128xbf16, #tpu.memory_space<vmem>>, %arg3: memref<1x128xf32, #tpu.memory_space<vmem>>, %arg4: memref<256x128xf32, #tpu.memory_space<vmem>>) attributes {dimension_semantics = [#tpu.dimension_semantics<parallel>], iteration_bounds = array<i64: 1>, scalar_prefetch = 0 : i64, scratch_operands = 0 : i64, tpu.core_type = #tpu.core_type<tc>, window_params = [{transform_indices = @transform_0, window_bounds = array<i64: 256, 32>}, {pipeline_mode = #tpu.pipeline_mode<synchronous>, transform_indices = @transform_1, window_bounds = array<i64: 32, 128>}, {pipeline_mode = #tpu.pipeline_mode<synchronous>, transform_indices = @transform_2, window_bounds = array<i64: 1, 128>}, {transform_indices = @transform_3, window_bounds = array<i64: 256, 128>}]} {
    %c0 = arith.constant 0 : index
    %c0_0 = arith.constant 0 : index
    %0 = vector.load %arg1[%c0, %c0_0] : memref<256x32xbf16, #tpu.memory_space<vmem>>, vector<256x32xbf16>
    %c0_1 = arith.constant 0 : index
    %c0_2 = arith.constant 0 : index
    %1 = vector.load %arg2[%c0_1, %c0_2] : memref<32x128xbf16, #tpu.memory_space<vmem>>, vector<32x128xbf16>
    %cst = arith.constant dense<0.000000e+00> : vector<256x128xf32>
    %2 = tpu.matmul %0, %1, %cst {dimension_numbers = #tpu.dot_dimension_numbers<[1], [0], [0], [1], [0, 0, 1, 1], [], []>} : vector<256x32xbf16>, vector<32x128xbf16>, vector<256x128xf32> -> vector<256x128xf32>
    %c0_3 = arith.constant 0 : index
    %c0_4 = arith.constant 0 : index
    %3 = vector.load %arg3[%c0_3, %c0_4] : memref<1x128xf32, #tpu.memory_space<vmem>>, vector<1x128xf32>
    %4 = vector.broadcast %3 : vector<1x128xf32> to vector<256x128xf32>
    %5 = arith.addf %2, %4 : vector<256x128xf32>
    %cst_5 = arith.constant 0.000000e+00 : f32
    %6 = vector.broadcast %cst_5 : f32 to vector<256x128xf32>
    %7 = arith.cmpf oge, %5, %6 : vector<256x128xf32>
    %cst_6 = arith.constant 2.000000e-01 : f32
    %8 = vector.broadcast %cst_6 : f32 to vector<256x128xf32>
    %9 = arith.mulf %8, %5 : vector<256x128xf32>
    %10 = arith.select %7, %5, %9 : vector<256x128xi1>, vector<256x128xf32>
    %c0_7 = arith.constant 0 : index
    %c0_8 = arith.constant 0 : index
    %11 = vector.load %arg4[%c0_7, %c0_8] : memref<256x128xf32, #tpu.memory_space<vmem>>, vector<256x128xf32>
    tpu.vector_store %arg4[%c0_7, %c0_8], %10 {strides = array<i32>} : memref<256x128xf32, #tpu.memory_space<vmem>>, vector<256x128xf32>,
    return
  }
  func.func @transform_0(%arg0: i32) -> (i32, i32) {
    %c0_i32 = arith.constant 0 : i32
    %c0_i32_0 = arith.constant 0 : i32
    return %arg0, %c0_i32 : i32, i32
  }
  func.func @transform_1(%arg0: i32) -> (i32, i32) {
    %c0_i32 = arith.constant 0 : i32
    %c0_i32_0 = arith.constant 0 : i32
    %c0_i32_1 = arith.constant 0 : i32
    return %c0_i32, %c0_i32_0 : i32, i32
  }
  func.func @transform_2(%arg0: i32) -> (i32, i32) {
    %c0_i32 = arith.constant 0 : i32
    %c0_i32_0 = arith.constant 0 : i32
    %c0_i32_1 = arith.constant 0 : i32
    return %c0_i32, %c0_i32_0 : i32, i32
  }
  func.func @transform_3(%arg0: i32) -> (i32, i32) {
    %c0_i32 = arith.constant 0 : i32
    %c0_i32_0 = arith.constant 0 : i32
    return %arg0, %c0_i32 : i32, i32
  }
}

module attributes {stable_mosaic.version = 11 : i64} {
  func.func @_matmul_bias_act_kernel(%arg0: i32, %arg1: memref<256x48xbf16, #tpu.memory_space<vmem>>, %arg2: memref<48x128xbf16, #tpu.memory_space<vmem>>, %arg3: memref<1x128xf32, #tpu.memory_space<vmem>>, %arg4: memref<256x128xf32, #tpu.memory_space<vmem>>) attributes {dimension_semantics = [#tpu.dimension_semantics<parallel>], iteration_bounds = array<i64: 1>, scalar_prefetch = 0 : i64, scratch_operands = 0 : i64, tpu.core_type = #tpu.core_type<tc>, window_params = [{transform_indices = @transform_0, window_bounds = array<i64: 256, 48>}, {pipeline_mode = #tpu.pipeline_mode<synchronous>, transform_indices = @transform_1, window_bounds = array<i64: 48, 128>}, {pipeline_mode = #tpu.pipeline_mode<synchronous>, transform_indices = @transform_2, window_bounds = array<i64: 1, 128>}, {transform_indices = @transform_3, window_bounds = array<i64: 256, 128>}]} {
    %c0 = arith.constant 0 : index
    %c0_0 = arith.constant 0 : index
    %0 = vector.load %arg1[%c0, %c0_0] : memref<256x48xbf16, #tpu.memory_space<vmem>>, vector<256x48xbf16>
    %c0_1 = arith.constant 0 : index
    %c0_2 = arith.constant 0 : index
    %1 = vector.load %arg2[%c0_1, %c0_2] : memref<48x128xbf16, #tpu.memory_space<vmem>>, vector<48x128xbf16>
    %cst = arith.constant dense<0.000000e+00> : vector<256x128xf32>
    %2 = tpu.matmul %0, %1, %cst {dimension_numbers = #tpu.dot_dimension_numbers<[1], [0], [0], [1], [0, 0, 1, 1], [], []>} : vector<256x48xbf16>, vector<48x128xbf16>, vector<256x128xf32> -> vector<256x128xf32>
    %c0_3 = arith.constant 0 : index
    %c0_4 = arith.constant 0 : index
    %3 = vector.load %arg3[%c0_3, %c0_4] : memref<1x128xf32, #tpu.memory_space<vmem>>, vector<1x128xf32>
    %4 = vector.broadcast %3 : vector<1x128xf32> to vector<256x128xf32>
    %5 = arith.addf %2, %4 : vector<256x128xf32>
    %cst_5 = arith.constant 0.000000e+00 : f32
    %6 = vector.broadcast %cst_5 : f32 to vector<256x128xf32>
    %7 = arith.cmpf oge, %5, %6 : vector<256x128xf32>
    %cst_6 = arith.constant 2.000000e-01 : f32
    %8 = vector.broadcast %cst_6 : f32 to vector<256x128xf32>
    %9 = arith.mulf %8, %5 : vector<256x128xf32>
    %10 = arith.select %7, %5, %9 : vector<256x128xi1>, vector<256x128xf32>
    %c0_7 = arith.constant 0 : index
    %c0_8 = arith.constant 0 : index
    %11 = vector.load %arg4[%c0_7, %c0_8] : memref<256x128xf32, #tpu.memory_space<vmem>>, vector<256x128xf32>
    tpu.vector_store %arg4[%c0_7, %c0_8], %10 {strides = array<i32>} : memref<256x128xf32, #tpu.memory_space<vmem>>, vector<256x128xf32>,
    return
  }
  func.func @transform_0(%arg0: i32) -> (i32, i32) {
    %c0_i32 = arith.constant 0 : i32
    %c0_i32_0 = arith.constant 0 : i32
    return %arg0, %c0_i32 : i32, i32
  }
  func.func @transform_1(%arg0: i32) -> (i32, i32) {
    %c0_i32 = arith.constant 0 : i32
    %c0_i32_0 = arith.constant 0 : i32
    %c0_i32_1 = arith.constant 0 : i32
    return %c0_i32, %c0_i32_0 : i32, i32
  }
  func.func @transform_2(%arg0: i32) -> (i32, i32) {
    %c0_i32 = arith.constant 0 : i32
    %c0_i32_0 = arith.constant 0 : i32
    %c0_i32_1 = arith.constant 0 : i32
    return %c0_i32, %c0_i32_0 : i32, i32
  }
  func.func @transform_3(%arg0: i32) -> (i32, i32) {
    %c0_i32 = arith.constant 0 : i32
    %c0_i32_0 = arith.constant 0 : i32
    return %arg0, %c0_i32 : i32, i32
  }
}

module attributes {stable_mosaic.version = 11 : i64} {
  func.func @_matmul_bias_act_kernel(%arg0: i32, %arg1: memref<256x80xbf16, #tpu.memory_space<vmem>>, %arg2: memref<80x128xbf16, #tpu.memory_space<vmem>>, %arg3: memref<1x128xf32, #tpu.memory_space<vmem>>, %arg4: memref<256x128xf32, #tpu.memory_space<vmem>>) attributes {dimension_semantics = [#tpu.dimension_semantics<parallel>], iteration_bounds = array<i64: 1>, scalar_prefetch = 0 : i64, scratch_operands = 0 : i64, tpu.core_type = #tpu.core_type<tc>, window_params = [{transform_indices = @transform_0, window_bounds = array<i64: 256, 80>}, {pipeline_mode = #tpu.pipeline_mode<synchronous>, transform_indices = @transform_1, window_bounds = array<i64: 80, 128>}, {pipeline_mode = #tpu.pipeline_mode<synchronous>, transform_indices = @transform_2, window_bounds = array<i64: 1, 128>}, {transform_indices = @transform_3, window_bounds = array<i64: 256, 128>}]} {
    %c0 = arith.constant 0 : index
    %c0_0 = arith.constant 0 : index
    %0 = vector.load %arg1[%c0, %c0_0] : memref<256x80xbf16, #tpu.memory_space<vmem>>, vector<256x80xbf16>
    %c0_1 = arith.constant 0 : index
    %c0_2 = arith.constant 0 : index
    %1 = vector.load %arg2[%c0_1, %c0_2] : memref<80x128xbf16, #tpu.memory_space<vmem>>, vector<80x128xbf16>
    %cst = arith.constant dense<0.000000e+00> : vector<256x128xf32>
    %2 = tpu.matmul %0, %1, %cst {dimension_numbers = #tpu.dot_dimension_numbers<[1], [0], [0], [1], [0, 0, 1, 1], [], []>} : vector<256x80xbf16>, vector<80x128xbf16>, vector<256x128xf32> -> vector<256x128xf32>
    %c0_3 = arith.constant 0 : index
    %c0_4 = arith.constant 0 : index
    %3 = vector.load %arg3[%c0_3, %c0_4] : memref<1x128xf32, #tpu.memory_space<vmem>>, vector<1x128xf32>
    %4 = vector.broadcast %3 : vector<1x128xf32> to vector<256x128xf32>
    %5 = arith.addf %2, %4 : vector<256x128xf32>
    %cst_5 = arith.constant 0.000000e+00 : f32
    %6 = vector.broadcast %cst_5 : f32 to vector<256x128xf32>
    %7 = arith.cmpf oge, %5, %6 : vector<256x128xf32>
    %cst_6 = arith.constant 2.000000e-01 : f32
    %8 = vector.broadcast %cst_6 : f32 to vector<256x128xf32>
    %9 = arith.mulf %8, %5 : vector<256x128xf32>
    %10 = arith.select %7, %5, %9 : vector<256x128xi1>, vector<256x128xf32>
    %c0_7 = arith.constant 0 : index
    %c0_8 = arith.constant 0 : index
    %11 = vector.load %arg4[%c0_7, %c0_8] : memref<256x128xf32, #tpu.memory_space<vmem>>, vector<256x128xf32>
    tpu.vector_store %arg4[%c0_7, %c0_8], %10 {strides = array<i32>} : memref<256x128xf32, #tpu.memory_space<vmem>>, vector<256x128xf32>,
    return
  }
  func.func @transform_0(%arg0: i32) -> (i32, i32) {
    %c0_i32 = arith.constant 0 : i32
    %c0_i32_0 = arith.constant 0 : i32
    return %arg0, %c0_i32 : i32, i32
  }
  func.func @transform_1(%arg0: i32) -> (i32, i32) {
    %c0_i32 = arith.constant 0 : i32
    %c0_i32_0 = arith.constant 0 : i32
    %c0_i32_1 = arith.constant 0 : i32
    return %c0_i32, %c0_i32_0 : i32, i32
  }
  func.func @transform_2(%arg0: i32) -> (i32, i32) {
    %c0_i32 = arith.constant 0 : i32
    %c0_i32_0 = arith.constant 0 : i32
    %c0_i32_1 = arith.constant 0 : i32
    return %c0_i32, %c0_i32_0 : i32, i32
  }
  func.func @transform_3(%arg0: i32) -> (i32, i32) {
    %c0_i32 = arith.constant 0 : i32
    %c0_i32_0 = arith.constant 0 : i32
    return %arg0, %c0_i32 : i32, i32
  }
}

module attributes {stable_mosaic.version = 11 : i64} {
  func.func @_matmul_bias_act_kernel(%arg0: i32, %arg1: memref<256x144xbf16, #tpu.memory_space<vmem>>, %arg2: memref<144x128xbf16, #tpu.memory_space<vmem>>, %arg3: memref<1x128xf32, #tpu.memory_space<vmem>>, %arg4: memref<256x128xf32, #tpu.memory_space<vmem>>) attributes {dimension_semantics = [#tpu.dimension_semantics<parallel>], iteration_bounds = array<i64: 1>, scalar_prefetch = 0 : i64, scratch_operands = 0 : i64, tpu.core_type = #tpu.core_type<tc>, window_params = [{transform_indices = @transform_0, window_bounds = array<i64: 256, 144>}, {pipeline_mode = #tpu.pipeline_mode<synchronous>, transform_indices = @transform_1, window_bounds = array<i64: 144, 128>}, {pipeline_mode = #tpu.pipeline_mode<synchronous>, transform_indices = @transform_2, window_bounds = array<i64: 1, 128>}, {transform_indices = @transform_3, window_bounds = array<i64: 256, 128>}]} {
    %c0 = arith.constant 0 : index
    %c0_0 = arith.constant 0 : index
    %0 = vector.load %arg1[%c0, %c0_0] : memref<256x144xbf16, #tpu.memory_space<vmem>>, vector<256x144xbf16>
    %c0_1 = arith.constant 0 : index
    %c0_2 = arith.constant 0 : index
    %1 = vector.load %arg2[%c0_1, %c0_2] : memref<144x128xbf16, #tpu.memory_space<vmem>>, vector<144x128xbf16>
    %cst = arith.constant dense<0.000000e+00> : vector<256x128xf32>
    %2 = tpu.matmul %0, %1, %cst {dimension_numbers = #tpu.dot_dimension_numbers<[1], [0], [0], [1], [0, 0, 1, 1], [], []>} : vector<256x144xbf16>, vector<144x128xbf16>, vector<256x128xf32> -> vector<256x128xf32>
    %c0_3 = arith.constant 0 : index
    %c0_4 = arith.constant 0 : index
    %3 = vector.load %arg3[%c0_3, %c0_4] : memref<1x128xf32, #tpu.memory_space<vmem>>, vector<1x128xf32>
    %4 = vector.broadcast %3 : vector<1x128xf32> to vector<256x128xf32>
    %5 = arith.addf %2, %4 : vector<256x128xf32>
    %cst_5 = arith.constant 0.000000e+00 : f32
    %6 = vector.broadcast %cst_5 : f32 to vector<256x128xf32>
    %7 = arith.cmpf oge, %5, %6 : vector<256x128xf32>
    %cst_6 = arith.constant 2.000000e-01 : f32
    %8 = vector.broadcast %cst_6 : f32 to vector<256x128xf32>
    %9 = arith.mulf %8, %5 : vector<256x128xf32>
    %10 = arith.select %7, %5, %9 : vector<256x128xi1>, vector<256x128xf32>
    %c0_7 = arith.constant 0 : index
    %c0_8 = arith.constant 0 : index
    %11 = vector.load %arg4[%c0_7, %c0_8] : memref<256x128xf32, #tpu.memory_space<vmem>>, vector<256x128xf32>
    tpu.vector_store %arg4[%c0_7, %c0_8], %10 {strides = array<i32>} : memref<256x128xf32, #tpu.memory_space<vmem>>, vector<256x128xf32>,
    return
  }
  func.func @transform_0(%arg0: i32) -> (i32, i32) {
    %c0_i32 = arith.constant 0 : i32
    %c0_i32_0 = arith.constant 0 : i32
    return %arg0, %c0_i32 : i32, i32
  }
  func.func @transform_1(%arg0: i32) -> (i32, i32) {
    %c0_i32 = arith.constant 0 : i32
    %c0_i32_0 = arith.constant 0 : i32
    %c0_i32_1 = arith.constant 0 : i32
    return %c0_i32, %c0_i32_0 : i32, i32
  }
  func.func @transform_2(%arg0: i32) -> (i32, i32) {
    %c0_i32 = arith.constant 0 : i32
    %c0_i32_0 = arith.constant 0 : i32
    %c0_i32_1 = arith.constant 0 : i32
    return %c0_i32, %c0_i32_0 : i32, i32
  }
  func.func @transform_3(%arg0: i32) -> (i32, i32) {
    %c0_i32 = arith.constant 0 : i32
    %c0_i32_0 = arith.constant 0 : i32
    return %arg0, %c0_i32 : i32, i32
  }
}

module attributes {stable_mosaic.version = 11 : i64} {
  func.func @_matmul_bias_act_kernel(%arg0: i32, %arg1: memref<256x288xbf16, #tpu.memory_space<vmem>>, %arg2: memref<288x128xbf16, #tpu.memory_space<vmem>>, %arg3: memref<1x128xf32, #tpu.memory_space<vmem>>, %arg4: memref<256x128xf32, #tpu.memory_space<vmem>>) attributes {dimension_semantics = [#tpu.dimension_semantics<parallel>], iteration_bounds = array<i64: 1>, scalar_prefetch = 0 : i64, scratch_operands = 0 : i64, tpu.core_type = #tpu.core_type<tc>, window_params = [{transform_indices = @transform_0, window_bounds = array<i64: 256, 288>}, {pipeline_mode = #tpu.pipeline_mode<synchronous>, transform_indices = @transform_1, window_bounds = array<i64: 288, 128>}, {pipeline_mode = #tpu.pipeline_mode<synchronous>, transform_indices = @transform_2, window_bounds = array<i64: 1, 128>}, {transform_indices = @transform_3, window_bounds = array<i64: 256, 128>}]} {
    %c0 = arith.constant 0 : index
    %c0_0 = arith.constant 0 : index
    %0 = vector.load %arg1[%c0, %c0_0] : memref<256x288xbf16, #tpu.memory_space<vmem>>, vector<256x288xbf16>
    %c0_1 = arith.constant 0 : index
    %c0_2 = arith.constant 0 : index
    %1 = vector.load %arg2[%c0_1, %c0_2] : memref<288x128xbf16, #tpu.memory_space<vmem>>, vector<288x128xbf16>
    %cst = arith.constant dense<0.000000e+00> : vector<256x128xf32>
    %2 = tpu.matmul %0, %1, %cst {dimension_numbers = #tpu.dot_dimension_numbers<[1], [0], [0], [1], [0, 0, 1, 1], [], []>} : vector<256x288xbf16>, vector<288x128xbf16>, vector<256x128xf32> -> vector<256x128xf32>
    %c0_3 = arith.constant 0 : index
    %c0_4 = arith.constant 0 : index
    %3 = vector.load %arg3[%c0_3, %c0_4] : memref<1x128xf32, #tpu.memory_space<vmem>>, vector<1x128xf32>
    %4 = vector.broadcast %3 : vector<1x128xf32> to vector<256x128xf32>
    %5 = arith.addf %2, %4 : vector<256x128xf32>
    %c0_5 = arith.constant 0 : index
    %c0_6 = arith.constant 0 : index
    %6 = vector.load %arg4[%c0_5, %c0_6] : memref<256x128xf32, #tpu.memory_space<vmem>>, vector<256x128xf32>
    tpu.vector_store %arg4[%c0_5, %c0_6], %5 {strides = array<i32>} : memref<256x128xf32, #tpu.memory_space<vmem>>, vector<256x128xf32>,
    return
  }
  func.func @transform_0(%arg0: i32) -> (i32, i32) {
    %c0_i32 = arith.constant 0 : i32
    %c0_i32_0 = arith.constant 0 : i32
    return %arg0, %c0_i32 : i32, i32
  }
  func.func @transform_1(%arg0: i32) -> (i32, i32) {
    %c0_i32 = arith.constant 0 : i32
    %c0_i32_0 = arith.constant 0 : i32
    %c0_i32_1 = arith.constant 0 : i32
    return %c0_i32, %c0_i32_0 : i32, i32
  }
  func.func @transform_2(%arg0: i32) -> (i32, i32) {
    %c0_i32 = arith.constant 0 : i32
    %c0_i32_0 = arith.constant 0 : i32
    %c0_i32_1 = arith.constant 0 : i32
    return %c0_i32, %c0_i32_0 : i32, i32
  }
  func.func @transform_3(%arg0: i32) -> (i32, i32) {
    %c0_i32 = arith.constant 0 : i32
    %c0_i32_0 = arith.constant 0 : i32
    return %arg0, %c0_i32 : i32, i32
  }
}

</mosaic_0001>

<bundles_post_ra>
// kernel: discriminator_r_forward.7
= control target key start
LH: loop header
LB: loop body
LE: loop exit
PB: predicated region body
PF: predicated region fallthrough
CT: control target
= control target key end

     0   :  { %vm270_vm0 = vcmask 392192   ;;  %s1548_s1 = inlined_call_operand.vmem [shape: bf16[48,128], index: 1, kind: input, shape index: {}]   ;;  %s1549_s0 = inlined_call_operand.vmem [shape: bf16[512,48], index: 0, kind: input, shape index: {}]   ;;  %s1550_s2 = inlined_call_operand.vmem [shape: f32[1,128], index: 2, kind: input, shape index: {}]   ;;  %s1551_s3 = inlined_call_operand.vmem [shape: f32[512,128], index: 3, kind: output, shape index: {}]  }
   0x1   :  { %v1095_v0 = vld [vmem:[%s1548_s1] sm:$0xff]   ;;  %v1096_v1 = vld [vmem:[%s1548_s1 + $0x8] sm:$0xff]   ;;  %v1097_v2 = vld [vmem:[%s1548_s1 + $0x10] sm:$0xff]  }
   0x2   :  { %1019 = vmatprep.subr.bf16.mxu0 %v1095_v0  ;;  %1089 = vmatprep.subr.bf16.mxu1 %v1095_v0  ;;  %v1098_v3 = vld [vmem:[%s1549_s0] sm:$0xff]   ;;  %v1100_v5 = vld [vmem:[%s1549_s0 + $0x8] sm:$0xff]   ;;  %v1102_v7 = vld [vmem:[%s1549_s0 + $0x10] sm:$0xff]  }
   0x3   :  { %1020 = vmatpush3.bf16.msra.mxu0 %v1095_v0  ;;  %1092 = vmatpush3.bf16.msra.mxu1 %v1095_v0  ;;  %v1099_v4 = vld [vmem:[%s1549_s0 + $0x80] sm:$0xff]   ;;  %v1101_v6 = vld [vmem:[%s1549_s0 + $0x88] sm:$0xff]   ;;  %v1103_v8 = vld [vmem:[%s1549_s0 + $0x90] sm:$0xff]  }
   0x4   :  { %1021 = vmatprep.subr.bf16.mxu0 %v1096_v1  ;;  %1090 = vmatprep.subr.bf16.mxu1 %v1096_v1  ;;  %v1104_v9 = vld [vmem:[%s1549_s0 + $0x18] sm:$0xff]   ;;  %v1106_v11 = vld [vmem:[%s1549_s0 + $0x20] sm:$0xff]   ;;  %v1108_v13 = vld [vmem:[%s1549_s0 + $0x28] sm:$0xff]  }
   0x5   :  { %1025 = vmatprep.mubr.msk.bf16.mxu0 %vm270_vm0, %v1098_v3  ;;  %1057 = vmatprep.mubr.msk.bf16.mxu1 %vm270_vm0, %v1099_v4  ;;  %v1105_v10 = vld [vmem:[%s1549_s0 + $0x98] sm:$0xff]   ;;  %v1107_v12 = vld [vmem:[%s1549_s0 + $0xa0] sm:$0xff]   ;;  %v1109_v14 = vld [vmem:[%s1549_s0 + $0xa8] sm:$0xff]  }
   0x6   :  { %v1110_v15 = vld [vmem:[%s1549_s0 + $0x30] sm:$0xff]   ;;  %v1112_v17 = vld [vmem:[%s1549_s0 + $0x38] sm:$0xff]   ;;  %v1114_v19 = vld [vmem:[%s1549_s0 + $0x40] sm:$0xff]  }
   0x7   :  { %1022 = vmatpush3.bf16.msra.mxu0 %v1096_v1  ;;  %1093 = vmatpush3.bf16.msra.mxu1 %v1096_v1  ;;  %v1111_v16 = vld [vmem:[%s1549_s0 + $0xb0] sm:$0xff]   ;;  %v1113_v18 = vld [vmem:[%s1549_s0 + $0xb8] sm:$0xff]   ;;  %v1115_v20 = vld [vmem:[%s1549_s0 + $0xc0] sm:$0xff]  }
   0x8   :  { %1023 = vmatprep.subr.bf16.mxu0 %v1097_v2  ;;  %1091 = vmatprep.subr.bf16.mxu1 %v1097_v2  ;;  %v1116_v21 = vld [vmem:[%s1549_s0 + $0x48] sm:$0xff]   ;;  %v1118_v23 = vld [vmem:[%s1549_s0 + $0x50] sm:$0xff]   ;;  %v1120_v25 = vld [vmem:[%s1549_s0 + $0x58] sm:$0xff]  }
   0x9   :  { %v1117_v22 = vld [vmem:[%s1549_s0 + $0xc8] sm:$0xff]   ;;  %v1119_v24 = vld [vmem:[%s1549_s0 + $0xd0] sm:$0xff]   ;;  %v1121_v26 = vld [vmem:[%s1549_s0 + $0xd8] sm:$0xff]  }
   0xa   :  { %v1122_v27 = vld [vmem:[%s1549_s0 + $0x60] sm:$0xff]   ;;  %v1124_v29 = vld [vmem:[%s1549_s0 + $0x68] sm:$0xff]   ;;  %v1126_v31 = vld [vmem:[%s1549_s0 + $0x70] sm:$0xff]  }
   0xb   :  { %1024 = vmatpush3.bf16.msra.mxu0 %v1097_v2  ;;  %1094 = vmatpush3.bf16.msra.mxu1 %v1097_v2  ;;  %v1123_v28 = vld [vmem:[%s1549_s0 + $0xe0] sm:$0xff]   ;;  %v1125_v30 = vld [vmem:[%s1549_s0 + $0xe8] sm:$0xff]   ;;  %v1127_v32 = vld [vmem:[%s1549_s0 + $0xf0] sm:$0xff]  }
   0xc   :  { %v1128_v33 = vld [vmem:[%s1549_s0 + $0x78] sm:$0xff]   ;;  %v1290_v35 = vld [vmem:[%s1550_s2] ss:$0 sm:$0xff] }
   0xd   :  { %v1129_v34 = vld [vmem:[%s1549_s0 + $0xf8] sm:$0xff]  }
   0xe   :  { %1026 = vmatmul.mubr.msk.bf16.vlgmr.msra.gmra.mrb[0].mxu0 %vm270_vm0, %v1100_v5  ;;  %1058 = vmatmul.mubr.msk.bf16.vlgmr.msra.gmra.mrb[0].mxu1 %vm270_vm0, %v1101_v6 }
   0xf   :  { %1029 = vmatprep.mubr.msk.bf16.mxu0 %vm270_vm0, %v1102_v7  ;;  %1061 = vmatprep.mubr.msk.bf16.mxu1 %vm270_vm0, %v1103_v8 }
  0x16   :  { %1030 = vmatmul.mubr.msk.bf16.gmra.mrb[4].mxu0 %vm270_vm0, %v1104_v9  ;;  %1062 = vmatmul.mubr.msk.bf16.gmra.mrb[4].mxu1 %vm270_vm0, %v1105_v10 }
  0x17   :  { %1033 = vmatprep.mubr.msk.bf16.mxu0 %vm270_vm0, %v1106_v11  ;;  %1065 = vmatprep.mubr.msk.bf16.mxu1 %vm270_vm0, %v1107_v12 }
  0x1e   :  { %1034 = vmatmul.mubr.msk.bf16.gmra.mrb[8].mxu0 %vm270_vm0, %v1108_v13  ;;  %1066 = vmatmul.mubr.msk.bf16.gmra.mrb[8].mxu1 %vm270_vm0, %v1109_v14 }
  0x1f   :  { %1037 = vmatprep.mubr.msk.bf16.mxu0 %vm270_vm0, %v1110_v15  ;;  %1069 = vmatprep.mubr.msk.bf16.mxu1 %vm270_vm0, %v1111_v16 }
  0x26   :  { %1038 = vmatmul.mubr.msk.bf16.gmra.mrb[12].mxu0 %vm270_vm0, %v1112_v17  ;;  %1070 = vmatmul.mubr.msk.bf16.gmra.mrb[12].mxu1 %vm270_vm0, %v1113_v18 }
  0x27   :  { %1041 = vmatprep.mubr.msk.bf16.mxu0 %vm270_vm0, %v1114_v19  ;;  %1073 = vmatprep.mubr.msk.bf16.mxu1 %vm270_vm0, %v1115_v20 }
  0x2e   :  { %1042 = vmatmul.mubr.msk.bf16.gmra.mrb[16].mxu0 %vm270_vm0, %v1116_v21  ;;  %1074 = vmatmul.mubr.msk.bf16.gmra.mrb[16].mxu1 %vm270_vm0, %v1117_v22 }
  0x2f   :  { %1045 = vmatprep.mubr.msk.bf16.mxu0 %vm270_vm0, %v1118_v23  ;;  %1077 = vmatprep.mubr.msk.bf16.mxu1 %vm270_vm0, %v1119_v24 }
  0x36   :  { %1046 = vmatmul.mubr.msk.bf16.gmra.mrb[20].mxu0 %vm270_vm0, %v1120_v25  ;;  %1078 = vmatmul.mubr.msk.bf16.gmra.mrb[20].mxu1 %vm270_vm0, %v1121_v26 }
  0x37   :  { %1049 = vmatprep.mubr.msk.bf16.mxu0 %vm270_vm0, %v1122_v27  ;;  %1081 = vmatprep.mubr.msk.bf16.mxu1 %vm270_vm0, %v1123_v28 }
  0x3e   :  { %1050 = vmatmul.mubr.msk.bf16.gmra.mrb[24].mxu0 %vm270_vm0, %v1124_v29  ;;  %1082 = vmatmul.mubr.msk.bf16.gmra.mrb[24].mxu1 %vm270_vm0, %v1125_v30 }
  0x3f   :  { %1053 = vmatprep.mubr.msk.bf16.mxu0 %vm270_vm0, %v1126_v31  ;;  %1085 = vmatprep.mubr.msk.bf16.mxu1 %vm270_vm0, %v1127_v32 }
  0x46   :  { %1054 = vmatmul.mubr.msk.bf16.gmra.mrb[28].mxu0 %vm270_vm0, %v1128_v33  ;;  %1086 = vmatmul.mubr.msk.bf16.gmra.mrb[28].mxu1 %vm270_vm0, %v1129_v34 }
  0xe1   :  { %v1027_v36 = vpop.f32.mrb[0].mxu0  ;;  %v1059_v37 = vpop.f32.mrb[0].mxu1 }
  0xe2   :  { %v410_v38 = vadd.f32 %v1027_v36, %v1290_v35  ;;  %v538_v39 = vadd.f32 %v1059_v37, %v1290_v35  ;;  %v401_v40 = vpop.f32.mrb[1].mxu0  ;;  %v529_v41 = vpop.f32.mrb[1].mxu1 }
  0xe3   :  { %v402_v42 = vadd.f32 %v1290_v35, %v401_v40  ;;  %v530_v43 = vadd.f32 %v1290_v35, %v529_v41  ;;  %v1028_v44 = vpop.f32.mrb[2].mxu0  ;;  %v1060_v45 = vpop.f32.mrb[2].mxu1 }
  0xe4   :  { %vm658_vm1 = vcmp.ge.f32.partialorder %v410_v38, 0.0  ;;  %v722_v46 = vmul.f32 0.2, %v410_v38  ;;  %vm690_vm2 = vcmp.ge.f32.partialorder %v538_v39, 0.0  ;;  %v754_v47 = vmul.f32 0.2, %v538_v39 }
  0xe5   :  { %vm656_vm3 = vcmp.ge.f32.partialorder %v402_v42, 0.0  ;;  %v720_v48 = vmul.f32 0.2, %v402_v42  ;;  %vm688_vm4 = vcmp.ge.f32.partialorder %v530_v43, 0.0  ;;  %v752_v49 = vmul.f32 0.2, %v530_v43 }
  0xe6   :  { %v786_v50 = vsel %vm658_vm1, %v410_v38, %v722_v46  ;;  %v818_v51 = vsel %vm690_vm2, %v538_v39, %v754_v47  ;;  %v413_v52 = vadd.f32 %v1028_v44, %v1290_v35  ;;  %v541_v53 = vadd.f32 %v1060_v45, %v1290_v35  ;;  %v404_v54 = vpop.f32.mrb[3].mxu0  ;;  %v532_v55 = vpop.f32.mrb[3].mxu1 }
  0xe7   :  { %850 = vst [vmem:[%s1551_s3 + $0x10] sm:$0xff] %v786_v50  ;;  %882 = vst [vmem:[%s1551_s3 + $0x110] sm:$0xff] %v818_v51  ;;  %v784_v56 = vsel %vm656_vm3, %v402_v42, %v720_v48  ;;  %v816_v57 = vsel %vm688_vm4, %v530_v43, %v752_v49  ;;  %v405_v58 = vadd.f32 %v1290_v35, %v404_v54 }
  0xe8   :  { %v533_v59 = vadd.f32 %v1290_v35, %v532_v55  ;;  %848 = vst [vmem:[%s1551_s3] sm:$0xff] %v784_v56  ;;  %880 = vst [vmem:[%s1551_s3 + $0x100] sm:$0xff] %v816_v57  ;;  %vm659_vm5 = vcmp.ge.f32.partialorder %v413_v52, 0.0  ;;  %v723_v60 = vmul.f32 0.2, %v413_v52  ;;  %vm691_vm6 = vcmp.ge.f32.partialorder %v541_v53, 0.0 }
  0xe9   :  { %v755_v61 = vmul.f32 0.2, %v541_v53  ;;  %vm657_vm7 = vcmp.ge.f32.partialorder %v405_v58, 0.0  ;;  %v721_v62 = vmul.f32 0.2, %v405_v58  ;;  %v1031_v2 = vpop.f32.mrb[4].mxu0 }
  0xea   :  { %vm689_vm8 = vcmp.ge.f32.partialorder %v533_v59, 0.0  ;;  %v753_v63 = vmul.f32 0.2, %v533_v59  ;;  %v787_v0 = vsel %vm659_vm5, %v413_v52, %v723_v60  ;;  %v1063_v3 = vpop.f32.mrb[4].mxu1  ;;  %v426_v6 = vadd.f32 %v1031_v2, %v1290_v35  ;;  %v417_v8 = vpop.f32.mrb[5].mxu0 }
  0xeb   :  { %v819_v1 = vsel %vm691_vm6, %v541_v53, %v755_v61  ;;  %851 = vst [vmem:[%s1551_s3 + $0x18] sm:$0xff] %v787_v0  ;;  %v785_v4 = vsel %vm657_vm7, %v405_v58, %v721_v62  ;;  %v554_v7 = vadd.f32 %v1063_v3, %v1290_v35  ;;  %v545_v9 = vpop.f32.mrb[5].mxu1  ;;  %v418_v10 = vadd.f32 %v1290_v35, %v417_v8  ;;  %v1032_v12 = vpop.f32.mrb[6].mxu0 }
  0xec   :  { %883 = vst [vmem:[%s1551_s3 + $0x118] sm:$0xff] %v819_v1  ;;  %v817_v5 = vsel %vm689_vm8, %v533_v59, %v753_v63  ;;  %849 = vst [vmem:[%s1551_s3 + $0x8] sm:$0xff] %v785_v4  ;;  %v546_v11 = vadd.f32 %v1290_v35, %v545_v9  ;;  %v1064_v13 = vpop.f32.mrb[6].mxu1  ;;  %vm662_vm9 = vcmp.ge.f32.partialorder %v426_v6, 0.0  ;;  %v726_v14 = vmul.f32 0.2, %v426_v6 }
  0xed   :  { %881 = vst [vmem:[%s1551_s3 + $0x108] sm:$0xff] %v817_v5  ;;  %vm694_vm10 = vcmp.ge.f32.partialorder %v554_v7, 0.0  ;;  %v758_v15 = vmul.f32 0.2, %v554_v7  ;;  %vm660_vm11 = vcmp.ge.f32.partialorder %v418_v10, 0.0  ;;  %v429_v20 = vadd.f32 %v1032_v12, %v1290_v35  ;;  %v420_v22 = vpop.f32.mrb[7].mxu0 }
  0xee   :  { %v724_v16 = vmul.f32 0.2, %v418_v10  ;;  %vm692_vm12 = vcmp.ge.f32.partialorder %v546_v11, 0.0  ;;  %v756_v17 = vmul.f32 0.2, %v546_v11  ;;  %v790_v18 = vsel %vm662_vm9, %v426_v6, %v726_v14  ;;  %v548_v23 = vpop.f32.mrb[7].mxu1 }
  0xef   :  { %v822_v19 = vsel %vm694_vm10, %v554_v7, %v758_v15  ;;  %v557_v21 = vadd.f32 %v1064_v13, %v1290_v35  ;;  %854 = vst [vmem:[%s1551_s3 + $0x30] sm:$0xff] %v790_v18  ;;  %v421_v26 = vadd.f32 %v1290_v35, %v420_v22  ;;  %v549_v27 = vadd.f32 %v1290_v35, %v548_v23 }
  0xf0   :  { %886 = vst [vmem:[%s1551_s3 + $0x130] sm:$0xff] %v822_v19  ;;  %v788_v24 = vsel %vm660_vm11, %v418_v10, %v724_v16  ;;  %v820_v25 = vsel %vm692_vm12, %v546_v11, %v756_v17  ;;  %vm663_vm13 = vcmp.ge.f32.partialorder %v429_v20, 0.0  ;;  %v727_v28 = vmul.f32 0.2, %v429_v20 }
  0xf1   :  { %852 = vst [vmem:[%s1551_s3 + $0x20] sm:$0xff] %v788_v24  ;;  %884 = vst [vmem:[%s1551_s3 + $0x120] sm:$0xff] %v820_v25  ;;  %vm695_vm14 = vcmp.ge.f32.partialorder %v557_v21, 0.0  ;;  %v759_v29 = vmul.f32 0.2, %v557_v21  ;;  %vm661_vm15 = vcmp.ge.f32.partialorder %v421_v26, 0.0 }
  0xf2   :  { %v725_v30 = vmul.f32 0.2, %v421_v26  ;;  %vm693_vm0 = vcmp.ge.f32.partialorder %v549_v27, 0.0  ;;  %v757_v31 = vmul.f32 0.2, %v549_v27  ;;  %v791_v32 = vsel %vm663_vm13, %v429_v20, %v727_v28  ;;  %v1035_v34 = vpop.f32.mrb[8].mxu0 }
  0xf3   :  { %v823_v33 = vsel %vm695_vm14, %v557_v21, %v759_v29  ;;  %v1067_v36 = vpop.f32.mrb[8].mxu1  ;;  %855 = vst [vmem:[%s1551_s3 + $0x38] sm:$0xff] %v791_v32  ;;  %v442_v39 = vadd.f32 %v1035_v34, %v1290_v35  ;;  %v433_v41 = vpop.f32.mrb[9].mxu0 }
  0xf4   :  { %887 = vst [vmem:[%s1551_s3 + $0x138] sm:$0xff] %v823_v33  ;;  %v789_v37 = vsel %vm661_vm15, %v421_v26, %v725_v30  ;;  %v821_v38 = vsel %vm693_vm0, %v549_v27, %v757_v31  ;;  %v570_v40 = vadd.f32 %v1067_v36, %v1290_v35  ;;  %v561_v42 = vpop.f32.mrb[9].mxu1  ;;  %v434_v43 = vadd.f32 %v1290_v35, %v433_v41  ;;  %v1036_v45 = vpop.f32.mrb[10].mxu0 }
  0xf5   :  { %853 = vst [vmem:[%s1551_s3 + $0x28] sm:$0xff] %v789_v37  ;;  %885 = vst [vmem:[%s1551_s3 + $0x128] sm:$0xff] %v821_v38  ;;  %v562_v44 = vadd.f32 %v1290_v35, %v561_v42  ;;  %v1068_v46 = vpop.f32.mrb[10].mxu1  ;;  %vm666_vm1 = vcmp.ge.f32.partialorder %v442_v39, 0.0  ;;  %v730_v47 = vmul.f32 0.2, %v442_v39  ;;  %v445_v53 = vadd.f32 %v1036_v45, %v1290_v35 }
  0xf6   :  { %vm698_vm2 = vcmp.ge.f32.partialorder %v570_v40, 0.0  ;;  %v762_v48 = vmul.f32 0.2, %v570_v40  ;;  %vm664_vm3 = vcmp.ge.f32.partialorder %v434_v43, 0.0  ;;  %v728_v49 = vmul.f32 0.2, %v434_v43 }
  0xf7   :  { %vm696_vm4 = vcmp.ge.f32.partialorder %v562_v44, 0.0  ;;  %v760_v50 = vmul.f32 0.2, %v562_v44  ;;  %v794_v51 = vsel %vm666_vm1, %v442_v39, %v730_v47  ;;  %v573_v54 = vadd.f32 %v1068_v46, %v1290_v35  ;;  %v436_v55 = vpop.f32.mrb[11].mxu0  ;;  %v564_v56 = vpop.f32.mrb[11].mxu1 }
  0xf8   :  { %v826_v52 = vsel %vm698_vm2, %v570_v40, %v762_v48  ;;  %858 = vst [vmem:[%s1551_s3 + $0x50] sm:$0xff] %v794_v51  ;;  %v792_v57 = vsel %vm664_vm3, %v434_v43, %v728_v49  ;;  %v437_v59 = vadd.f32 %v1290_v35, %v436_v55  ;;  %v565_v60 = vadd.f32 %v1290_v35, %v564_v56 }
  0xf9   :  { %890 = vst [vmem:[%s1551_s3 + $0x150] sm:$0xff] %v826_v52  ;;  %v824_v58 = vsel %vm696_vm4, %v562_v44, %v760_v50  ;;  %v1039_v61 = vpop.f32.mrb[12].mxu0  ;;  %v1071_v62 = vpop.f32.mrb[12].mxu1  ;;  %856 = vst [vmem:[%s1551_s3 + $0x40] sm:$0xff] %v792_v57  ;;  %vm667_vm5 = vcmp.ge.f32.partialorder %v445_v53, 0.0  ;;  %vm699_vm6 = vcmp.ge.f32.partialorder %v573_v54, 0.0 }
  0xfa   :  { %888 = vst [vmem:[%s1551_s3 + $0x140] sm:$0xff] %v824_v58  ;;  %v731_v63 = vmul.f32 0.2, %v445_v53  ;;  %v763_v0 = vmul.f32 0.2, %v573_v54  ;;  %vm665_vm7 = vcmp.ge.f32.partialorder %v437_v59, 0.0  ;;  %v458_v5 = vadd.f32 %v1039_v61, %v1290_v35 }
  0xfb   :  { %v729_v1 = vmul.f32 0.2, %v437_v59  ;;  %vm697_vm8 = vcmp.ge.f32.partialorder %v565_v60, 0.0  ;;  %v761_v2 = vmul.f32 0.2, %v565_v60  ;;  %v586_v6 = vadd.f32 %v1071_v62, %v1290_v35  ;;  %v449_v7 = vpop.f32.mrb[13].mxu0 }
  0xfc   :  { %v795_v3 = vsel %vm667_vm5, %v445_v53, %v731_v63  ;;  %v827_v4 = vsel %vm699_vm6, %v573_v54, %v763_v0  ;;  %v577_v8 = vpop.f32.mrb[13].mxu1  ;;  %v450_v11 = vadd.f32 %v1290_v35, %v449_v7  ;;  %v1040_v13 = vpop.f32.mrb[14].mxu0  ;;  %vm670_vm9 = vcmp.ge.f32.partialorder %v458_v5, 0.0 }
  0xfd   :  { %859 = vst [vmem:[%s1551_s3 + $0x58] sm:$0xff] %v795_v3  ;;  %891 = vst [vmem:[%s1551_s3 + $0x158] sm:$0xff] %v827_v4  ;;  %v793_v9 = vsel %vm665_vm7, %v437_v59, %v729_v1  ;;  %v825_v10 = vsel %vm697_vm8, %v565_v60, %v761_v2  ;;  %v578_v12 = vadd.f32 %v1290_v35, %v577_v8  ;;  %v1072_v14 = vpop.f32.mrb[14].mxu1  ;;  %v734_v15 = vmul.f32 0.2, %v458_v5  ;;  %v452_v23 = vpop.f32.mrb[15].mxu0 }
  0xfe   :  { %857 = vst [vmem:[%s1551_s3 + $0x48] sm:$0xff] %v793_v9  ;;  %889 = vst [vmem:[%s1551_s3 + $0x148] sm:$0xff] %v825_v10  ;;  %vm702_vm10 = vcmp.ge.f32.partialorder %v586_v6, 0.0  ;;  %v766_v16 = vmul.f32 0.2, %v586_v6  ;;  %vm668_vm11 = vcmp.ge.f32.partialorder %v450_v11, 0.0  ;;  %v461_v21 = vadd.f32 %v1040_v13, %v1290_v35 }
  0xff   :  { %v732_v17 = vmul.f32 0.2, %v450_v11  ;;  %vm700_vm12 = vcmp.ge.f32.partialorder %v578_v12, 0.0  ;;  %v764_v18 = vmul.f32 0.2, %v578_v12  ;;  %v798_v19 = vsel %vm670_vm9, %v458_v5, %v734_v15  ;;  %v580_v24 = vpop.f32.mrb[15].mxu1 }
 0x100   :  { %v830_v20 = vsel %vm702_vm10, %v586_v6, %v766_v16  ;;  %v589_v22 = vadd.f32 %v1072_v14, %v1290_v35  ;;  %862 = vst [vmem:[%s1551_s3 + $0x70] sm:$0xff] %v798_v19  ;;  %v453_v27 = vadd.f32 %v1290_v35, %v452_v23  ;;  %v581_v28 = vadd.f32 %v1290_v35, %v580_v24 }
 0x101   :  { %894 = vst [vmem:[%s1551_s3 + $0x170] sm:$0xff] %v830_v20  ;;  %v796_v25 = vsel %vm668_vm11, %v450_v11, %v732_v17  ;;  %v828_v26 = vsel %vm700_vm12, %v578_v12, %v764_v18  ;;  %v1043_v29 = vpop.f32.mrb[16].mxu0  ;;  %v1075_v30 = vpop.f32.mrb[16].mxu1  ;;  %vm671_vm13 = vcmp.ge.f32.partialorder %v461_v21, 0.0  ;;  %v735_v31 = vmul.f32 0.2, %v461_v21 }
 0x102   :  { %860 = vst [vmem:[%s1551_s3 + $0x60] sm:$0xff] %v796_v25  ;;  %892 = vst [vmem:[%s1551_s3 + $0x160] sm:$0xff] %v828_v26  ;;  %vm703_vm14 = vcmp.ge.f32.partialorder %v589_v22, 0.0  ;;  %v767_v32 = vmul.f32 0.2, %v589_v22  ;;  %vm669_vm15 = vcmp.ge.f32.partialorder %v453_v27, 0.0  ;;  %v474_v38 = vadd.f32 %v1043_v29, %v1290_v35 }
 0x103   :  { %v733_v33 = vmul.f32 0.2, %v453_v27  ;;  %vm701_vm0 = vcmp.ge.f32.partialorder %v581_v28, 0.0  ;;  %v765_v34 = vmul.f32 0.2, %v581_v28  ;;  %v799_v36 = vsel %vm671_vm13, %v461_v21, %v735_v31  ;;  %v465_v40 = vpop.f32.mrb[17].mxu0 }
 0x104   :  { %v831_v37 = vsel %vm703_vm14, %v589_v22, %v767_v32  ;;  %v602_v39 = vadd.f32 %v1075_v30, %v1290_v35  ;;  %v593_v41 = vpop.f32.mrb[17].mxu1  ;;  %863 = vst [vmem:[%s1551_s3 + $0x78] sm:$0xff] %v799_v36  ;;  %v466_v44 = vadd.f32 %v1290_v35, %v465_v40  ;;  %v1044_v46 = vpop.f32.mrb[18].mxu0  ;;  %vm674_vm1 = vcmp.ge.f32.partialorder %v474_v38, 0.0 }
 0x105   :  { %895 = vst [vmem:[%s1551_s3 + $0x178] sm:$0xff] %v831_v37  ;;  %v797_v42 = vsel %vm669_vm15, %v453_v27, %v733_v33  ;;  %v829_v43 = vsel %vm701_vm0, %v581_v28, %v765_v34  ;;  %v594_v45 = vadd.f32 %v1290_v35, %v593_v41  ;;  %v1076_v47 = vpop.f32.mrb[18].mxu1  ;;  %v738_v48 = vmul.f32 0.2, %v474_v38  ;;  %v468_v56 = vpop.f32.mrb[19].mxu0 }
 0x106   :  { %861 = vst [vmem:[%s1551_s3 + $0x68] sm:$0xff] %v797_v42  ;;  %893 = vst [vmem:[%s1551_s3 + $0x168] sm:$0xff] %v829_v43  ;;  %vm706_vm2 = vcmp.ge.f32.partialorder %v602_v39, 0.0  ;;  %v770_v49 = vmul.f32 0.2, %v602_v39  ;;  %vm672_vm3 = vcmp.ge.f32.partialorder %v466_v44, 0.0  ;;  %v477_v54 = vadd.f32 %v1044_v46, %v1290_v35 }
 0x107   :  { %v736_v50 = vmul.f32 0.2, %v466_v44  ;;  %vm704_vm4 = vcmp.ge.f32.partialorder %v594_v45, 0.0  ;;  %v768_v51 = vmul.f32 0.2, %v594_v45  ;;  %v802_v52 = vsel %vm674_vm1, %v474_v38, %v738_v48  ;;  %v596_v57 = vpop.f32.mrb[19].mxu1 }
 0x108   :  { %v834_v53 = vsel %vm706_vm2, %v602_v39, %v770_v49  ;;  %v605_v55 = vadd.f32 %v1076_v47, %v1290_v35  ;;  %866 = vst [vmem:[%s1551_s3 + $0x90] sm:$0xff] %v802_v52  ;;  %v469_v60 = vadd.f32 %v1290_v35, %v468_v56  ;;  %v597_v61 = vadd.f32 %v1290_v35, %v596_v57 }
 0x109   :  { %898 = vst [vmem:[%s1551_s3 + $0x190] sm:$0xff] %v834_v53  ;;  %v800_v58 = vsel %vm672_vm3, %v466_v44, %v736_v50  ;;  %v832_v59 = vsel %vm704_vm4, %v594_v45, %v768_v51  ;;  %v1047_v62 = vpop.f32.mrb[20].mxu0  ;;  %v1079_v63 = vpop.f32.mrb[20].mxu1  ;;  %vm675_vm5 = vcmp.ge.f32.partialorder %v477_v54, 0.0  ;;  %v739_v0 = vmul.f32 0.2, %v477_v54 }
 0x10a   :  { %864 = vst [vmem:[%s1551_s3 + $0x80] sm:$0xff] %v800_v58  ;;  %896 = vst [vmem:[%s1551_s3 + $0x180] sm:$0xff] %v832_v59  ;;  %vm707_vm6 = vcmp.ge.f32.partialorder %v605_v55, 0.0  ;;  %v771_v1 = vmul.f32 0.2, %v605_v55  ;;  %vm673_vm7 = vcmp.ge.f32.partialorder %v469_v60, 0.0  ;;  %v490_v6 = vadd.f32 %v1047_v62, %v1290_v35 }
 0x10b   :  { %v737_v2 = vmul.f32 0.2, %v469_v60  ;;  %vm705_vm8 = vcmp.ge.f32.partialorder %v597_v61, 0.0  ;;  %v769_v3 = vmul.f32 0.2, %v597_v61  ;;  %v803_v4 = vsel %vm675_vm5, %v477_v54, %v739_v0  ;;  %v481_v8 = vpop.f32.mrb[21].mxu0 }
 0x10c   :  { %v835_v5 = vsel %vm707_vm6, %v605_v55, %v771_v1  ;;  %v618_v7 = vadd.f32 %v1079_v63, %v1290_v35  ;;  %v609_v9 = vpop.f32.mrb[21].mxu1  ;;  %867 = vst [vmem:[%s1551_s3 + $0x98] sm:$0xff] %v803_v4  ;;  %v482_v12 = vadd.f32 %v1290_v35, %v481_v8  ;;  %v1048_v14 = vpop.f32.mrb[22].mxu0  ;;  %vm678_vm9 = vcmp.ge.f32.partialorder %v490_v6, 0.0 }
 0x10d   :  { %899 = vst [vmem:[%s1551_s3 + $0x198] sm:$0xff] %v835_v5  ;;  %v801_v10 = vsel %vm673_vm7, %v469_v60, %v737_v2  ;;  %v833_v11 = vsel %vm705_vm8, %v597_v61, %v769_v3  ;;  %v610_v13 = vadd.f32 %v1290_v35, %v609_v9  ;;  %v1080_v15 = vpop.f32.mrb[22].mxu1  ;;  %v742_v16 = vmul.f32 0.2, %v490_v6  ;;  %v484_v24 = vpop.f32.mrb[23].mxu0 }
 0x10e   :  { %865 = vst [vmem:[%s1551_s3 + $0x88] sm:$0xff] %v801_v10  ;;  %897 = vst [vmem:[%s1551_s3 + $0x188] sm:$0xff] %v833_v11  ;;  %vm710_vm10 = vcmp.ge.f32.partialorder %v618_v7, 0.0  ;;  %v774_v17 = vmul.f32 0.2, %v618_v7  ;;  %vm676_vm11 = vcmp.ge.f32.partialorder %v482_v12, 0.0  ;;  %v493_v22 = vadd.f32 %v1048_v14, %v1290_v35 }
 0x10f   :  { %v740_v18 = vmul.f32 0.2, %v482_v12  ;;  %vm708_vm12 = vcmp.ge.f32.partialorder %v610_v13, 0.0  ;;  %v772_v19 = vmul.f32 0.2, %v610_v13  ;;  %v806_v20 = vsel %vm678_vm9, %v490_v6, %v742_v16  ;;  %v612_v25 = vpop.f32.mrb[23].mxu1 }
 0x110   :  { %v838_v21 = vsel %vm710_vm10, %v618_v7, %v774_v17  ;;  %v621_v23 = vadd.f32 %v1080_v15, %v1290_v35  ;;  %870 = vst [vmem:[%s1551_s3 + $0xb0] sm:$0xff] %v806_v20  ;;  %v485_v28 = vadd.f32 %v1290_v35, %v484_v24  ;;  %v613_v29 = vadd.f32 %v1290_v35, %v612_v25 }
 0x111   :  { %902 = vst [vmem:[%s1551_s3 + $0x1b0] sm:$0xff] %v838_v21  ;;  %v804_v26 = vsel %vm676_vm11, %v482_v12, %v740_v18  ;;  %v836_v27 = vsel %vm708_vm12, %v610_v13, %v772_v19  ;;  %v1051_v30 = vpop.f32.mrb[24].mxu0  ;;  %v1083_v31 = vpop.f32.mrb[24].mxu1  ;;  %vm679_vm13 = vcmp.ge.f32.partialorder %v493_v22, 0.0  ;;  %v743_v32 = vmul.f32 0.2, %v493_v22 }
 0x112   :  { %868 = vst [vmem:[%s1551_s3 + $0xa0] sm:$0xff] %v804_v26  ;;  %900 = vst [vmem:[%s1551_s3 + $0x1a0] sm:$0xff] %v836_v27  ;;  %vm711_vm14 = vcmp.ge.f32.partialorder %v621_v23, 0.0  ;;  %v775_v33 = vmul.f32 0.2, %v621_v23  ;;  %vm677_vm15 = vcmp.ge.f32.partialorder %v485_v28, 0.0  ;;  %v506_v39 = vadd.f32 %v1051_v30, %v1290_v35 }
 0x113   :  { %v741_v34 = vmul.f32 0.2, %v485_v28  ;;  %vm709_vm0 = vcmp.ge.f32.partialorder %v613_v29, 0.0  ;;  %v773_v36 = vmul.f32 0.2, %v613_v29  ;;  %v807_v37 = vsel %vm679_vm13, %v493_v22, %v743_v32  ;;  %v497_v41 = vpop.f32.mrb[25].mxu0 }
 0x114   :  { %v839_v38 = vsel %vm711_vm14, %v621_v23, %v775_v33  ;;  %v634_v40 = vadd.f32 %v1083_v31, %v1290_v35  ;;  %v625_v42 = vpop.f32.mrb[25].mxu1  ;;  %871 = vst [vmem:[%s1551_s3 + $0xb8] sm:$0xff] %v807_v37  ;;  %v498_v45 = vadd.f32 %v1290_v35, %v497_v41  ;;  %v1052_v47 = vpop.f32.mrb[26].mxu0  ;;  %vm682_vm1 = vcmp.ge.f32.partialorder %v506_v39, 0.0 }
 0x115   :  { %903 = vst [vmem:[%s1551_s3 + $0x1b8] sm:$0xff] %v839_v38  ;;  %v805_v43 = vsel %vm677_vm15, %v485_v28, %v741_v34  ;;  %v837_v44 = vsel %vm709_vm0, %v613_v29, %v773_v36  ;;  %v626_v46 = vadd.f32 %v1290_v35, %v625_v42  ;;  %v1084_v48 = vpop.f32.mrb[26].mxu1  ;;  %v746_v49 = vmul.f32 0.2, %v506_v39  ;;  %v500_v57 = vpop.f32.mrb[27].mxu0 }
 0x116   :  { %869 = vst [vmem:[%s1551_s3 + $0xa8] sm:$0xff] %v805_v43  ;;  %901 = vst [vmem:[%s1551_s3 + $0x1a8] sm:$0xff] %v837_v44  ;;  %vm714_vm2 = vcmp.ge.f32.partialorder %v634_v40, 0.0  ;;  %v778_v50 = vmul.f32 0.2, %v634_v40  ;;  %vm680_vm3 = vcmp.ge.f32.partialorder %v498_v45, 0.0  ;;  %v509_v55 = vadd.f32 %v1052_v47, %v1290_v35 }
 0x117   :  { %v744_v51 = vmul.f32 0.2, %v498_v45  ;;  %vm712_vm4 = vcmp.ge.f32.partialorder %v626_v46, 0.0  ;;  %v776_v52 = vmul.f32 0.2, %v626_v46  ;;  %v810_v53 = vsel %vm682_vm1, %v506_v39, %v746_v49  ;;  %v628_v58 = vpop.f32.mrb[27].mxu1 }
 0x118   :  { %v842_v54 = vsel %vm714_vm2, %v634_v40, %v778_v50  ;;  %v637_v56 = vadd.f32 %v1084_v48, %v1290_v35  ;;  %874 = vst [vmem:[%s1551_s3 + $0xd0] sm:$0xff] %v810_v53  ;;  %v501_v61 = vadd.f32 %v1290_v35, %v500_v57  ;;  %v629_v62 = vadd.f32 %v1290_v35, %v628_v58 }
 0x119   :  { %906 = vst [vmem:[%s1551_s3 + $0x1d0] sm:$0xff] %v842_v54  ;;  %v808_v59 = vsel %vm680_vm3, %v498_v45, %v744_v51  ;;  %v840_v60 = vsel %vm712_vm4, %v626_v46, %v776_v52  ;;  %v1055_v63 = vpop.f32.mrb[28].mxu0  ;;  %v1087_v0 = vpop.f32.mrb[28].mxu1  ;;  %vm683_vm5 = vcmp.ge.f32.partialorder %v509_v55, 0.0  ;;  %v747_v1 = vmul.f32 0.2, %v509_v55 }
 0x11a   :  { %872 = vst [vmem:[%s1551_s3 + $0xc0] sm:$0xff] %v808_v59  ;;  %904 = vst [vmem:[%s1551_s3 + $0x1c0] sm:$0xff] %v840_v60  ;;  %vm715_vm6 = vcmp.ge.f32.partialorder %v637_v56, 0.0  ;;  %v779_v2 = vmul.f32 0.2, %v637_v56  ;;  %vm681_vm7 = vcmp.ge.f32.partialorder %v501_v61, 0.0  ;;  %v522_v7 = vadd.f32 %v1055_v63, %v1290_v35 }
 0x11b   :  { %v745_v3 = vmul.f32 0.2, %v501_v61  ;;  %vm713_vm8 = vcmp.ge.f32.partialorder %v629_v62, 0.0  ;;  %v777_v4 = vmul.f32 0.2, %v629_v62  ;;  %v811_v5 = vsel %vm683_vm5, %v509_v55, %v747_v1  ;;  %v513_v9 = vpop.f32.mrb[29].mxu0 }
 0x11c   :  { %v843_v6 = vsel %vm715_vm6, %v637_v56, %v779_v2  ;;  %v650_v8 = vadd.f32 %v1087_v0, %v1290_v35  ;;  %v641_v10 = vpop.f32.mrb[29].mxu1  ;;  %875 = vst [vmem:[%s1551_s3 + $0xd8] sm:$0xff] %v811_v5  ;;  %v514_v13 = vadd.f32 %v1290_v35, %v513_v9  ;;  %v1056_v15 = vpop.f32.mrb[30].mxu0  ;;  %vm686_vm9 = vcmp.ge.f32.partialorder %v522_v7, 0.0 }
 0x11d   :  { %907 = vst [vmem:[%s1551_s3 + $0x1d8] sm:$0xff] %v843_v6  ;;  %v809_v11 = vsel %vm681_vm7, %v501_v61, %v745_v3  ;;  %v841_v12 = vsel %vm713_vm8, %v629_v62, %v777_v4  ;;  %v642_v14 = vadd.f32 %v1290_v35, %v641_v10  ;;  %v1088_v16 = vpop.f32.mrb[30].mxu1  ;;  %v750_v17 = vmul.f32 0.2, %v522_v7  ;;  %v516_v25 = vpop.f32.mrb[31].mxu0 }
 0x11e   :  { %873 = vst [vmem:[%s1551_s3 + $0xc8] sm:$0xff] %v809_v11  ;;  %905 = vst [vmem:[%s1551_s3 + $0x1c8] sm:$0xff] %v841_v12  ;;  %vm718_vm10 = vcmp.ge.f32.partialorder %v650_v8, 0.0  ;;  %v782_v18 = vmul.f32 0.2, %v650_v8  ;;  %vm684_vm11 = vcmp.ge.f32.partialorder %v514_v13, 0.0  ;;  %v525_v23 = vadd.f32 %v1056_v15, %v1290_v35 }
 0x11f   :  { %v748_v19 = vmul.f32 0.2, %v514_v13  ;;  %vm716_vm12 = vcmp.ge.f32.partialorder %v642_v14, 0.0  ;;  %v780_v20 = vmul.f32 0.2, %v642_v14  ;;  %v814_v21 = vsel %vm686_vm9, %v522_v7, %v750_v17  ;;  %v644_v26 = vpop.f32.mrb[31].mxu1 }
 0x120   :  { %v846_v22 = vsel %vm718_vm10, %v650_v8, %v782_v18  ;;  %v653_v24 = vadd.f32 %v1088_v16, %v1290_v35  ;;  %878 = vst [vmem:[%s1551_s3 + $0xf0] sm:$0xff] %v814_v21  ;;  %v517_v29 = vadd.f32 %v1290_v35, %v516_v25  ;;  %v645_v30 = vadd.f32 %v1290_v35, %v644_v26 }
 0x121   :  { %910 = vst [vmem:[%s1551_s3 + $0x1f0] sm:$0xff] %v846_v22  ;;  %v812_v27 = vsel %vm684_vm11, %v514_v13, %v748_v19  ;;  %v844_v28 = vsel %vm716_vm12, %v642_v14, %v780_v20  ;;  %vm687_vm13 = vcmp.ge.f32.partialorder %v525_v23, 0.0  ;;  %v751_v31 = vmul.f32 0.2, %v525_v23 }
 0x122   :  { %876 = vst [vmem:[%s1551_s3 + $0xe0] sm:$0xff] %v812_v27  ;;  %908 = vst [vmem:[%s1551_s3 + $0x1e0] sm:$0xff] %v844_v28  ;;  %vm719_vm14 = vcmp.ge.f32.partialorder %v653_v24, 0.0  ;;  %v783_v32 = vmul.f32 0.2, %v653_v24  ;;  %vm685_vm15 = vcmp.ge.f32.partialorder %v517_v29, 0.0 }
 0x123   :  { %v749_v33 = vmul.f32 0.2, %v517_v29  ;;  %vm717_vm0 = vcmp.ge.f32.partialorder %v645_v30, 0.0  ;;  %v781_v34 = vmul.f32 0.2, %v645_v30  ;;  %v815_v36 = vsel %vm687_vm13, %v525_v23, %v751_v31 }
 0x124   :  { %v847_v37 = vsel %vm719_vm14, %v653_v24, %v783_v32  ;;  %879 = vst [vmem:[%s1551_s3 + $0xf8] sm:$0xff] %v815_v36 }
 0x125   :  { %911 = vst [vmem:[%s1551_s3 + $0x1f8] sm:$0xff] %v847_v37  ;;  %v813_v35 = vsel %vm685_vm15, %v517_v29, %v749_v33  ;;  %v845_v38 = vsel %vm717_vm0, %v645_v30, %v781_v34 }
 0x126   :  { %877 = vst [vmem:[%s1551_s3 + $0xe8] sm:$0xff] %v813_v35  ;;  %909 = vst [vmem:[%s1551_s3 + $0x1e8] sm:$0xff] %v845_v38 }

// kernel: discriminator_r_forward.8
= control target key start
LH: loop header
LB: loop body
LE: loop exit
PB: predicated region body
PF: predicated region fallthrough
CT: control target
= control target key end

     0   :  { %vm142_vm0 = vcmask 130048   ;;  %s808_s1 = inlined_call_operand.vmem [shape: bf16[16,128], index: 1, kind: input, shape index: {}]   ;;  %s809_s0 = inlined_call_operand.vmem [shape: bf16[256,16], index: 0, kind: input, shape index: {}]   ;;  %s810_s2 = inlined_call_operand.vmem [shape: f32[1,128], index: 2, kind: input, shape index: {}]   ;;  %s811_s3 = inlined_call_operand.vmem [shape: f32[256,128], index: 3, kind: output, shape index: {}]  }
   0x1   :  { %v571_v0 = vld [vmem:[%s808_s1] sm:$0xff]   ;;  %v574_v3 = vld [vmem:[%s809_s0 + $0x8] sm:$0xff]   ;;  %v576_v5 = vld [vmem:[%s809_s0 + $0x10] sm:$0xff]  }
   0x2   :  { %v572_v1 = vld [vmem:[%s809_s0] sm:$0xff]   ;;  %535 = vmatprep.subr.bf16.mxu0 %v571_v0  ;;  %569 = vmatprep.subr.bf16.mxu1 %v571_v0  ;;  %v575_v4 = vld [vmem:[%s809_s0 + $0x48] sm:$0xff]   ;;  %v577_v6 = vld [vmem:[%s809_s0 + $0x50] sm:$0xff]  }
   0x3   :  { %v573_v2 = vld [vmem:[%s809_s0 + $0x40] sm:$0xff]   ;;  %536 = vmatpush3.bf16.msra.mxu0 %v571_v0  ;;  %570 = vmatpush3.bf16.msra.mxu1 %v571_v0  ;;  %v578_v7 = vld [vmem:[%s809_s0 + $0x18] sm:$0xff]   ;;  %v582_v11 = vld [vmem:[%s809_s0 + $0x28] sm:$0xff]  }
   0x4   :  { %537 = vmatprep.mubr.msk.bf16.mxu0 %vm142_vm0, %v572_v1  ;;  %553 = vmatprep.mubr.msk.bf16.mxu1 %vm142_vm0, %v573_v2  ;;  %v579_v8 = vld [vmem:[%s809_s0 + $0x58] sm:$0xff]   ;;  %v580_v9 = vld [vmem:[%s809_s0 + $0x20] sm:$0xff]   ;;  %v583_v12 = vld [vmem:[%s809_s0 + $0x68] sm:$0xff]  }
   0x5   :  { %v581_v10 = vld [vmem:[%s809_s0 + $0x60] sm:$0xff]   ;;  %v584_v13 = vld [vmem:[%s809_s0 + $0x30] sm:$0xff]   ;;  %v586_v15 = vld [vmem:[%s809_s0 + $0x38] sm:$0xff]  }
   0x6   :  { %538 = vmatmul.mubr.msk.bf16.vlgmr.msra.gmra.mrb[0].mxu0 %vm142_vm0, %v574_v3  ;;  %554 = vmatmul.mubr.msk.bf16.vlgmr.msra.gmra.mrb[0].mxu1 %vm142_vm0, %v575_v4  ;;  %v585_v14 = vld [vmem:[%s809_s0 + $0x70] sm:$0xff]   ;;  %v587_v16 = vld [vmem:[%s809_s0 + $0x78] sm:$0xff]   ;;  %v678_v17 = vld [vmem:[%s810_s2] ss:$0 sm:$0xff] }
   0x7   :  { %541 = vmatprep.mubr.msk.bf16.mxu0 %vm142_vm0, %v576_v5  ;;  %557 = vmatprep.mubr.msk.bf16.mxu1 %vm142_vm0, %v577_v6 }
   0xe   :  { %542 = vmatmul.mubr.msk.bf16.gmra.mrb[4].mxu0 %vm142_vm0, %v578_v7  ;;  %558 = vmatmul.mubr.msk.bf16.gmra.mrb[4].mxu1 %vm142_vm0, %v579_v8 }
   0xf   :  { %545 = vmatprep.mubr.msk.bf16.mxu0 %vm142_vm0, %v580_v9  ;;  %561 = vmatprep.mubr.msk.bf16.mxu1 %vm142_vm0, %v581_v10 }
  0x16   :  { %546 = vmatmul.mubr.msk.bf16.gmra.mrb[8].mxu0 %vm142_vm0, %v582_v11  ;;  %562 = vmatmul.mubr.msk.bf16.gmra.mrb[8].mxu1 %vm142_vm0, %v583_v12 }
  0x17   :  { %549 = vmatprep.mubr.msk.bf16.mxu0 %vm142_vm0, %v584_v13  ;;  %565 = vmatprep.mubr.msk.bf16.mxu1 %vm142_vm0, %v585_v14 }
  0x1e   :  { %550 = vmatmul.mubr.msk.bf16.gmra.mrb[12].mxu0 %vm142_vm0, %v586_v15  ;;  %566 = vmatmul.mubr.msk.bf16.gmra.mrb[12].mxu1 %vm142_vm0, %v587_v16 }
  0xd9   :  { %v539_v18 = vpop.f32.mrb[0].mxu0  ;;  %v555_v19 = vpop.f32.mrb[0].mxu1 }
  0xda   :  { %v234_v20 = vadd.f32 %v539_v18, %v678_v17  ;;  %v298_v21 = vadd.f32 %v555_v19, %v678_v17  ;;  %v225_v22 = vpop.f32.mrb[1].mxu0  ;;  %v289_v23 = vpop.f32.mrb[1].mxu1 }
  0xdb   :  { %v226_v24 = vadd.f32 %v678_v17, %v225_v22  ;;  %v290_v25 = vadd.f32 %v678_v17, %v289_v23  ;;  %v540_v26 = vpop.f32.mrb[2].mxu0  ;;  %v556_v27 = vpop.f32.mrb[2].mxu1 }
  0xdc   :  { %vm354_vm1 = vcmp.ge.f32.partialorder %v234_v20, 0.0  ;;  %v386_v28 = vmul.f32 0.2, %v234_v20  ;;  %vm370_vm2 = vcmp.ge.f32.partialorder %v298_v21, 0.0  ;;  %v402_v29 = vmul.f32 0.2, %v298_v21 }
  0xdd   :  { %vm352_vm3 = vcmp.ge.f32.partialorder %v226_v24, 0.0  ;;  %v384_v30 = vmul.f32 0.2, %v226_v24  ;;  %vm368_vm4 = vcmp.ge.f32.partialorder %v290_v25, 0.0  ;;  %v400_v31 = vmul.f32 0.2, %v290_v25 }
  0xde   :  { %v418_v32 = vsel %vm354_vm1, %v234_v20, %v386_v28  ;;  %v434_v33 = vsel %vm370_vm2, %v298_v21, %v402_v29  ;;  %v237_v34 = vadd.f32 %v540_v26, %v678_v17  ;;  %v301_v35 = vadd.f32 %v556_v27, %v678_v17  ;;  %v228_v36 = vpop.f32.mrb[3].mxu0  ;;  %v292_v37 = vpop.f32.mrb[3].mxu1 }
  0xdf   :  { %450 = vst [vmem:[%s811_s3 + $0x10] sm:$0xff] %v418_v32  ;;  %466 = vst [vmem:[%s811_s3 + $0x90] sm:$0xff] %v434_v33  ;;  %v416_v38 = vsel %vm352_vm3, %v226_v24, %v384_v30  ;;  %v432_v39 = vsel %vm368_vm4, %v290_v25, %v400_v31  ;;  %v229_v40 = vadd.f32 %v678_v17, %v228_v36 }
  0xe0   :  { %v293_v41 = vadd.f32 %v678_v17, %v292_v37  ;;  %448 = vst [vmem:[%s811_s3] sm:$0xff] %v416_v38  ;;  %464 = vst [vmem:[%s811_s3 + $0x80] sm:$0xff] %v432_v39  ;;  %vm355_vm5 = vcmp.ge.f32.partialorder %v237_v34, 0.0  ;;  %v387_v42 = vmul.f32 0.2, %v237_v34  ;;  %vm371_vm6 = vcmp.ge.f32.partialorder %v301_v35, 0.0 }
  0xe1   :  { %v403_v43 = vmul.f32 0.2, %v301_v35  ;;  %vm353_vm7 = vcmp.ge.f32.partialorder %v229_v40, 0.0  ;;  %v385_v44 = vmul.f32 0.2, %v229_v40  ;;  %v543_v48 = vpop.f32.mrb[4].mxu0 }
  0xe2   :  { %vm369_vm8 = vcmp.ge.f32.partialorder %v293_v41, 0.0  ;;  %v401_v45 = vmul.f32 0.2, %v293_v41  ;;  %v419_v46 = vsel %vm355_vm5, %v237_v34, %v387_v42  ;;  %v559_v49 = vpop.f32.mrb[4].mxu1  ;;  %v250_v52 = vadd.f32 %v543_v48, %v678_v17  ;;  %v241_v54 = vpop.f32.mrb[5].mxu0 }
  0xe3   :  { %v435_v47 = vsel %vm371_vm6, %v301_v35, %v403_v43  ;;  %451 = vst [vmem:[%s811_s3 + $0x18] sm:$0xff] %v419_v46  ;;  %v417_v50 = vsel %vm353_vm7, %v229_v40, %v385_v44  ;;  %v314_v53 = vadd.f32 %v559_v49, %v678_v17  ;;  %v305_v55 = vpop.f32.mrb[5].mxu1  ;;  %v242_v56 = vadd.f32 %v678_v17, %v241_v54  ;;  %v544_v58 = vpop.f32.mrb[6].mxu0 }
  0xe4   :  { %467 = vst [vmem:[%s811_s3 + $0x98] sm:$0xff] %v435_v47  ;;  %v433_v51 = vsel %vm369_vm8, %v293_v41, %v401_v45  ;;  %449 = vst [vmem:[%s811_s3 + $0x8] sm:$0xff] %v417_v50  ;;  %v306_v57 = vadd.f32 %v678_v17, %v305_v55  ;;  %v560_v59 = vpop.f32.mrb[6].mxu1  ;;  %vm358_vm9 = vcmp.ge.f32.partialorder %v250_v52, 0.0  ;;  %v390_v60 = vmul.f32 0.2, %v250_v52 }
  0xe5   :  { %465 = vst [vmem:[%s811_s3 + $0x88] sm:$0xff] %v433_v51  ;;  %vm374_vm10 = vcmp.ge.f32.partialorder %v314_v53, 0.0  ;;  %v406_v61 = vmul.f32 0.2, %v314_v53  ;;  %vm356_vm11 = vcmp.ge.f32.partialorder %v242_v56, 0.0  ;;  %v253_v2 = vadd.f32 %v544_v58, %v678_v17  ;;  %v244_v4 = vpop.f32.mrb[7].mxu0 }
  0xe6   :  { %v388_v62 = vmul.f32 0.2, %v242_v56  ;;  %vm372_vm12 = vcmp.ge.f32.partialorder %v306_v57, 0.0  ;;  %v404_v63 = vmul.f32 0.2, %v306_v57  ;;  %v422_v0 = vsel %vm358_vm9, %v250_v52, %v390_v60  ;;  %v308_v5 = vpop.f32.mrb[7].mxu1 }
  0xe7   :  { %v438_v1 = vsel %vm374_vm10, %v314_v53, %v406_v61  ;;  %v317_v3 = vadd.f32 %v560_v59, %v678_v17  ;;  %454 = vst [vmem:[%s811_s3 + $0x30] sm:$0xff] %v422_v0  ;;  %v245_v8 = vadd.f32 %v678_v17, %v244_v4  ;;  %v309_v9 = vadd.f32 %v678_v17, %v308_v5 }
  0xe8   :  { %470 = vst [vmem:[%s811_s3 + $0xb0] sm:$0xff] %v438_v1  ;;  %v420_v6 = vsel %vm356_vm11, %v242_v56, %v388_v62  ;;  %v436_v7 = vsel %vm372_vm12, %v306_v57, %v404_v63  ;;  %vm359_vm13 = vcmp.ge.f32.partialorder %v253_v2, 0.0  ;;  %v391_v10 = vmul.f32 0.2, %v253_v2 }
  0xe9   :  { %452 = vst [vmem:[%s811_s3 + $0x20] sm:$0xff] %v420_v6  ;;  %468 = vst [vmem:[%s811_s3 + $0xa0] sm:$0xff] %v436_v7  ;;  %vm375_vm14 = vcmp.ge.f32.partialorder %v317_v3, 0.0  ;;  %v407_v11 = vmul.f32 0.2, %v317_v3  ;;  %vm357_vm15 = vcmp.ge.f32.partialorder %v245_v8, 0.0 }
  0xea   :  { %v389_v12 = vmul.f32 0.2, %v245_v8  ;;  %vm373_vm0 = vcmp.ge.f32.partialorder %v309_v9, 0.0  ;;  %v405_v13 = vmul.f32 0.2, %v309_v9  ;;  %v423_v14 = vsel %vm359_vm13, %v253_v2, %v391_v10  ;;  %v547_v16 = vpop.f32.mrb[8].mxu0 }
  0xeb   :  { %v439_v15 = vsel %vm375_vm14, %v317_v3, %v407_v11  ;;  %v563_v18 = vpop.f32.mrb[8].mxu1  ;;  %455 = vst [vmem:[%s811_s3 + $0x38] sm:$0xff] %v423_v14  ;;  %v266_v21 = vadd.f32 %v547_v16, %v678_v17  ;;  %v257_v23 = vpop.f32.mrb[9].mxu0 }
  0xec   :  { %471 = vst [vmem:[%s811_s3 + $0xb8] sm:$0xff] %v439_v15  ;;  %v421_v19 = vsel %vm357_vm15, %v245_v8, %v389_v12  ;;  %v437_v20 = vsel %vm373_vm0, %v309_v9, %v405_v13  ;;  %v330_v22 = vadd.f32 %v563_v18, %v678_v17  ;;  %v321_v24 = vpop.f32.mrb[9].mxu1  ;;  %v258_v25 = vadd.f32 %v678_v17, %v257_v23  ;;  %v548_v27 = vpop.f32.mrb[10].mxu0 }
  0xed   :  { %453 = vst [vmem:[%s811_s3 + $0x28] sm:$0xff] %v421_v19  ;;  %469 = vst [vmem:[%s811_s3 + $0xa8] sm:$0xff] %v437_v20  ;;  %v322_v26 = vadd.f32 %v678_v17, %v321_v24  ;;  %v564_v28 = vpop.f32.mrb[10].mxu1  ;;  %vm362_vm1 = vcmp.ge.f32.partialorder %v266_v21, 0.0  ;;  %v394_v29 = vmul.f32 0.2, %v266_v21  ;;  %v269_v35 = vadd.f32 %v548_v27, %v678_v17 }
  0xee   :  { %vm378_vm2 = vcmp.ge.f32.partialorder %v330_v22, 0.0  ;;  %v410_v30 = vmul.f32 0.2, %v330_v22  ;;  %vm360_vm3 = vcmp.ge.f32.partialorder %v258_v25, 0.0  ;;  %v392_v31 = vmul.f32 0.2, %v258_v25 }
  0xef   :  { %vm376_vm4 = vcmp.ge.f32.partialorder %v322_v26, 0.0  ;;  %v408_v32 = vmul.f32 0.2, %v322_v26  ;;  %v426_v33 = vsel %vm362_vm1, %v266_v21, %v394_v29  ;;  %v333_v36 = vadd.f32 %v564_v28, %v678_v17  ;;  %v260_v37 = vpop.f32.mrb[11].mxu0  ;;  %v324_v38 = vpop.f32.mrb[11].mxu1 }
  0xf0   :  { %v442_v34 = vsel %vm378_vm2, %v330_v22, %v410_v30  ;;  %458 = vst [vmem:[%s811_s3 + $0x50] sm:$0xff] %v426_v33  ;;  %v424_v39 = vsel %vm360_vm3, %v258_v25, %v392_v31  ;;  %v261_v41 = vadd.f32 %v678_v17, %v260_v37  ;;  %v325_v42 = vadd.f32 %v678_v17, %v324_v38 }
  0xf1   :  { %474 = vst [vmem:[%s811_s3 + $0xd0] sm:$0xff] %v442_v34  ;;  %v440_v40 = vsel %vm376_vm4, %v322_v26, %v408_v32  ;;  %v551_v43 = vpop.f32.mrb[12].mxu0  ;;  %v567_v44 = vpop.f32.mrb[12].mxu1  ;;  %456 = vst [vmem:[%s811_s3 + $0x40] sm:$0xff] %v424_v39  ;;  %vm363_vm5 = vcmp.ge.f32.partialorder %v269_v35, 0.0  ;;  %vm379_vm6 = vcmp.ge.f32.partialorder %v333_v36, 0.0 }
  0xf2   :  { %472 = vst [vmem:[%s811_s3 + $0xc0] sm:$0xff] %v440_v40  ;;  %v395_v45 = vmul.f32 0.2, %v269_v35  ;;  %v411_v46 = vmul.f32 0.2, %v333_v36  ;;  %vm361_vm7 = vcmp.ge.f32.partialorder %v261_v41, 0.0  ;;  %v282_v51 = vadd.f32 %v551_v43, %v678_v17 }
  0xf3   :  { %v393_v47 = vmul.f32 0.2, %v261_v41  ;;  %vm377_vm8 = vcmp.ge.f32.partialorder %v325_v42, 0.0  ;;  %v409_v48 = vmul.f32 0.2, %v325_v42  ;;  %v346_v52 = vadd.f32 %v567_v44, %v678_v17  ;;  %v273_v53 = vpop.f32.mrb[13].mxu0 }
  0xf4   :  { %v427_v49 = vsel %vm363_vm5, %v269_v35, %v395_v45  ;;  %v443_v50 = vsel %vm379_vm6, %v333_v36, %v411_v46  ;;  %v337_v54 = vpop.f32.mrb[13].mxu1  ;;  %v274_v57 = vadd.f32 %v678_v17, %v273_v53  ;;  %v552_v59 = vpop.f32.mrb[14].mxu0  ;;  %vm366_vm9 = vcmp.ge.f32.partialorder %v282_v51, 0.0 }
  0xf5   :  { %459 = vst [vmem:[%s811_s3 + $0x58] sm:$0xff] %v427_v49  ;;  %475 = vst [vmem:[%s811_s3 + $0xd8] sm:$0xff] %v443_v50  ;;  %v425_v55 = vsel %vm361_vm7, %v261_v41, %v393_v47  ;;  %v441_v56 = vsel %vm377_vm8, %v325_v42, %v409_v48  ;;  %v338_v58 = vadd.f32 %v678_v17, %v337_v54  ;;  %v568_v60 = vpop.f32.mrb[14].mxu1  ;;  %v398_v61 = vmul.f32 0.2, %v282_v51  ;;  %v276_v5 = vpop.f32.mrb[15].mxu0 }
  0xf6   :  { %457 = vst [vmem:[%s811_s3 + $0x48] sm:$0xff] %v425_v55  ;;  %473 = vst [vmem:[%s811_s3 + $0xc8] sm:$0xff] %v441_v56  ;;  %vm382_vm10 = vcmp.ge.f32.partialorder %v346_v52, 0.0  ;;  %v414_v62 = vmul.f32 0.2, %v346_v52  ;;  %vm364_vm11 = vcmp.ge.f32.partialorder %v274_v57, 0.0  ;;  %v285_v3 = vadd.f32 %v552_v59, %v678_v17 }
  0xf7   :  { %v396_v63 = vmul.f32 0.2, %v274_v57  ;;  %vm380_vm12 = vcmp.ge.f32.partialorder %v338_v58, 0.0  ;;  %v412_v0 = vmul.f32 0.2, %v338_v58  ;;  %v430_v1 = vsel %vm366_vm9, %v282_v51, %v398_v61  ;;  %v340_v6 = vpop.f32.mrb[15].mxu1 }
  0xf8   :  { %v446_v2 = vsel %vm382_vm10, %v346_v52, %v414_v62  ;;  %v349_v4 = vadd.f32 %v568_v60, %v678_v17  ;;  %462 = vst [vmem:[%s811_s3 + $0x70] sm:$0xff] %v430_v1  ;;  %v277_v9 = vadd.f32 %v678_v17, %v276_v5  ;;  %v341_v10 = vadd.f32 %v678_v17, %v340_v6 }
  0xf9   :  { %478 = vst [vmem:[%s811_s3 + $0xf0] sm:$0xff] %v446_v2  ;;  %v428_v7 = vsel %vm364_vm11, %v274_v57, %v396_v63  ;;  %v444_v8 = vsel %vm380_vm12, %v338_v58, %v412_v0  ;;  %vm367_vm13 = vcmp.ge.f32.partialorder %v285_v3, 0.0  ;;  %v399_v11 = vmul.f32 0.2, %v285_v3 }
  0xfa   :  { %460 = vst [vmem:[%s811_s3 + $0x60] sm:$0xff] %v428_v7  ;;  %476 = vst [vmem:[%s811_s3 + $0xe0] sm:$0xff] %v444_v8  ;;  %vm383_vm14 = vcmp.ge.f32.partialorder %v349_v4, 0.0  ;;  %v415_v12 = vmul.f32 0.2, %v349_v4  ;;  %vm365_vm15 = vcmp.ge.f32.partialorder %v277_v9, 0.0 }
  0xfb   :  { %v397_v13 = vmul.f32 0.2, %v277_v9  ;;  %vm381_vm0 = vcmp.ge.f32.partialorder %v341_v10, 0.0  ;;  %v413_v14 = vmul.f32 0.2, %v341_v10  ;;  %v431_v15 = vsel %vm367_vm13, %v285_v3, %v399_v11 }
  0xfc   :  { %v447_v16 = vsel %vm383_vm14, %v349_v4, %v415_v12  ;;  %463 = vst [vmem:[%s811_s3 + $0x78] sm:$0xff] %v431_v15 }
  0xfd   :  { %479 = vst [vmem:[%s811_s3 + $0xf8] sm:$0xff] %v447_v16  ;;  %v429_v17 = vsel %vm365_vm15, %v277_v9, %v397_v13  ;;  %v445_v18 = vsel %vm381_vm0, %v341_v10, %v413_v14 }
  0xfe   :  { %461 = vst [vmem:[%s811_s3 + $0x68] sm:$0xff] %v429_v17  ;;  %477 = vst [vmem:[%s811_s3 + $0xe8] sm:$0xff] %v445_v18 }

// kernel: discriminator_r_forward.9
= control target key start
LH: loop header
LB: loop body
LE: loop exit
PB: predicated region body
PF: predicated region fallthrough
CT: control target
= control target key end

     0   :  { %vm150_vm0 = vcmask 261120   ;;  %s826_s1 = inlined_call_operand.vmem [shape: bf16[32,128], index: 1, kind: input, shape index: {}]   ;;  %s827_s0 = inlined_call_operand.vmem [shape: bf16[256,32], index: 0, kind: input, shape index: {}]   ;;  %s828_s2 = inlined_call_operand.vmem [shape: f32[1,128], index: 2, kind: input, shape index: {}]   ;;  %s829_s3 = inlined_call_operand.vmem [shape: f32[256,128], index: 3, kind: output, shape index: {}]  }
   0x1   :  { %v585_v0 = vld [vmem:[%s826_s1] sm:$0xff]   ;;  %v586_v1 = vld [vmem:[%s826_s1 + $0x8] sm:$0xff]   ;;  %v591_v6 = vld [vmem:[%s827_s0 + $0x10] sm:$0xff]  }
   0x2   :  { %545 = vmatprep.subr.bf16.mxu0 %v585_v0  ;;  %581 = vmatprep.subr.bf16.mxu1 %v585_v0  ;;  %v587_v2 = vld [vmem:[%s827_s0] sm:$0xff]   ;;  %v589_v4 = vld [vmem:[%s827_s0 + $0x8] sm:$0xff]   ;;  %v592_v7 = vld [vmem:[%s827_s0 + $0x50] sm:$0xff]  }
   0x3   :  { %546 = vmatpush3.bf16.msra.mxu0 %v585_v0  ;;  %583 = vmatpush3.bf16.msra.mxu1 %v585_v0  ;;  %v588_v3 = vld [vmem:[%s827_s0 + $0x40] sm:$0xff]   ;;  %v590_v5 = vld [vmem:[%s827_s0 + $0x48] sm:$0xff]   ;;  %v593_v8 = vld [vmem:[%s827_s0 + $0x18] sm:$0xff]  }
   0x4   :  { %547 = vmatprep.subr.bf16.mxu0 %v586_v1  ;;  %582 = vmatprep.subr.bf16.mxu1 %v586_v1  ;;  %v594_v9 = vld [vmem:[%s827_s0 + $0x58] sm:$0xff]   ;;  %v595_v10 = vld [vmem:[%s827_s0 + $0x20] sm:$0xff]   ;;  %v597_v12 = vld [vmem:[%s827_s0 + $0x28] sm:$0xff]  }
   0x5   :  { %549 = vmatprep.mubr.msk.bf16.mxu0 %vm150_vm0, %v587_v2  ;;  %565 = vmatprep.mubr.msk.bf16.mxu1 %vm150_vm0, %v588_v3  ;;  %v596_v11 = vld [vmem:[%s827_s0 + $0x60] sm:$0xff]   ;;  %v598_v13 = vld [vmem:[%s827_s0 + $0x68] sm:$0xff]   ;;  %v599_v14 = vld [vmem:[%s827_s0 + $0x30] sm:$0xff]  }
   0x6   :  { %v600_v15 = vld [vmem:[%s827_s0 + $0x70] sm:$0xff]   ;;  %v601_v16 = vld [vmem:[%s827_s0 + $0x38] sm:$0xff]   ;;  %v696_v18 = vld [vmem:[%s828_s2] ss:$0 sm:$0xff] }
   0x7   :  { %548 = vmatpush3.bf16.msra.mxu0 %v586_v1  ;;  %584 = vmatpush3.bf16.msra.mxu1 %v586_v1  ;;  %v602_v17 = vld [vmem:[%s827_s0 + $0x78] sm:$0xff]  }
   0xa   :  { %550 = vmatmul.mubr.msk.bf16.vlgmr.msra.gmra.mrb[0].mxu0 %vm150_vm0, %v589_v4  ;;  %566 = vmatmul.mubr.msk.bf16.vlgmr.msra.gmra.mrb[0].mxu1 %vm150_vm0, %v590_v5 }
   0xb   :  { %553 = vmatprep.mubr.msk.bf16.mxu0 %vm150_vm0, %v591_v6  ;;  %569 = vmatprep.mubr.msk.bf16.mxu1 %vm150_vm0, %v592_v7 }
  0x12   :  { %554 = vmatmul.mubr.msk.bf16.gmra.mrb[4].mxu0 %vm150_vm0, %v593_v8  ;;  %570 = vmatmul.mubr.msk.bf16.gmra.mrb[4].mxu1 %vm150_vm0, %v594_v9 }
  0x13   :  { %557 = vmatprep.mubr.msk.bf16.mxu0 %vm150_vm0, %v595_v10  ;;  %573 = vmatprep.mubr.msk.bf16.mxu1 %vm150_vm0, %v596_v11 }
  0x1a   :  { %558 = vmatmul.mubr.msk.bf16.gmra.mrb[8].mxu0 %vm150_vm0, %v597_v12  ;;  %574 = vmatmul.mubr.msk.bf16.gmra.mrb[8].mxu1 %vm150_vm0, %v598_v13 }
  0x1b   :  { %561 = vmatprep.mubr.msk.bf16.mxu0 %vm150_vm0, %v599_v14  ;;  %577 = vmatprep.mubr.msk.bf16.mxu1 %vm150_vm0, %v600_v15 }
  0x22   :  { %562 = vmatmul.mubr.msk.bf16.gmra.mrb[12].mxu0 %vm150_vm0, %v601_v16  ;;  %578 = vmatmul.mubr.msk.bf16.gmra.mrb[12].mxu1 %vm150_vm0, %v602_v17 }
  0xdd   :  { %v551_v19 = vpop.f32.mrb[0].mxu0  ;;  %v567_v20 = vpop.f32.mrb[0].mxu1 }
  0xde   :  { %v242_v21 = vadd.f32 %v551_v19, %v696_v18  ;;  %v306_v22 = vadd.f32 %v567_v20, %v696_v18  ;;  %v233_v23 = vpop.f32.mrb[1].mxu0  ;;  %v297_v24 = vpop.f32.mrb[1].mxu1 }
  0xdf   :  { %v234_v25 = vadd.f32 %v696_v18, %v233_v23  ;;  %v298_v26 = vadd.f32 %v696_v18, %v297_v24  ;;  %v552_v27 = vpop.f32.mrb[2].mxu0  ;;  %v568_v28 = vpop.f32.mrb[2].mxu1 }
  0xe0   :  { %vm362_vm1 = vcmp.ge.f32.partialorder %v242_v21, 0.0  ;;  %v394_v29 = vmul.f32 0.2, %v242_v21  ;;  %vm378_vm2 = vcmp.ge.f32.partialorder %v306_v22, 0.0  ;;  %v410_v30 = vmul.f32 0.2, %v306_v22 }
  0xe1   :  { %vm360_vm3 = vcmp.ge.f32.partialorder %v234_v25, 0.0  ;;  %v392_v31 = vmul.f32 0.2, %v234_v25  ;;  %vm376_vm4 = vcmp.ge.f32.partialorder %v298_v26, 0.0  ;;  %v408_v32 = vmul.f32 0.2, %v298_v26 }
  0xe2   :  { %v426_v33 = vsel %vm362_vm1, %v242_v21, %v394_v29  ;;  %v442_v34 = vsel %vm378_vm2, %v306_v22, %v410_v30  ;;  %v245_v35 = vadd.f32 %v552_v27, %v696_v18  ;;  %v309_v36 = vadd.f32 %v568_v28, %v696_v18  ;;  %v236_v37 = vpop.f32.mrb[3].mxu0  ;;  %v300_v38 = vpop.f32.mrb[3].mxu1 }
  0xe3   :  { %458 = vst [vmem:[%s829_s3 + $0x10] sm:$0xff] %v426_v33  ;;  %474 = vst [vmem:[%s829_s3 + $0x90] sm:$0xff] %v442_v34  ;;  %v424_v39 = vsel %vm360_vm3, %v234_v25, %v392_v31  ;;  %v440_v40 = vsel %vm376_vm4, %v298_v26, %v408_v32  ;;  %v237_v41 = vadd.f32 %v696_v18, %v236_v37 }
  0xe4   :  { %v301_v42 = vadd.f32 %v696_v18, %v300_v38  ;;  %456 = vst [vmem:[%s829_s3] sm:$0xff] %v424_v39  ;;  %472 = vst [vmem:[%s829_s3 + $0x80] sm:$0xff] %v440_v40  ;;  %vm363_vm5 = vcmp.ge.f32.partialorder %v245_v35, 0.0  ;;  %v395_v43 = vmul.f32 0.2, %v245_v35  ;;  %vm379_vm6 = vcmp.ge.f32.partialorder %v309_v36, 0.0 }
  0xe5   :  { %v411_v44 = vmul.f32 0.2, %v309_v36  ;;  %vm361_vm7 = vcmp.ge.f32.partialorder %v237_v41, 0.0  ;;  %v393_v45 = vmul.f32 0.2, %v237_v41  ;;  %v555_v49 = vpop.f32.mrb[4].mxu0 }
  0xe6   :  { %vm377_vm8 = vcmp.ge.f32.partialorder %v301_v42, 0.0  ;;  %v409_v46 = vmul.f32 0.2, %v301_v42  ;;  %v427_v47 = vsel %vm363_vm5, %v245_v35, %v395_v43  ;;  %v571_v50 = vpop.f32.mrb[4].mxu1  ;;  %v258_v53 = vadd.f32 %v555_v49, %v696_v18  ;;  %v249_v55 = vpop.f32.mrb[5].mxu0 }
  0xe7   :  { %v443_v48 = vsel %vm379_vm6, %v309_v36, %v411_v44  ;;  %459 = vst [vmem:[%s829_s3 + $0x18] sm:$0xff] %v427_v47  ;;  %v425_v51 = vsel %vm361_vm7, %v237_v41, %v393_v45  ;;  %v322_v54 = vadd.f32 %v571_v50, %v696_v18  ;;  %v313_v56 = vpop.f32.mrb[5].mxu1  ;;  %v250_v57 = vadd.f32 %v696_v18, %v249_v55  ;;  %v556_v59 = vpop.f32.mrb[6].mxu0 }
  0xe8   :  { %475 = vst [vmem:[%s829_s3 + $0x98] sm:$0xff] %v443_v48  ;;  %v441_v52 = vsel %vm377_vm8, %v301_v42, %v409_v46  ;;  %457 = vst [vmem:[%s829_s3 + $0x8] sm:$0xff] %v425_v51  ;;  %v314_v58 = vadd.f32 %v696_v18, %v313_v56  ;;  %v572_v60 = vpop.f32.mrb[6].mxu1  ;;  %vm366_vm9 = vcmp.ge.f32.partialorder %v258_v53, 0.0  ;;  %v398_v61 = vmul.f32 0.2, %v258_v53 }
  0xe9   :  { %473 = vst [vmem:[%s829_s3 + $0x88] sm:$0xff] %v441_v52  ;;  %vm382_vm10 = vcmp.ge.f32.partialorder %v322_v54, 0.0  ;;  %v414_v62 = vmul.f32 0.2, %v322_v54  ;;  %vm364_vm11 = vcmp.ge.f32.partialorder %v250_v57, 0.0  ;;  %v261_v3 = vadd.f32 %v556_v59, %v696_v18  ;;  %v252_v5 = vpop.f32.mrb[7].mxu0 }
  0xea   :  { %v396_v63 = vmul.f32 0.2, %v250_v57  ;;  %vm380_vm12 = vcmp.ge.f32.partialorder %v314_v58, 0.0  ;;  %v412_v0 = vmul.f32 0.2, %v314_v58  ;;  %v430_v1 = vsel %vm366_vm9, %v258_v53, %v398_v61  ;;  %v316_v6 = vpop.f32.mrb[7].mxu1 }
  0xeb   :  { %v446_v2 = vsel %vm382_vm10, %v322_v54, %v414_v62  ;;  %v325_v4 = vadd.f32 %v572_v60, %v696_v18  ;;  %462 = vst [vmem:[%s829_s3 + $0x30] sm:$0xff] %v430_v1  ;;  %v253_v9 = vadd.f32 %v696_v18, %v252_v5  ;;  %v317_v10 = vadd.f32 %v696_v18, %v316_v6 }
  0xec   :  { %478 = vst [vmem:[%s829_s3 + $0xb0] sm:$0xff] %v446_v2  ;;  %v428_v7 = vsel %vm364_vm11, %v250_v57, %v396_v63  ;;  %v444_v8 = vsel %vm380_vm12, %v314_v58, %v412_v0  ;;  %vm367_vm13 = vcmp.ge.f32.partialorder %v261_v3, 0.0  ;;  %v399_v11 = vmul.f32 0.2, %v261_v3 }
  0xed   :  { %460 = vst [vmem:[%s829_s3 + $0x20] sm:$0xff] %v428_v7  ;;  %476 = vst [vmem:[%s829_s3 + $0xa0] sm:$0xff] %v444_v8  ;;  %vm383_vm14 = vcmp.ge.f32.partialorder %v325_v4, 0.0  ;;  %v415_v12 = vmul.f32 0.2, %v325_v4  ;;  %vm365_vm15 = vcmp.ge.f32.partialorder %v253_v9, 0.0 }
  0xee   :  { %v397_v13 = vmul.f32 0.2, %v253_v9  ;;  %vm381_vm0 = vcmp.ge.f32.partialorder %v317_v10, 0.0  ;;  %v413_v14 = vmul.f32 0.2, %v317_v10  ;;  %v431_v15 = vsel %vm367_vm13, %v261_v3, %v399_v11  ;;  %v559_v17 = vpop.f32.mrb[8].mxu0 }
  0xef   :  { %v447_v16 = vsel %vm383_vm14, %v325_v4, %v415_v12  ;;  %v575_v19 = vpop.f32.mrb[8].mxu1  ;;  %463 = vst [vmem:[%s829_s3 + $0x38] sm:$0xff] %v431_v15  ;;  %v274_v22 = vadd.f32 %v559_v17, %v696_v18  ;;  %v265_v24 = vpop.f32.mrb[9].mxu0 }
  0xf0   :  { %479 = vst [vmem:[%s829_s3 + $0xb8] sm:$0xff] %v447_v16  ;;  %v429_v20 = vsel %vm365_vm15, %v253_v9, %v397_v13  ;;  %v445_v21 = vsel %vm381_vm0, %v317_v10, %v413_v14  ;;  %v338_v23 = vadd.f32 %v575_v19, %v696_v18  ;;  %v329_v25 = vpop.f32.mrb[9].mxu1  ;;  %v266_v26 = vadd.f32 %v696_v18, %v265_v24  ;;  %v560_v28 = vpop.f32.mrb[10].mxu0 }
  0xf1   :  { %461 = vst [vmem:[%s829_s3 + $0x28] sm:$0xff] %v429_v20  ;;  %477 = vst [vmem:[%s829_s3 + $0xa8] sm:$0xff] %v445_v21  ;;  %v330_v27 = vadd.f32 %v696_v18, %v329_v25  ;;  %v576_v29 = vpop.f32.mrb[10].mxu1  ;;  %vm370_vm1 = vcmp.ge.f32.partialorder %v274_v22, 0.0  ;;  %v402_v30 = vmul.f32 0.2, %v274_v22  ;;  %v277_v36 = vadd.f32 %v560_v28, %v696_v18 }
  0xf2   :  { %vm386_vm2 = vcmp.ge.f32.partialorder %v338_v23, 0.0  ;;  %v418_v31 = vmul.f32 0.2, %v338_v23  ;;  %vm368_vm3 = vcmp.ge.f32.partialorder %v266_v26, 0.0  ;;  %v400_v32 = vmul.f32 0.2, %v266_v26 }
  0xf3   :  { %vm384_vm4 = vcmp.ge.f32.partialorder %v330_v27, 0.0  ;;  %v416_v33 = vmul.f32 0.2, %v330_v27  ;;  %v434_v34 = vsel %vm370_vm1, %v274_v22, %v402_v30  ;;  %v341_v37 = vadd.f32 %v576_v29, %v696_v18  ;;  %v268_v38 = vpop.f32.mrb[11].mxu0  ;;  %v332_v39 = vpop.f32.mrb[11].mxu1 }
  0xf4   :  { %v450_v35 = vsel %vm386_vm2, %v338_v23, %v418_v31  ;;  %466 = vst [vmem:[%s829_s3 + $0x50] sm:$0xff] %v434_v34  ;;  %v432_v40 = vsel %vm368_vm3, %v266_v26, %v400_v32  ;;  %v269_v42 = vadd.f32 %v696_v18, %v268_v38  ;;  %v333_v43 = vadd.f32 %v696_v18, %v332_v39 }
  0xf5   :  { %482 = vst [vmem:[%s829_s3 + $0xd0] sm:$0xff] %v450_v35  ;;  %v448_v41 = vsel %vm384_vm4, %v330_v27, %v416_v33  ;;  %v563_v44 = vpop.f32.mrb[12].mxu0  ;;  %v579_v45 = vpop.f32.mrb[12].mxu1  ;;  %464 = vst [vmem:[%s829_s3 + $0x40] sm:$0xff] %v432_v40  ;;  %vm371_vm5 = vcmp.ge.f32.partialorder %v277_v36, 0.0  ;;  %vm387_vm6 = vcmp.ge.f32.partialorder %v341_v37, 0.0 }
  0xf6   :  { %480 = vst [vmem:[%s829_s3 + $0xc0] sm:$0xff] %v448_v41  ;;  %v403_v46 = vmul.f32 0.2, %v277_v36  ;;  %v419_v47 = vmul.f32 0.2, %v341_v37  ;;  %vm369_vm7 = vcmp.ge.f32.partialorder %v269_v42, 0.0  ;;  %v290_v52 = vadd.f32 %v563_v44, %v696_v18 }
  0xf7   :  { %v401_v48 = vmul.f32 0.2, %v269_v42  ;;  %vm385_vm8 = vcmp.ge.f32.partialorder %v333_v43, 0.0  ;;  %v417_v49 = vmul.f32 0.2, %v333_v43  ;;  %v354_v53 = vadd.f32 %v579_v45, %v696_v18  ;;  %v281_v54 = vpop.f32.mrb[13].mxu0 }
  0xf8   :  { %v435_v50 = vsel %vm371_vm5, %v277_v36, %v403_v46  ;;  %v451_v51 = vsel %vm387_vm6, %v341_v37, %v419_v47  ;;  %v345_v55 = vpop.f32.mrb[13].mxu1  ;;  %v282_v58 = vadd.f32 %v696_v18, %v281_v54  ;;  %v564_v60 = vpop.f32.mrb[14].mxu0  ;;  %vm374_vm9 = vcmp.ge.f32.partialorder %v290_v52, 0.0 }
  0xf9   :  { %467 = vst [vmem:[%s829_s3 + $0x58] sm:$0xff] %v435_v50  ;;  %483 = vst [vmem:[%s829_s3 + $0xd8] sm:$0xff] %v451_v51  ;;  %v433_v56 = vsel %vm369_vm7, %v269_v42, %v401_v48  ;;  %v449_v57 = vsel %vm385_vm8, %v333_v43, %v417_v49  ;;  %v346_v59 = vadd.f32 %v696_v18, %v345_v55  ;;  %v580_v61 = vpop.f32.mrb[14].mxu1  ;;  %v406_v62 = vmul.f32 0.2, %v290_v52  ;;  %v284_v6 = vpop.f32.mrb[15].mxu0 }
  0xfa   :  { %465 = vst [vmem:[%s829_s3 + $0x48] sm:$0xff] %v433_v56  ;;  %481 = vst [vmem:[%s829_s3 + $0xc8] sm:$0xff] %v449_v57  ;;  %vm390_vm10 = vcmp.ge.f32.partialorder %v354_v53, 0.0  ;;  %v422_v63 = vmul.f32 0.2, %v354_v53  ;;  %vm372_vm11 = vcmp.ge.f32.partialorder %v282_v58, 0.0  ;;  %v293_v4 = vadd.f32 %v564_v60, %v696_v18 }
  0xfb   :  { %v404_v0 = vmul.f32 0.2, %v282_v58  ;;  %vm388_vm12 = vcmp.ge.f32.partialorder %v346_v59, 0.0  ;;  %v420_v1 = vmul.f32 0.2, %v346_v59  ;;  %v438_v2 = vsel %vm374_vm9, %v290_v52, %v406_v62  ;;  %v348_v7 = vpop.f32.mrb[15].mxu1 }
  0xfc   :  { %v454_v3 = vsel %vm390_vm10, %v354_v53, %v422_v63  ;;  %v357_v5 = vadd.f32 %v580_v61, %v696_v18  ;;  %470 = vst [vmem:[%s829_s3 + $0x70] sm:$0xff] %v438_v2  ;;  %v285_v10 = vadd.f32 %v696_v18, %v284_v6  ;;  %v349_v11 = vadd.f32 %v696_v18, %v348_v7 }
  0xfd   :  { %486 = vst [vmem:[%s829_s3 + $0xf0] sm:$0xff] %v454_v3  ;;  %v436_v8 = vsel %vm372_vm11, %v282_v58, %v404_v0  ;;  %v452_v9 = vsel %vm388_vm12, %v346_v59, %v420_v1  ;;  %vm375_vm13 = vcmp.ge.f32.partialorder %v293_v4, 0.0  ;;  %v407_v12 = vmul.f32 0.2, %v293_v4 }
  0xfe   :  { %468 = vst [vmem:[%s829_s3 + $0x60] sm:$0xff] %v436_v8  ;;  %484 = vst [vmem:[%s829_s3 + $0xe0] sm:$0xff] %v452_v9  ;;  %vm391_vm14 = vcmp.ge.f32.partialorder %v357_v5, 0.0  ;;  %v423_v13 = vmul.f32 0.2, %v357_v5  ;;  %vm373_vm15 = vcmp.ge.f32.partialorder %v285_v10, 0.0 }
  0xff   :  { %v405_v14 = vmul.f32 0.2, %v285_v10  ;;  %vm389_vm0 = vcmp.ge.f32.partialorder %v349_v11, 0.0  ;;  %v421_v15 = vmul.f32 0.2, %v349_v11  ;;  %v439_v16 = vsel %vm375_vm13, %v293_v4, %v407_v12 }
 0x100   :  { %v455_v17 = vsel %vm391_vm14, %v357_v5, %v423_v13  ;;  %471 = vst [vmem:[%s829_s3 + $0x78] sm:$0xff] %v439_v16 }
 0x101   :  { %487 = vst [vmem:[%s829_s3 + $0xf8] sm:$0xff] %v455_v17  ;;  %v437_v18 = vsel %vm373_vm15, %v285_v10, %v405_v14  ;;  %v453_v19 = vsel %vm389_vm0, %v349_v11, %v421_v15 }
 0x102   :  { %469 = vst [vmem:[%s829_s3 + $0x68] sm:$0xff] %v437_v18  ;;  %485 = vst [vmem:[%s829_s3 + $0xe8] sm:$0xff] %v453_v19 }

// kernel: discriminator_r_forward.10
= control target key start
LH: loop header
LB: loop body
LE: loop exit
PB: predicated region body
PF: predicated region fallthrough
CT: control target
= control target key end

     0   :  { %vm158_vm0 = vcmask 392192   ;;  %s844_s1 = inlined_call_operand.vmem [shape: bf16[48,128], index: 1, kind: input, shape index: {}]   ;;  %s845_s0 = inlined_call_operand.vmem [shape: bf16[256,48], index: 0, kind: input, shape index: {}]   ;;  %s846_s2 = inlined_call_operand.vmem [shape: f32[1,128], index: 2, kind: input, shape index: {}]   ;;  %s847_s3 = inlined_call_operand.vmem [shape: f32[256,128], index: 3, kind: output, shape index: {}]  }
   0x1   :  { %v599_v0 = vld [vmem:[%s844_s1] sm:$0xff]   ;;  %v600_v1 = vld [vmem:[%s844_s1 + $0x8] sm:$0xff]   ;;  %v601_v2 = vld [vmem:[%s844_s1 + $0x10] sm:$0xff]  }
   0x2   :  { %555 = vmatprep.subr.bf16.mxu0 %v599_v0  ;;  %593 = vmatprep.subr.bf16.mxu1 %v599_v0  ;;  %v602_v3 = vld [vmem:[%s845_s0] sm:$0xff]   ;;  %v604_v5 = vld [vmem:[%s845_s0 + $0x8] sm:$0xff]   ;;  %v606_v7 = vld [vmem:[%s845_s0 + $0x10] sm:$0xff]  }
   0x3   :  { %556 = vmatpush3.bf16.msra.mxu0 %v599_v0  ;;  %596 = vmatpush3.bf16.msra.mxu1 %v599_v0  ;;  %v603_v4 = vld [vmem:[%s845_s0 + $0x40] sm:$0xff]   ;;  %v605_v6 = vld [vmem:[%s845_s0 + $0x48] sm:$0xff]   ;;  %v607_v8 = vld [vmem:[%s845_s0 + $0x50] sm:$0xff]  }
   0x4   :  { %557 = vmatprep.subr.bf16.mxu0 %v600_v1  ;;  %594 = vmatprep.subr.bf16.mxu1 %v600_v1  ;;  %v608_v9 = vld [vmem:[%s845_s0 + $0x18] sm:$0xff]   ;;  %v610_v11 = vld [vmem:[%s845_s0 + $0x20] sm:$0xff]   ;;  %v612_v13 = vld [vmem:[%s845_s0 + $0x28] sm:$0xff]  }
   0x5   :  { %561 = vmatprep.mubr.msk.bf16.mxu0 %vm158_vm0, %v602_v3  ;;  %577 = vmatprep.mubr.msk.bf16.mxu1 %vm158_vm0, %v603_v4  ;;  %v609_v10 = vld [vmem:[%s845_s0 + $0x58] sm:$0xff]   ;;  %v611_v12 = vld [vmem:[%s845_s0 + $0x60] sm:$0xff]   ;;  %v613_v14 = vld [vmem:[%s845_s0 + $0x68] sm:$0xff]  }
   0x6   :  { %v614_v15 = vld [vmem:[%s845_s0 + $0x30] sm:$0xff]   ;;  %v616_v17 = vld [vmem:[%s845_s0 + $0x38] sm:$0xff]   ;;  %v714_v19 = vld [vmem:[%s846_s2] ss:$0 sm:$0xff] }
   0x7   :  { %558 = vmatpush3.bf16.msra.mxu0 %v600_v1  ;;  %597 = vmatpush3.bf16.msra.mxu1 %v600_v1  ;;  %v615_v16 = vld [vmem:[%s845_s0 + $0x70] sm:$0xff]   ;;  %v617_v18 = vld [vmem:[%s845_s0 + $0x78] sm:$0xff]  }
   0x8   :  { %559 = vmatprep.subr.bf16.mxu0 %v601_v2  ;;  %595 = vmatprep.subr.bf16.mxu1 %v601_v2 }
   0xb   :  { %560 = vmatpush3.bf16.msra.mxu0 %v601_v2  ;;  %598 = vmatpush3.bf16.msra.mxu1 %v601_v2 }
   0xe   :  { %562 = vmatmul.mubr.msk.bf16.vlgmr.msra.gmra.mrb[0].mxu0 %vm158_vm0, %v604_v5  ;;  %578 = vmatmul.mubr.msk.bf16.vlgmr.msra.gmra.mrb[0].mxu1 %vm158_vm0, %v605_v6 }
   0xf   :  { %565 = vmatprep.mubr.msk.bf16.mxu0 %vm158_vm0, %v606_v7  ;;  %581 = vmatprep.mubr.msk.bf16.mxu1 %vm158_vm0, %v607_v8 }
  0x16   :  { %566 = vmatmul.mubr.msk.bf16.gmra.mrb[4].mxu0 %vm158_vm0, %v608_v9  ;;  %582 = vmatmul.mubr.msk.bf16.gmra.mrb[4].mxu1 %vm158_vm0, %v609_v10 }
  0x17   :  { %569 = vmatprep.mubr.msk.bf16.mxu0 %vm158_vm0, %v610_v11  ;;  %585 = vmatprep.mubr.msk.bf16.mxu1 %vm158_vm0, %v611_v12 }
  0x1e   :  { %570 = vmatmul.mubr.msk.bf16.gmra.mrb[8].mxu0 %vm158_vm0, %v612_v13  ;;  %586 = vmatmul.mubr.msk.bf16.gmra.mrb[8].mxu1 %vm158_vm0, %v613_v14 }
  0x1f   :  { %573 = vmatprep.mubr.msk.bf16.mxu0 %vm158_vm0, %v614_v15  ;;  %589 = vmatprep.mubr.msk.bf16.mxu1 %vm158_vm0, %v615_v16 }
  0x26   :  { %574 = vmatmul.mubr.msk.bf16.gmra.mrb[12].mxu0 %vm158_vm0, %v616_v17  ;;  %590 = vmatmul.mubr.msk.bf16.gmra.mrb[12].mxu1 %vm158_vm0, %v617_v18 }
  0xe1   :  { %v563_v20 = vpop.f32.mrb[0].mxu0  ;;  %v579_v21 = vpop.f32.mrb[0].mxu1 }
  0xe2   :  { %v250_v22 = vadd.f32 %v563_v20, %v714_v19  ;;  %v314_v23 = vadd.f32 %v579_v21, %v714_v19  ;;  %v241_v24 = vpop.f32.mrb[1].mxu0  ;;  %v305_v25 = vpop.f32.mrb[1].mxu1 }
  0xe3   :  { %v242_v26 = vadd.f32 %v714_v19, %v241_v24  ;;  %v306_v27 = vadd.f32 %v714_v19, %v305_v25  ;;  %v564_v28 = vpop.f32.mrb[2].mxu0  ;;  %v580_v29 = vpop.f32.mrb[2].mxu1 }
  0xe4   :  { %vm370_vm1 = vcmp.ge.f32.partialorder %v250_v22, 0.0  ;;  %v402_v30 = vmul.f32 0.2, %v250_v22  ;;  %vm386_vm2 = vcmp.ge.f32.partialorder %v314_v23, 0.0  ;;  %v418_v31 = vmul.f32 0.2, %v314_v23 }
  0xe5   :  { %vm368_vm3 = vcmp.ge.f32.partialorder %v242_v26, 0.0  ;;  %v400_v32 = vmul.f32 0.2, %v242_v26  ;;  %vm384_vm4 = vcmp.ge.f32.partialorder %v306_v27, 0.0  ;;  %v416_v33 = vmul.f32 0.2, %v306_v27 }
  0xe6   :  { %v434_v34 = vsel %vm370_vm1, %v250_v22, %v402_v30  ;;  %v450_v35 = vsel %vm386_vm2, %v314_v23, %v418_v31  ;;  %v253_v36 = vadd.f32 %v564_v28, %v714_v19  ;;  %v317_v37 = vadd.f32 %v580_v29, %v714_v19  ;;  %v244_v38 = vpop.f32.mrb[3].mxu0  ;;  %v308_v39 = vpop.f32.mrb[3].mxu1 }
  0xe7   :  { %466 = vst [vmem:[%s847_s3 + $0x10] sm:$0xff] %v434_v34  ;;  %482 = vst [vmem:[%s847_s3 + $0x90] sm:$0xff] %v450_v35  ;;  %v432_v40 = vsel %vm368_vm3, %v242_v26, %v400_v32  ;;  %v448_v41 = vsel %vm384_vm4, %v306_v27, %v416_v33  ;;  %v245_v42 = vadd.f32 %v714_v19, %v244_v38 }
  0xe8   :  { %v309_v43 = vadd.f32 %v714_v19, %v308_v39  ;;  %464 = vst [vmem:[%s847_s3] sm:$0xff] %v432_v40  ;;  %480 = vst [vmem:[%s847_s3 + $0x80] sm:$0xff] %v448_v41  ;;  %vm371_vm5 = vcmp.ge.f32.partialorder %v253_v36, 0.0  ;;  %v403_v44 = vmul.f32 0.2, %v253_v36  ;;  %vm387_vm6 = vcmp.ge.f32.partialorder %v317_v37, 0.0 }
  0xe9   :  { %v419_v45 = vmul.f32 0.2, %v317_v37  ;;  %vm369_vm7 = vcmp.ge.f32.partialorder %v245_v42, 0.0  ;;  %v401_v46 = vmul.f32 0.2, %v245_v42  ;;  %v567_v50 = vpop.f32.mrb[4].mxu0 }
  0xea   :  { %vm385_vm8 = vcmp.ge.f32.partialorder %v309_v43, 0.0  ;;  %v417_v47 = vmul.f32 0.2, %v309_v43  ;;  %v435_v48 = vsel %vm371_vm5, %v253_v36, %v403_v44  ;;  %v583_v51 = vpop.f32.mrb[4].mxu1  ;;  %v266_v54 = vadd.f32 %v567_v50, %v714_v19  ;;  %v257_v56 = vpop.f32.mrb[5].mxu0 }
  0xeb   :  { %v451_v49 = vsel %vm387_vm6, %v317_v37, %v419_v45  ;;  %467 = vst [vmem:[%s847_s3 + $0x18] sm:$0xff] %v435_v48  ;;  %v433_v52 = vsel %vm369_vm7, %v245_v42, %v401_v46  ;;  %v330_v55 = vadd.f32 %v583_v51, %v714_v19  ;;  %v321_v57 = vpop.f32.mrb[5].mxu1  ;;  %v258_v58 = vadd.f32 %v714_v19, %v257_v56  ;;  %v568_v60 = vpop.f32.mrb[6].mxu0 }
  0xec   :  { %483 = vst [vmem:[%s847_s3 + $0x98] sm:$0xff] %v451_v49  ;;  %v449_v53 = vsel %vm385_vm8, %v309_v43, %v417_v47  ;;  %465 = vst [vmem:[%s847_s3 + $0x8] sm:$0xff] %v433_v52  ;;  %v322_v59 = vadd.f32 %v714_v19, %v321_v57  ;;  %v584_v61 = vpop.f32.mrb[6].mxu1  ;;  %vm374_vm9 = vcmp.ge.f32.partialorder %v266_v54, 0.0  ;;  %v406_v62 = vmul.f32 0.2, %v266_v54 }
  0xed   :  { %481 = vst [vmem:[%s847_s3 + $0x88] sm:$0xff] %v449_v53  ;;  %vm390_vm10 = vcmp.ge.f32.partialorder %v330_v55, 0.0  ;;  %v422_v63 = vmul.f32 0.2, %v330_v55  ;;  %vm372_vm11 = vcmp.ge.f32.partialorder %v258_v58, 0.0  ;;  %v269_v4 = vadd.f32 %v568_v60, %v714_v19  ;;  %v260_v6 = vpop.f32.mrb[7].mxu0 }
  0xee   :  { %v404_v0 = vmul.f32 0.2, %v258_v58  ;;  %vm388_vm12 = vcmp.ge.f32.partialorder %v322_v59, 0.0  ;;  %v420_v1 = vmul.f32 0.2, %v322_v59  ;;  %v438_v2 = vsel %vm374_vm9, %v266_v54, %v406_v62  ;;  %v324_v7 = vpop.f32.mrb[7].mxu1 }
  0xef   :  { %v454_v3 = vsel %vm390_vm10, %v330_v55, %v422_v63  ;;  %v333_v5 = vadd.f32 %v584_v61, %v714_v19  ;;  %470 = vst [vmem:[%s847_s3 + $0x30] sm:$0xff] %v438_v2  ;;  %v261_v10 = vadd.f32 %v714_v19, %v260_v6  ;;  %v325_v11 = vadd.f32 %v714_v19, %v324_v7 }
  0xf0   :  { %486 = vst [vmem:[%s847_s3 + $0xb0] sm:$0xff] %v454_v3  ;;  %v436_v8 = vsel %vm372_vm11, %v258_v58, %v404_v0  ;;  %v452_v9 = vsel %vm388_vm12, %v322_v59, %v420_v1  ;;  %vm375_vm13 = vcmp.ge.f32.partialorder %v269_v4, 0.0  ;;  %v407_v12 = vmul.f32 0.2, %v269_v4 }
  0xf1   :  { %468 = vst [vmem:[%s847_s3 + $0x20] sm:$0xff] %v436_v8  ;;  %484 = vst [vmem:[%s847_s3 + $0xa0] sm:$0xff] %v452_v9  ;;  %vm391_vm14 = vcmp.ge.f32.partialorder %v333_v5, 0.0  ;;  %v423_v13 = vmul.f32 0.2, %v333_v5  ;;  %vm373_vm15 = vcmp.ge.f32.partialorder %v261_v10, 0.0 }
  0xf2   :  { %v405_v14 = vmul.f32 0.2, %v261_v10  ;;  %vm389_vm0 = vcmp.ge.f32.partialorder %v325_v11, 0.0  ;;  %v421_v15 = vmul.f32 0.2, %v325_v11  ;;  %v439_v16 = vsel %vm375_vm13, %v269_v4, %v407_v12  ;;  %v571_v18 = vpop.f32.mrb[8].mxu0 }
  0xf3   :  { %v455_v17 = vsel %vm391_vm14, %v333_v5, %v423_v13  ;;  %v587_v20 = vpop.f32.mrb[8].mxu1  ;;  %471 = vst [vmem:[%s847_s3 + $0x38] sm:$0xff] %v439_v16  ;;  %v282_v23 = vadd.f32 %v571_v18, %v714_v19  ;;  %v273_v25 = vpop.f32.mrb[9].mxu0 }
  0xf4   :  { %487 = vst [vmem:[%s847_s3 + $0xb8] sm:$0xff] %v455_v17  ;;  %v437_v21 = vsel %vm373_vm15, %v261_v10, %v405_v14  ;;  %v453_v22 = vsel %vm389_vm0, %v325_v11, %v421_v15  ;;  %v346_v24 = vadd.f32 %v587_v20, %v714_v19  ;;  %v337_v26 = vpop.f32.mrb[9].mxu1  ;;  %v274_v27 = vadd.f32 %v714_v19, %v273_v25  ;;  %v572_v29 = vpop.f32.mrb[10].mxu0 }
  0xf5   :  { %469 = vst [vmem:[%s847_s3 + $0x28] sm:$0xff] %v437_v21  ;;  %485 = vst [vmem:[%s847_s3 + $0xa8] sm:$0xff] %v453_v22  ;;  %v338_v28 = vadd.f32 %v714_v19, %v337_v26  ;;  %v588_v30 = vpop.f32.mrb[10].mxu1  ;;  %vm378_vm1 = vcmp.ge.f32.partialorder %v282_v23, 0.0  ;;  %v410_v31 = vmul.f32 0.2, %v282_v23  ;;  %v285_v37 = vadd.f32 %v572_v29, %v714_v19 }
  0xf6   :  { %vm394_vm2 = vcmp.ge.f32.partialorder %v346_v24, 0.0  ;;  %v426_v32 = vmul.f32 0.2, %v346_v24  ;;  %vm376_vm3 = vcmp.ge.f32.partialorder %v274_v27, 0.0  ;;  %v408_v33 = vmul.f32 0.2, %v274_v27 }
  0xf7   :  { %vm392_vm4 = vcmp.ge.f32.partialorder %v338_v28, 0.0  ;;  %v424_v34 = vmul.f32 0.2, %v338_v28  ;;  %v442_v35 = vsel %vm378_vm1, %v282_v23, %v410_v31  ;;  %v349_v38 = vadd.f32 %v588_v30, %v714_v19  ;;  %v276_v39 = vpop.f32.mrb[11].mxu0  ;;  %v340_v40 = vpop.f32.mrb[11].mxu1 }
  0xf8   :  { %v458_v36 = vsel %vm394_vm2, %v346_v24, %v426_v32  ;;  %474 = vst [vmem:[%s847_s3 + $0x50] sm:$0xff] %v442_v35  ;;  %v440_v41 = vsel %vm376_vm3, %v274_v27, %v408_v33  ;;  %v277_v43 = vadd.f32 %v714_v19, %v276_v39  ;;  %v341_v44 = vadd.f32 %v714_v19, %v340_v40 }
  0xf9   :  { %490 = vst [vmem:[%s847_s3 + $0xd0] sm:$0xff] %v458_v36  ;;  %v456_v42 = vsel %vm392_vm4, %v338_v28, %v424_v34  ;;  %v575_v45 = vpop.f32.mrb[12].mxu0  ;;  %v591_v46 = vpop.f32.mrb[12].mxu1  ;;  %472 = vst [vmem:[%s847_s3 + $0x40] sm:$0xff] %v440_v41  ;;  %vm379_vm5 = vcmp.ge.f32.partialorder %v285_v37, 0.0  ;;  %vm395_vm6 = vcmp.ge.f32.partialorder %v349_v38, 0.0 }
  0xfa   :  { %488 = vst [vmem:[%s847_s3 + $0xc0] sm:$0xff] %v456_v42  ;;  %v411_v47 = vmul.f32 0.2, %v285_v37  ;;  %v427_v48 = vmul.f32 0.2, %v349_v38  ;;  %vm377_vm7 = vcmp.ge.f32.partialorder %v277_v43, 0.0  ;;  %v298_v53 = vadd.f32 %v575_v45, %v714_v19 }
  0xfb   :  { %v409_v49 = vmul.f32 0.2, %v277_v43  ;;  %vm393_vm8 = vcmp.ge.f32.partialorder %v341_v44, 0.0  ;;  %v425_v50 = vmul.f32 0.2, %v341_v44  ;;  %v362_v54 = vadd.f32 %v591_v46, %v714_v19  ;;  %v289_v55 = vpop.f32.mrb[13].mxu0 }
  0xfc   :  { %v443_v51 = vsel %vm379_vm5, %v285_v37, %v411_v47  ;;  %v459_v52 = vsel %vm395_vm6, %v349_v38, %v427_v48  ;;  %v353_v56 = vpop.f32.mrb[13].mxu1  ;;  %v290_v59 = vadd.f32 %v714_v19, %v289_v55  ;;  %v576_v61 = vpop.f32.mrb[14].mxu0  ;;  %vm382_vm9 = vcmp.ge.f32.partialorder %v298_v53, 0.0 }
  0xfd   :  { %475 = vst [vmem:[%s847_s3 + $0x58] sm:$0xff] %v443_v51  ;;  %491 = vst [vmem:[%s847_s3 + $0xd8] sm:$0xff] %v459_v52  ;;  %v441_v57 = vsel %vm377_vm7, %v277_v43, %v409_v49  ;;  %v457_v58 = vsel %vm393_vm8, %v341_v44, %v425_v50  ;;  %v354_v60 = vadd.f32 %v714_v19, %v353_v56  ;;  %v592_v62 = vpop.f32.mrb[14].mxu1  ;;  %v414_v63 = vmul.f32 0.2, %v298_v53  ;;  %v292_v7 = vpop.f32.mrb[15].mxu0 }
  0xfe   :  { %473 = vst [vmem:[%s847_s3 + $0x48] sm:$0xff] %v441_v57  ;;  %489 = vst [vmem:[%s847_s3 + $0xc8] sm:$0xff] %v457_v58  ;;  %vm398_vm10 = vcmp.ge.f32.partialorder %v362_v54, 0.0  ;;  %v430_v0 = vmul.f32 0.2, %v362_v54  ;;  %vm380_vm11 = vcmp.ge.f32.partialorder %v290_v59, 0.0  ;;  %v301_v5 = vadd.f32 %v576_v61, %v714_v19 }
  0xff   :  { %v412_v1 = vmul.f32 0.2, %v290_v59  ;;  %vm396_vm12 = vcmp.ge.f32.partialorder %v354_v60, 0.0  ;;  %v428_v2 = vmul.f32 0.2, %v354_v60  ;;  %v446_v3 = vsel %vm382_vm9, %v298_v53, %v414_v63  ;;  %v356_v8 = vpop.f32.mrb[15].mxu1 }
 0x100   :  { %v462_v4 = vsel %vm398_vm10, %v362_v54, %v430_v0  ;;  %v365_v6 = vadd.f32 %v592_v62, %v714_v19  ;;  %478 = vst [vmem:[%s847_s3 + $0x70] sm:$0xff] %v446_v3  ;;  %v293_v11 = vadd.f32 %v714_v19, %v292_v7  ;;  %v357_v12 = vadd.f32 %v714_v19, %v356_v8 }
 0x101   :  { %494 = vst [vmem:[%s847_s3 + $0xf0] sm:$0xff] %v462_v4  ;;  %v444_v9 = vsel %vm380_vm11, %v290_v59, %v412_v1  ;;  %v460_v10 = vsel %vm396_vm12, %v354_v60, %v428_v2  ;;  %vm383_vm13 = vcmp.ge.f32.partialorder %v301_v5, 0.0  ;;  %v415_v13 = vmul.f32 0.2, %v301_v5 }
 0x102   :  { %476 = vst [vmem:[%s847_s3 + $0x60] sm:$0xff] %v444_v9  ;;  %492 = vst [vmem:[%s847_s3 + $0xe0] sm:$0xff] %v460_v10  ;;  %vm399_vm14 = vcmp.ge.f32.partialorder %v365_v6, 0.0  ;;  %v431_v14 = vmul.f32 0.2, %v365_v6  ;;  %vm381_vm15 = vcmp.ge.f32.partialorder %v293_v11, 0.0 }
 0x103   :  { %v413_v15 = vmul.f32 0.2, %v293_v11  ;;  %vm397_vm0 = vcmp.ge.f32.partialorder %v357_v12, 0.0  ;;  %v429_v16 = vmul.f32 0.2, %v357_v12  ;;  %v447_v17 = vsel %vm383_vm13, %v301_v5, %v415_v13 }
 0x104   :  { %v463_v18 = vsel %vm399_vm14, %v365_v6, %v431_v14  ;;  %479 = vst [vmem:[%s847_s3 + $0x78] sm:$0xff] %v447_v17 }
 0x105   :  { %495 = vst [vmem:[%s847_s3 + $0xf8] sm:$0xff] %v463_v18  ;;  %v445_v19 = vsel %vm381_vm15, %v293_v11, %v413_v15  ;;  %v461_v20 = vsel %vm397_vm0, %v357_v12, %v429_v16 }
 0x106   :  { %477 = vst [vmem:[%s847_s3 + $0x68] sm:$0xff] %v445_v19  ;;  %493 = vst [vmem:[%s847_s3 + $0xe8] sm:$0xff] %v461_v20 }

// kernel: discriminator_r_forward.11
= control target key start
LH: loop header
LB: loop body
LE: loop exit
PB: predicated region body
PF: predicated region fallthrough
CT: control target
= control target key end

     0   :  { %vm174_vm0 = vcmask 654336   ;;  %s880_s1 = inlined_call_operand.vmem [shape: bf16[80,128], index: 1, kind: input, shape index: {}]   ;;  %s881_s0 = inlined_call_operand.vmem [shape: bf16[256,80], index: 0, kind: input, shape index: {}]   ;;  %s882_s2 = inlined_call_operand.vmem [shape: f32[1,128], index: 2, kind: input, shape index: {}]   ;;  %s883_s3 = inlined_call_operand.vmem [shape: f32[256,128], index: 3, kind: output, shape index: {}]  }
   0x1   :  { %v627_v0 = vld [vmem:[%s880_s1] sm:$0xff]   ;;  %v628_v1 = vld [vmem:[%s880_s1 + $0x8] sm:$0xff]   ;;  %v629_v2 = vld [vmem:[%s880_s1 + $0x10] sm:$0xff]  }
   0x2   :  { %575 = vmatprep.subr.bf16.mxu0 %v627_v0  ;;  %617 = vmatprep.subr.bf16.mxu1 %v627_v0  ;;  %v632_v3 = vld [vmem:[%s881_s0] sm:$0xff]   ;;  %v630_v5 = vld [vmem:[%s880_s1 + $0x18] sm:$0xff]   ;;  %v634_v7 = vld [vmem:[%s881_s0 + $0x8] sm:$0xff]  }
   0x3   :  { %576 = vmatpush3.bf16.msra.mxu0 %v627_v0  ;;  %622 = vmatpush3.bf16.msra.mxu1 %v627_v0  ;;  %v633_v4 = vld [vmem:[%s881_s0 + $0x40] sm:$0xff]   ;;  %v635_v8 = vld [vmem:[%s881_s0 + $0x48] sm:$0xff]   ;;  %v636_v9 = vld [vmem:[%s881_s0 + $0x10] sm:$0xff]  }
   0x4   :  { %577 = vmatprep.subr.bf16.mxu0 %v628_v1  ;;  %618 = vmatprep.subr.bf16.mxu1 %v628_v1  ;;  %v631_v6 = vld [vmem:[%s880_s1 + $0x20] sm:$0xff]   ;;  %v637_v10 = vld [vmem:[%s881_s0 + $0x50] sm:$0xff]   ;;  %v638_v11 = vld [vmem:[%s881_s0 + $0x18] sm:$0xff]  }
   0x5   :  { %585 = vmatprep.mubr.msk.bf16.mxu0 %vm174_vm0, %v632_v3  ;;  %601 = vmatprep.mubr.msk.bf16.mxu1 %vm174_vm0, %v633_v4  ;;  %v639_v12 = vld [vmem:[%s881_s0 + $0x58] sm:$0xff]   ;;  %v640_v13 = vld [vmem:[%s881_s0 + $0x20] sm:$0xff]   ;;  %v642_v15 = vld [vmem:[%s881_s0 + $0x28] sm:$0xff]  }
   0x6   :  { %v641_v14 = vld [vmem:[%s881_s0 + $0x60] sm:$0xff]   ;;  %v643_v16 = vld [vmem:[%s881_s0 + $0x68] sm:$0xff]   ;;  %v644_v17 = vld [vmem:[%s881_s0 + $0x30] sm:$0xff]  }
   0x7   :  { %578 = vmatpush3.bf16.msra.mxu0 %v628_v1  ;;  %623 = vmatpush3.bf16.msra.mxu1 %v628_v1  ;;  %v645_v18 = vld [vmem:[%s881_s0 + $0x70] sm:$0xff]   ;;  %v646_v19 = vld [vmem:[%s881_s0 + $0x38] sm:$0xff]   ;;  %v750_v21 = vld [vmem:[%s882_s2] ss:$0 sm:$0xff] }
   0x8   :  { %579 = vmatprep.subr.bf16.mxu0 %v629_v2  ;;  %619 = vmatprep.subr.bf16.mxu1 %v629_v2  ;;  %v647_v20 = vld [vmem:[%s881_s0 + $0x78] sm:$0xff]  }
   0xb   :  { %580 = vmatpush3.bf16.msra.mxu0 %v629_v2  ;;  %624 = vmatpush3.bf16.msra.mxu1 %v629_v2 }
   0xc   :  { %581 = vmatprep.subr.bf16.mxu0 %v630_v5  ;;  %620 = vmatprep.subr.bf16.mxu1 %v630_v5 }
   0xf   :  { %582 = vmatpush3.bf16.msra.mxu0 %v630_v5  ;;  %625 = vmatpush3.bf16.msra.mxu1 %v630_v5 }
  0x10   :  { %583 = vmatprep.subr.bf16.mxu0 %v631_v6  ;;  %621 = vmatprep.subr.bf16.mxu1 %v631_v6 }
  0x13   :  { %584 = vmatpush3.bf16.msra.mxu0 %v631_v6  ;;  %626 = vmatpush3.bf16.msra.mxu1 %v631_v6 }
  0x16   :  { %586 = vmatmul.mubr.msk.bf16.vlgmr.msra.gmra.mrb[0].mxu0 %vm174_vm0, %v634_v7  ;;  %602 = vmatmul.mubr.msk.bf16.vlgmr.msra.gmra.mrb[0].mxu1 %vm174_vm0, %v635_v8 }
  0x17   :  { %589 = vmatprep.mubr.msk.bf16.mxu0 %vm174_vm0, %v636_v9  ;;  %605 = vmatprep.mubr.msk.bf16.mxu1 %vm174_vm0, %v637_v10 }
  0x1e   :  { %590 = vmatmul.mubr.msk.bf16.gmra.mrb[4].mxu0 %vm174_vm0, %v638_v11  ;;  %606 = vmatmul.mubr.msk.bf16.gmra.mrb[4].mxu1 %vm174_vm0, %v639_v12 }
  0x1f   :  { %593 = vmatprep.mubr.msk.bf16.mxu0 %vm174_vm0, %v640_v13  ;;  %609 = vmatprep.mubr.msk.bf16.mxu1 %vm174_vm0, %v641_v14 }
  0x26   :  { %594 = vmatmul.mubr.msk.bf16.gmra.mrb[8].mxu0 %vm174_vm0, %v642_v15  ;;  %610 = vmatmul.mubr.msk.bf16.gmra.mrb[8].mxu1 %vm174_vm0, %v643_v16 }
  0x27   :  { %597 = vmatprep.mubr.msk.bf16.mxu0 %vm174_vm0, %v644_v17  ;;  %613 = vmatprep.mubr.msk.bf16.mxu1 %vm174_vm0, %v645_v18 }
  0x2e   :  { %598 = vmatmul.mubr.msk.bf16.gmra.mrb[12].mxu0 %vm174_vm0, %v646_v19  ;;  %614 = vmatmul.mubr.msk.bf16.gmra.mrb[12].mxu1 %vm174_vm0, %v647_v20 }
  0xe9   :  { %v587_v22 = vpop.f32.mrb[0].mxu0  ;;  %v603_v23 = vpop.f32.mrb[0].mxu1 }
  0xea   :  { %v266_v24 = vadd.f32 %v587_v22, %v750_v21  ;;  %v330_v25 = vadd.f32 %v603_v23, %v750_v21  ;;  %v257_v26 = vpop.f32.mrb[1].mxu0  ;;  %v321_v27 = vpop.f32.mrb[1].mxu1 }
  0xeb   :  { %v258_v28 = vadd.f32 %v750_v21, %v257_v26  ;;  %v322_v29 = vadd.f32 %v750_v21, %v321_v27  ;;  %v588_v30 = vpop.f32.mrb[2].mxu0  ;;  %v604_v31 = vpop.f32.mrb[2].mxu1 }
  0xec   :  { %vm386_vm1 = vcmp.ge.f32.partialorder %v266_v24, 0.0  ;;  %v418_v32 = vmul.f32 0.2, %v266_v24  ;;  %vm402_vm2 = vcmp.ge.f32.partialorder %v330_v25, 0.0  ;;  %v434_v33 = vmul.f32 0.2, %v330_v25 }
  0xed   :  { %vm384_vm3 = vcmp.ge.f32.partialorder %v258_v28, 0.0  ;;  %v416_v34 = vmul.f32 0.2, %v258_v28  ;;  %vm400_vm4 = vcmp.ge.f32.partialorder %v322_v29, 0.0  ;;  %v432_v35 = vmul.f32 0.2, %v322_v29 }
  0xee   :  { %v450_v36 = vsel %vm386_vm1, %v266_v24, %v418_v32  ;;  %v466_v37 = vsel %vm402_vm2, %v330_v25, %v434_v33  ;;  %v269_v38 = vadd.f32 %v588_v30, %v750_v21  ;;  %v333_v39 = vadd.f32 %v604_v31, %v750_v21  ;;  %v260_v40 = vpop.f32.mrb[3].mxu0  ;;  %v324_v41 = vpop.f32.mrb[3].mxu1 }
  0xef   :  { %482 = vst [vmem:[%s883_s3 + $0x10] sm:$0xff] %v450_v36  ;;  %498 = vst [vmem:[%s883_s3 + $0x90] sm:$0xff] %v466_v37  ;;  %v448_v42 = vsel %vm384_vm3, %v258_v28, %v416_v34  ;;  %v464_v43 = vsel %vm400_vm4, %v322_v29, %v432_v35  ;;  %v261_v44 = vadd.f32 %v750_v21, %v260_v40 }
  0xf0   :  { %v325_v45 = vadd.f32 %v750_v21, %v324_v41  ;;  %480 = vst [vmem:[%s883_s3] sm:$0xff] %v448_v42  ;;  %496 = vst [vmem:[%s883_s3 + $0x80] sm:$0xff] %v464_v43  ;;  %vm387_vm5 = vcmp.ge.f32.partialorder %v269_v38, 0.0  ;;  %v419_v46 = vmul.f32 0.2, %v269_v38  ;;  %vm403_vm6 = vcmp.ge.f32.partialorder %v333_v39, 0.0 }
  0xf1   :  { %v435_v47 = vmul.f32 0.2, %v333_v39  ;;  %vm385_vm7 = vcmp.ge.f32.partialorder %v261_v44, 0.0  ;;  %v417_v48 = vmul.f32 0.2, %v261_v44  ;;  %v591_v52 = vpop.f32.mrb[4].mxu0 }
  0xf2   :  { %vm401_vm8 = vcmp.ge.f32.partialorder %v325_v45, 0.0  ;;  %v433_v49 = vmul.f32 0.2, %v325_v45  ;;  %v451_v50 = vsel %vm387_vm5, %v269_v38, %v419_v46  ;;  %v607_v53 = vpop.f32.mrb[4].mxu1  ;;  %v282_v56 = vadd.f32 %v591_v52, %v750_v21  ;;  %v273_v58 = vpop.f32.mrb[5].mxu0 }
  0xf3   :  { %v467_v51 = vsel %vm403_vm6, %v333_v39, %v435_v47  ;;  %483 = vst [vmem:[%s883_s3 + $0x18] sm:$0xff] %v451_v50  ;;  %v449_v54 = vsel %vm385_vm7, %v261_v44, %v417_v48  ;;  %v346_v57 = vadd.f32 %v607_v53, %v750_v21  ;;  %v337_v59 = vpop.f32.mrb[5].mxu1  ;;  %v274_v60 = vadd.f32 %v750_v21, %v273_v58  ;;  %v592_v62 = vpop.f32.mrb[6].mxu0 }
  0xf4   :  { %499 = vst [vmem:[%s883_s3 + $0x98] sm:$0xff] %v467_v51  ;;  %v465_v55 = vsel %vm401_vm8, %v325_v45, %v433_v49  ;;  %481 = vst [vmem:[%s883_s3 + $0x8] sm:$0xff] %v449_v54  ;;  %v338_v61 = vadd.f32 %v750_v21, %v337_v59  ;;  %v608_v63 = vpop.f32.mrb[6].mxu1  ;;  %vm390_vm9 = vcmp.ge.f32.partialorder %v282_v56, 0.0  ;;  %v422_v0 = vmul.f32 0.2, %v282_v56 }
  0xf5   :  { %497 = vst [vmem:[%s883_s3 + $0x88] sm:$0xff] %v465_v55  ;;  %vm406_vm10 = vcmp.ge.f32.partialorder %v346_v57, 0.0  ;;  %v438_v1 = vmul.f32 0.2, %v346_v57  ;;  %vm388_vm11 = vcmp.ge.f32.partialorder %v274_v60, 0.0  ;;  %v285_v6 = vadd.f32 %v592_v62, %v750_v21  ;;  %v276_v8 = vpop.f32.mrb[7].mxu0 }
  0xf6   :  { %v420_v2 = vmul.f32 0.2, %v274_v60  ;;  %vm404_vm12 = vcmp.ge.f32.partialorder %v338_v61, 0.0  ;;  %v436_v3 = vmul.f32 0.2, %v338_v61  ;;  %v454_v4 = vsel %vm390_vm9, %v282_v56, %v422_v0  ;;  %v340_v9 = vpop.f32.mrb[7].mxu1 }
  0xf7   :  { %v470_v5 = vsel %vm406_vm10, %v346_v57, %v438_v1  ;;  %v349_v7 = vadd.f32 %v608_v63, %v750_v21  ;;  %486 = vst [vmem:[%s883_s3 + $0x30] sm:$0xff] %v454_v4  ;;  %v277_v12 = vadd.f32 %v750_v21, %v276_v8  ;;  %v341_v13 = vadd.f32 %v750_v21, %v340_v9 }
  0xf8   :  { %502 = vst [vmem:[%s883_s3 + $0xb0] sm:$0xff] %v470_v5  ;;  %v452_v10 = vsel %vm388_vm11, %v274_v60, %v420_v2  ;;  %v468_v11 = vsel %vm404_vm12, %v338_v61, %v436_v3  ;;  %vm391_vm13 = vcmp.ge.f32.partialorder %v285_v6, 0.0  ;;  %v423_v14 = vmul.f32 0.2, %v285_v6 }
  0xf9   :  { %484 = vst [vmem:[%s883_s3 + $0x20] sm:$0xff] %v452_v10  ;;  %500 = vst [vmem:[%s883_s3 + $0xa0] sm:$0xff] %v468_v11  ;;  %vm407_vm14 = vcmp.ge.f32.partialorder %v349_v7, 0.0  ;;  %v439_v15 = vmul.f32 0.2, %v349_v7  ;;  %vm389_vm15 = vcmp.ge.f32.partialorder %v277_v12, 0.0 }
  0xfa   :  { %v421_v16 = vmul.f32 0.2, %v277_v12  ;;  %vm405_vm0 = vcmp.ge.f32.partialorder %v341_v13, 0.0  ;;  %v437_v17 = vmul.f32 0.2, %v341_v13  ;;  %v455_v18 = vsel %vm391_vm13, %v285_v6, %v423_v14  ;;  %v595_v20 = vpop.f32.mrb[8].mxu0 }
  0xfb   :  { %v471_v19 = vsel %vm407_vm14, %v349_v7, %v439_v15  ;;  %v611_v22 = vpop.f32.mrb[8].mxu1  ;;  %487 = vst [vmem:[%s883_s3 + $0x38] sm:$0xff] %v455_v18  ;;  %v298_v25 = vadd.f32 %v595_v20, %v750_v21  ;;  %v289_v27 = vpop.f32.mrb[9].mxu0 }
  0xfc   :  { %503 = vst [vmem:[%s883_s3 + $0xb8] sm:$0xff] %v471_v19  ;;  %v453_v23 = vsel %vm389_vm15, %v277_v12, %v421_v16  ;;  %v469_v24 = vsel %vm405_vm0, %v341_v13, %v437_v17  ;;  %v362_v26 = vadd.f32 %v611_v22, %v750_v21  ;;  %v353_v28 = vpop.f32.mrb[9].mxu1  ;;  %v290_v29 = vadd.f32 %v750_v21, %v289_v27  ;;  %v596_v31 = vpop.f32.mrb[10].mxu0 }
  0xfd   :  { %485 = vst [vmem:[%s883_s3 + $0x28] sm:$0xff] %v453_v23  ;;  %501 = vst [vmem:[%s883_s3 + $0xa8] sm:$0xff] %v469_v24  ;;  %v354_v30 = vadd.f32 %v750_v21, %v353_v28  ;;  %v612_v32 = vpop.f32.mrb[10].mxu1  ;;  %vm394_vm1 = vcmp.ge.f32.partialorder %v298_v25, 0.0  ;;  %v426_v33 = vmul.f32 0.2, %v298_v25  ;;  %v301_v39 = vadd.f32 %v596_v31, %v750_v21 }
  0xfe   :  { %vm410_vm2 = vcmp.ge.f32.partialorder %v362_v26, 0.0  ;;  %v442_v34 = vmul.f32 0.2, %v362_v26  ;;  %vm392_vm3 = vcmp.ge.f32.partialorder %v290_v29, 0.0  ;;  %v424_v35 = vmul.f32 0.2, %v290_v29 }
  0xff   :  { %vm408_vm4 = vcmp.ge.f32.partialorder %v354_v30, 0.0  ;;  %v440_v36 = vmul.f32 0.2, %v354_v30  ;;  %v458_v37 = vsel %vm394_vm1, %v298_v25, %v426_v33  ;;  %v365_v40 = vadd.f32 %v612_v32, %v750_v21  ;;  %v292_v41 = vpop.f32.mrb[11].mxu0  ;;  %v356_v42 = vpop.f32.mrb[11].mxu1 }
 0x100   :  { %v474_v38 = vsel %vm410_vm2, %v362_v26, %v442_v34  ;;  %490 = vst [vmem:[%s883_s3 + $0x50] sm:$0xff] %v458_v37  ;;  %v456_v43 = vsel %vm392_vm3, %v290_v29, %v424_v35  ;;  %v293_v45 = vadd.f32 %v750_v21, %v292_v41  ;;  %v357_v46 = vadd.f32 %v750_v21, %v356_v42 }
 0x101   :  { %506 = vst [vmem:[%s883_s3 + $0xd0] sm:$0xff] %v474_v38  ;;  %v472_v44 = vsel %vm408_vm4, %v354_v30, %v440_v36  ;;  %v599_v47 = vpop.f32.mrb[12].mxu0  ;;  %v615_v48 = vpop.f32.mrb[12].mxu1  ;;  %488 = vst [vmem:[%s883_s3 + $0x40] sm:$0xff] %v456_v43  ;;  %vm395_vm5 = vcmp.ge.f32.partialorder %v301_v39, 0.0  ;;  %vm411_vm6 = vcmp.ge.f32.partialorder %v365_v40, 0.0 }
 0x102   :  { %504 = vst [vmem:[%s883_s3 + $0xc0] sm:$0xff] %v472_v44  ;;  %v427_v49 = vmul.f32 0.2, %v301_v39  ;;  %v443_v50 = vmul.f32 0.2, %v365_v40  ;;  %vm393_vm7 = vcmp.ge.f32.partialorder %v293_v45, 0.0  ;;  %v314_v55 = vadd.f32 %v599_v47, %v750_v21 }
 0x103   :  { %v425_v51 = vmul.f32 0.2, %v293_v45  ;;  %vm409_vm8 = vcmp.ge.f32.partialorder %v357_v46, 0.0  ;;  %v441_v52 = vmul.f32 0.2, %v357_v46  ;;  %v378_v56 = vadd.f32 %v615_v48, %v750_v21  ;;  %v305_v57 = vpop.f32.mrb[13].mxu0 }
 0x104   :  { %v459_v53 = vsel %vm395_vm5, %v301_v39, %v427_v49  ;;  %v475_v54 = vsel %vm411_vm6, %v365_v40, %v443_v50  ;;  %v369_v58 = vpop.f32.mrb[13].mxu1  ;;  %v306_v61 = vadd.f32 %v750_v21, %v305_v57  ;;  %v600_v63 = vpop.f32.mrb[14].mxu0  ;;  %vm398_vm9 = vcmp.ge.f32.partialorder %v314_v55, 0.0 }
 0x105   :  { %491 = vst [vmem:[%s883_s3 + $0x58] sm:$0xff] %v459_v53  ;;  %507 = vst [vmem:[%s883_s3 + $0xd8] sm:$0xff] %v475_v54  ;;  %v457_v59 = vsel %vm393_vm7, %v293_v45, %v425_v51  ;;  %v473_v60 = vsel %vm409_vm8, %v357_v46, %v441_v52  ;;  %v370_v62 = vadd.f32 %v750_v21, %v369_v58  ;;  %v616_v0 = vpop.f32.mrb[14].mxu1  ;;  %v430_v1 = vmul.f32 0.2, %v314_v55  ;;  %v308_v9 = vpop.f32.mrb[15].mxu0 }
 0x106   :  { %489 = vst [vmem:[%s883_s3 + $0x48] sm:$0xff] %v457_v59  ;;  %505 = vst [vmem:[%s883_s3 + $0xc8] sm:$0xff] %v473_v60  ;;  %vm414_vm10 = vcmp.ge.f32.partialorder %v378_v56, 0.0  ;;  %v446_v2 = vmul.f32 0.2, %v378_v56  ;;  %vm396_vm11 = vcmp.ge.f32.partialorder %v306_v61, 0.0  ;;  %v317_v7 = vadd.f32 %v600_v63, %v750_v21 }
 0x107   :  { %v428_v3 = vmul.f32 0.2, %v306_v61  ;;  %vm412_vm12 = vcmp.ge.f32.partialorder %v370_v62, 0.0  ;;  %v444_v4 = vmul.f32 0.2, %v370_v62  ;;  %v462_v5 = vsel %vm398_vm9, %v314_v55, %v430_v1  ;;  %v372_v10 = vpop.f32.mrb[15].mxu1 }
 0x108   :  { %v478_v6 = vsel %vm414_vm10, %v378_v56, %v446_v2  ;;  %v381_v8 = vadd.f32 %v616_v0, %v750_v21  ;;  %494 = vst [vmem:[%s883_s3 + $0x70] sm:$0xff] %v462_v5  ;;  %v309_v13 = vadd.f32 %v750_v21, %v308_v9  ;;  %v373_v14 = vadd.f32 %v750_v21, %v372_v10 }
 0x109   :  { %510 = vst [vmem:[%s883_s3 + $0xf0] sm:$0xff] %v478_v6  ;;  %v460_v11 = vsel %vm396_vm11, %v306_v61, %v428_v3  ;;  %v476_v12 = vsel %vm412_vm12, %v370_v62, %v444_v4  ;;  %vm399_vm13 = vcmp.ge.f32.partialorder %v317_v7, 0.0  ;;  %v431_v15 = vmul.f32 0.2, %v317_v7 }
 0x10a   :  { %492 = vst [vmem:[%s883_s3 + $0x60] sm:$0xff] %v460_v11  ;;  %508 = vst [vmem:[%s883_s3 + $0xe0] sm:$0xff] %v476_v12  ;;  %vm415_vm14 = vcmp.ge.f32.partialorder %v381_v8, 0.0  ;;  %v447_v16 = vmul.f32 0.2, %v381_v8  ;;  %vm397_vm15 = vcmp.ge.f32.partialorder %v309_v13, 0.0 }
 0x10b   :  { %v429_v17 = vmul.f32 0.2, %v309_v13  ;;  %vm413_vm0 = vcmp.ge.f32.partialorder %v373_v14, 0.0  ;;  %v445_v18 = vmul.f32 0.2, %v373_v14  ;;  %v463_v19 = vsel %vm399_vm13, %v317_v7, %v431_v15 }
 0x10c   :  { %v479_v20 = vsel %vm415_vm14, %v381_v8, %v447_v16  ;;  %495 = vst [vmem:[%s883_s3 + $0x78] sm:$0xff] %v463_v19 }
 0x10d   :  { %511 = vst [vmem:[%s883_s3 + $0xf8] sm:$0xff] %v479_v20  ;;  %v461_v21 = vsel %vm397_vm15, %v309_v13, %v429_v17  ;;  %v477_v22 = vsel %vm413_vm0, %v373_v14, %v445_v18 }
 0x10e   :  { %493 = vst [vmem:[%s883_s3 + $0x68] sm:$0xff] %v461_v21  ;;  %509 = vst [vmem:[%s883_s3 + $0xe8] sm:$0xff] %v477_v22 }

// kernel: discriminator_r_forward.12
= control target key start
LH: loop header
LB: loop body
LE: loop exit
PB: predicated region body
PF: predicated region fallthrough
CT: control target
= control target key end

     0   :  { %v746_v0 = vmov 0   ;;  %vm270_vm0 = vcmask 130048   ;;  %s1039_s1 = inlined_call_operand.vmem [shape: bf16[144,128], index: 1, kind: input, shape index: {}]   ;;  %s1040_s0 = inlined_call_operand.vmem [shape: bf16[256,144], index: 0, kind: input, shape index: {}]   ;;  %s1041_s2 = inlined_call_operand.vmem [shape: f32[1,128], index: 2, kind: input, shape index: {}]   ;;  %s1042_s3 = inlined_call_operand.vmem [shape: f32[256,128], index: 3, kind: output, shape index: {}]  }
   0x1   :  { %319 = vmatprep.subr.bf16.mxu0 %v746_v0  ;;  %670 = vmatprep.subr.bf16.mxu1 %v746_v0  ;;  %v689_v1 = vld [vmem:[%s1039_s1] sm:$0xff]   ;;  %v690_v2 = vld [vmem:[%s1039_s1 + $0x8] sm:$0xff]   ;;  %v691_v3 = vld [vmem:[%s1039_s1 + $0x10] sm:$0xff]  }
   0x2   :  { %320 = vmatpush1.bf16.msra.mxu0 %v689_v1  ;;  %679 = vmatpush1.bf16.msra.mxu1 %v689_v1  ;;  %v692_v4 = vld [vmem:[%s1039_s1 + $0x18] sm:$0xff]   ;;  %v700_v5 = vld [vmem:[%s1040_s0 + $0x4] ss:$8 sps:$4 sm:$0xff]   ;;  %v695_v9 = vld [vmem:[%s1039_s1 + $0x30] sm:$0xff]  }
   0x3   :  { %321 = vmatprep.subr.bf16.mxu0 %v746_v0  ;;  %671 = vmatprep.subr.bf16.mxu1 %v746_v0  ;;  %v703_v6 = vld [vmem:[%s1040_s0 + $0x84] ss:$8 sps:$4 sm:$0xff]   ;;  %v696_v10 = vld [vmem:[%s1039_s1 + $0x38] sm:$0xff]   ;;  %v698_v12 = vld [vmem:[%s1040_s0] ss:$8 sps:$4 sm:$0xff]  }
   0x4   :  { %654 = vmatprep.mubr.msk.bf16.mxu0 %vm270_vm0, %v700_v5  ;;  %662 = vmatprep.mubr.msk.bf16.mxu1 %vm270_vm0, %v703_v6  ;;  %v693_v7 = vld [vmem:[%s1039_s1 + $0x20] sm:$0xff]   ;;  %v694_v8 = vld [vmem:[%s1039_s1 + $0x28] sm:$0xff]   ;;  %v704_v14 = vld [vmem:[%s1040_s0 + $0x14] ss:$8 sps:$4 sm:$0xff]  }
   0x5   :  { %v697_v11 = vld [vmem:[%s1039_s1 + $0x40] sm:$0xff]   ;;  %v706_v15 = vld [vmem:[%s1040_s0 + $0x94] ss:$8 sps:$4 sm:$0xff]   ;;  %v708_v16 = vld [vmem:[%s1040_s0 + $0x10] ss:$8 sps:$4 sm:$0xff]  }
   0x6   :  { %322 = vmatpush1.bf16.msra.mxu0 %v690_v2  ;;  %680 = vmatpush1.bf16.msra.mxu1 %v690_v2  ;;  %v701_v13 = vld [vmem:[%s1040_s0 + $0x80] ss:$8 sps:$4 sm:$0xff]   ;;  %v709_v17 = vld [vmem:[%s1040_s0 + $0x90] ss:$8 sps:$4 sm:$0xff]   ;;  %v710_v18 = vld [vmem:[%s1040_s0 + $0x24] ss:$8 sps:$4 sm:$0xff]  }
   0x7   :  { %323 = vmatprep.subr.bf16.mxu0 %v746_v0  ;;  %672 = vmatprep.subr.bf16.mxu1 %v746_v0  ;;  %v712_v19 = vld [vmem:[%s1040_s0 + $0xa4] ss:$8 sps:$4 sm:$0xff]   ;;  %v714_v20 = vld [vmem:[%s1040_s0 + $0x20] ss:$8 sps:$4 sm:$0xff]   ;;  %v716_v22 = vld [vmem:[%s1040_s0 + $0x34] ss:$8 sps:$4 sm:$0xff]  }
   0x8   :  { %v715_v21 = vld [vmem:[%s1040_s0 + $0xa0] ss:$8 sps:$4 sm:$0xff]   ;;  %v718_v23 = vld [vmem:[%s1040_s0 + $0xb4] ss:$8 sps:$4 sm:$0xff]   ;;  %v720_v24 = vld [vmem:[%s1040_s0 + $0x30] ss:$8 sps:$4 sm:$0xff]  }
   0x9   :  { %v721_v25 = vld [vmem:[%s1040_s0 + $0xb0] ss:$8 sps:$4 sm:$0xff]   ;;  %v722_v26 = vld [vmem:[%s1040_s0 + $0x44] ss:$8 sps:$4 sm:$0xff]   ;;  %v726_v28 = vld [vmem:[%s1040_s0 + $0x40] ss:$8 sps:$4 sm:$0xff]  }
   0xa   :  { %324 = vmatpush1.bf16.msra.mxu0 %v691_v3  ;;  %681 = vmatpush1.bf16.msra.mxu1 %v691_v3  ;;  %v724_v27 = vld [vmem:[%s1040_s0 + $0xc4] ss:$8 sps:$4 sm:$0xff]   ;;  %v727_v29 = vld [vmem:[%s1040_s0 + $0xc0] ss:$8 sps:$4 sm:$0xff]   ;;  %v728_v30 = vld [vmem:[%s1040_s0 + $0x54] ss:$8 sps:$4 sm:$0xff]  }
   0xb   :  { %325 = vmatprep.subr.bf16.mxu0 %v746_v0  ;;  %673 = vmatprep.subr.bf16.mxu1 %v746_v0  ;;  %v730_v31 = vld [vmem:[%s1040_s0 + $0xd4] ss:$8 sps:$4 sm:$0xff]   ;;  %v732_v32 = vld [vmem:[%s1040_s0 + $0x50] ss:$8 sps:$4 sm:$0xff]   ;;  %v734_v34 = vld [vmem:[%s1040_s0 + $0x64] ss:$8 sps:$4 sm:$0xff]  }
   0xc   :  { %v733_v33 = vld [vmem:[%s1040_s0 + $0xd0] ss:$8 sps:$4 sm:$0xff]   ;;  %v736_v35 = vld [vmem:[%s1040_s0 + $0xe4] ss:$8 sps:$4 sm:$0xff]   ;;  %v738_v36 = vld [vmem:[%s1040_s0 + $0x60] ss:$8 sps:$4 sm:$0xff]  }
   0xd   :  { %v739_v37 = vld [vmem:[%s1040_s0 + $0xe0] ss:$8 sps:$4 sm:$0xff]   ;;  %v740_v38 = vld [vmem:[%s1040_s0 + $0x74] ss:$8 sps:$4 sm:$0xff]   ;;  %v744_v40 = vld [vmem:[%s1040_s0 + $0x70] ss:$8 sps:$4 sm:$0xff]  }
   0xe   :  { %326 = vmatpush1.bf16.msra.mxu0 %v692_v4  ;;  %682 = vmatpush1.bf16.msra.mxu1 %v692_v4  ;;  %v742_v39 = vld [vmem:[%s1040_s0 + $0xf4] ss:$8 sps:$4 sm:$0xff]   ;;  %v745_v41 = vld [vmem:[%s1040_s0 + $0xf0] ss:$8 sps:$4 sm:$0xff]   ;;  %v909_v42 = vld [vmem:[%s1041_s2] ss:$0 sm:$0xff] }
   0xf   :  { %327 = vmatprep.subr.bf16.mxu0 %v746_v0  ;;  %674 = vmatprep.subr.bf16.mxu1 %v746_v0 }
  0x12   :  { %328 = vmatpush1.bf16.msra.mxu0 %v693_v7  ;;  %683 = vmatpush1.bf16.msra.mxu1 %v693_v7 }
  0x13   :  { %329 = vmatprep.subr.bf16.mxu0 %v746_v0  ;;  %675 = vmatprep.subr.bf16.mxu1 %v746_v0 }
  0x16   :  { %330 = vmatpush1.bf16.msra.mxu0 %v694_v8  ;;  %684 = vmatpush1.bf16.msra.mxu1 %v694_v8 }
  0x17   :  { %331 = vmatprep.subr.bf16.mxu0 %v746_v0  ;;  %676 = vmatprep.subr.bf16.mxu1 %v746_v0 }
  0x1a   :  { %332 = vmatpush1.bf16.msra.mxu0 %v695_v9  ;;  %685 = vmatpush1.bf16.msra.mxu1 %v695_v9 }
  0x1b   :  { %333 = vmatprep.subr.bf16.mxu0 %v746_v0  ;;  %677 = vmatprep.subr.bf16.mxu1 %v746_v0 }
  0x1e   :  { %334 = vmatpush1.bf16.msra.mxu0 %v696_v10  ;;  %686 = vmatpush1.bf16.msra.mxu1 %v696_v10 }
  0x1f   :  { %335 = vmatprep.subr.bf16.mxu0 %v746_v0  ;;  %678 = vmatprep.subr.bf16.mxu1 %v746_v0 }
  0x22   :  { %336 = vmatpush1.bf16.msra.mxu0 %v697_v11  ;;  %687 = vmatpush1.bf16.msra.mxu1 %v697_v11 }
  0x25   :  { %352 = vmatmul.mubr.bf16.vlgmr.msra.gmra.mrb[0].mxu0 %v698_v12  ;;  %416 = vmatmul.mubr.bf16.vlgmr.msra.gmra.mrb[0].mxu1 %v701_v13 }
  0x26   :  { %655 = vmatprep.mubr.msk.bf16.mxu0 %vm270_vm0, %v704_v14  ;;  %663 = vmatprep.mubr.msk.bf16.mxu1 %vm270_vm0, %v706_v15 }
  0x2d   :  { %360 = vmatmul.mubr.bf16.gmra.mrb[4].mxu0 %v708_v16  ;;  %424 = vmatmul.mubr.bf16.gmra.mrb[4].mxu1 %v709_v17 }
  0x2e   :  { %656 = vmatprep.mubr.msk.bf16.mxu0 %vm270_vm0, %v710_v18  ;;  %664 = vmatprep.mubr.msk.bf16.mxu1 %vm270_vm0, %v712_v19 }
  0x35   :  { %368 = vmatmul.mubr.bf16.gmra.mrb[8].mxu0 %v714_v20  ;;  %432 = vmatmul.mubr.bf16.gmra.mrb[8].mxu1 %v715_v21 }
  0x36   :  { %657 = vmatprep.mubr.msk.bf16.mxu0 %vm270_vm0, %v716_v22  ;;  %665 = vmatprep.mubr.msk.bf16.mxu1 %vm270_vm0, %v718_v23 }
  0x3d   :  { %376 = vmatmul.mubr.bf16.gmra.mrb[12].mxu0 %v720_v24  ;;  %440 = vmatmul.mubr.bf16.gmra.mrb[12].mxu1 %v721_v25 }
  0x3e   :  { %658 = vmatprep.mubr.msk.bf16.mxu0 %vm270_vm0, %v722_v26  ;;  %666 = vmatprep.mubr.msk.bf16.mxu1 %vm270_vm0, %v724_v27 }
  0x45   :  { %384 = vmatmul.mubr.bf16.gmra.mrb[16].mxu0 %v726_v28  ;;  %448 = vmatmul.mubr.bf16.gmra.mrb[16].mxu1 %v727_v29 }
  0x46   :  { %659 = vmatprep.mubr.msk.bf16.mxu0 %vm270_vm0, %v728_v30  ;;  %667 = vmatprep.mubr.msk.bf16.mxu1 %vm270_vm0, %v730_v31 }
  0x4d   :  { %392 = vmatmul.mubr.bf16.gmra.mrb[20].mxu0 %v732_v32  ;;  %456 = vmatmul.mubr.bf16.gmra.mrb[20].mxu1 %v733_v33 }
  0x4e   :  { %660 = vmatprep.mubr.msk.bf16.mxu0 %vm270_vm0, %v734_v34  ;;  %668 = vmatprep.mubr.msk.bf16.mxu1 %vm270_vm0, %v736_v35 }
  0x55   :  { %400 = vmatmul.mubr.bf16.gmra.mrb[24].mxu0 %v738_v36  ;;  %464 = vmatmul.mubr.bf16.gmra.mrb[24].mxu1 %v739_v37 }
  0x56   :  { %661 = vmatprep.mubr.msk.bf16.mxu0 %vm270_vm0, %v740_v38  ;;  %669 = vmatprep.mubr.msk.bf16.mxu1 %vm270_vm0, %v742_v39 }
  0x5d   :  { %408 = vmatmul.mubr.bf16.gmra.mrb[28].mxu0 %v744_v40  ;;  %472 = vmatmul.mubr.bf16.gmra.mrb[28].mxu1 %v745_v41 }
  0xf8   :  { %v353_v43 = vpop.f32.mrb[0].mxu0  ;;  %v417_v44 = vpop.f32.mrb[0].mxu1 }
  0xf9   :  { %v354_v45 = vadd.f32 %v909_v42, %v353_v43  ;;  %v418_v46 = vadd.f32 %v909_v42, %v417_v44  ;;  %v355_v47 = vpop.f32.mrb[1].mxu0  ;;  %v419_v48 = vpop.f32.mrb[1].mxu1 }
  0xfa   :  { %v356_v49 = vpop.f32.mrb[2].mxu0  ;;  %v420_v50 = vpop.f32.mrb[2].mxu1 }
  0xfb   :  { %vm480_vm1 = vcmp.ge.f32.partialorder %v354_v45, 0.0  ;;  %v512_v51 = vmul.f32 0.2, %v354_v45  ;;  %vm496_vm2 = vcmp.ge.f32.partialorder %v418_v46, 0.0  ;;  %v528_v52 = vmul.f32 0.2, %v418_v46 }
  0xfc   :  { %v357_v53 = vadd.f32 %v909_v42, %v356_v49  ;;  %v421_v54 = vadd.f32 %v909_v42, %v420_v50  ;;  %v358_v55 = vpop.f32.mrb[3].mxu0  ;;  %v422_v56 = vpop.f32.mrb[3].mxu1 }
  0xfd   :  { %v544_v57 = vsel %vm480_vm1, %v354_v45, %v512_v51  ;;  %v560_v58 = vsel %vm496_vm2, %v418_v46, %v528_v52 }
  0xfe   :  { %576 = vst [vmem:[%s1042_s3] sm:$0xff] %v544_v57  ;;  %592 = vst [vmem:[%s1042_s3 + $0x80] sm:$0xff] %v560_v58  ;;  %vm481_vm3 = vcmp.ge.f32.partialorder %v357_v53, 0.0  ;;  %v513_v59 = vmul.f32 0.2, %v357_v53  ;;  %vm497_vm4 = vcmp.ge.f32.partialorder %v421_v54, 0.0 }
  0xff   :  { %v529_v60 = vmul.f32 0.2, %v421_v54 }
 0x100   :  { %v545_v61 = vsel %vm481_vm3, %v357_v53, %v513_v59  ;;  %v361_v63 = vpop.f32.mrb[4].mxu0  ;;  %v425_v0 = vpop.f32.mrb[4].mxu1 }
 0x101   :  { %v561_v62 = vsel %vm497_vm4, %v421_v54, %v529_v60  ;;  %577 = vst [vmem:[%s1042_s3 + $0x8] sm:$0xff] %v545_v61  ;;  %v362_v1 = vadd.f32 %v909_v42, %v361_v63  ;;  %v426_v2 = vadd.f32 %v909_v42, %v425_v0  ;;  %v363_v3 = vpop.f32.mrb[5].mxu0  ;;  %v427_v4 = vpop.f32.mrb[5].mxu1 }
 0x102   :  { %593 = vst [vmem:[%s1042_s3 + $0x88] sm:$0xff] %v561_v62  ;;  %v364_v5 = vpop.f32.mrb[6].mxu0  ;;  %v428_v6 = vpop.f32.mrb[6].mxu1 }
 0x103   :  { %vm482_vm5 = vcmp.ge.f32.partialorder %v362_v1, 0.0  ;;  %v514_v7 = vmul.f32 0.2, %v362_v1  ;;  %vm498_vm6 = vcmp.ge.f32.partialorder %v426_v2, 0.0  ;;  %v530_v8 = vmul.f32 0.2, %v426_v2 }
 0x104   :  { %v365_v9 = vadd.f32 %v909_v42, %v364_v5  ;;  %v429_v10 = vadd.f32 %v909_v42, %v428_v6  ;;  %v366_v11 = vpop.f32.mrb[7].mxu0  ;;  %v430_v12 = vpop.f32.mrb[7].mxu1 }
 0x105   :  { %v546_v13 = vsel %vm482_vm5, %v362_v1, %v514_v7  ;;  %v562_v14 = vsel %vm498_vm6, %v426_v2, %v530_v8 }
 0x106   :  { %578 = vst [vmem:[%s1042_s3 + $0x10] sm:$0xff] %v546_v13  ;;  %594 = vst [vmem:[%s1042_s3 + $0x90] sm:$0xff] %v562_v14  ;;  %vm483_vm7 = vcmp.ge.f32.partialorder %v365_v9, 0.0  ;;  %v515_v15 = vmul.f32 0.2, %v365_v9  ;;  %vm499_vm8 = vcmp.ge.f32.partialorder %v429_v10, 0.0 }
 0x107   :  { %v531_v16 = vmul.f32 0.2, %v429_v10 }
 0x108   :  { %v547_v17 = vsel %vm483_vm7, %v365_v9, %v515_v15  ;;  %v369_v19 = vpop.f32.mrb[8].mxu0  ;;  %v433_v20 = vpop.f32.mrb[8].mxu1 }
 0x109   :  { %v563_v18 = vsel %vm499_vm8, %v429_v10, %v531_v16  ;;  %579 = vst [vmem:[%s1042_s3 + $0x18] sm:$0xff] %v547_v17  ;;  %v370_v21 = vadd.f32 %v909_v42, %v369_v19  ;;  %v434_v22 = vadd.f32 %v909_v42, %v433_v20  ;;  %v371_v23 = vpop.f32.mrb[9].mxu0  ;;  %v435_v24 = vpop.f32.mrb[9].mxu1 }
 0x10a   :  { %595 = vst [vmem:[%s1042_s3 + $0x98] sm:$0xff] %v563_v18  ;;  %v372_v25 = vpop.f32.mrb[10].mxu0  ;;  %v436_v26 = vpop.f32.mrb[10].mxu1 }
 0x10b   :  { %vm484_vm9 = vcmp.ge.f32.partialorder %v370_v21, 0.0  ;;  %v516_v27 = vmul.f32 0.2, %v370_v21  ;;  %vm500_vm10 = vcmp.ge.f32.partialorder %v434_v22, 0.0  ;;  %v532_v28 = vmul.f32 0.2, %v434_v22 }
 0x10c   :  { %v373_v29 = vadd.f32 %v909_v42, %v372_v25  ;;  %v437_v30 = vadd.f32 %v909_v42, %v436_v26  ;;  %v374_v31 = vpop.f32.mrb[11].mxu0  ;;  %v438_v32 = vpop.f32.mrb[11].mxu1 }
 0x10d   :  { %v548_v33 = vsel %vm484_vm9, %v370_v21, %v516_v27  ;;  %v564_v34 = vsel %vm500_vm10, %v434_v22, %v532_v28 }
 0x10e   :  { %580 = vst [vmem:[%s1042_s3 + $0x20] sm:$0xff] %v548_v33  ;;  %596 = vst [vmem:[%s1042_s3 + $0xa0] sm:$0xff] %v564_v34  ;;  %vm485_vm11 = vcmp.ge.f32.partialorder %v373_v29, 0.0  ;;  %v517_v35 = vmul.f32 0.2, %v373_v29  ;;  %vm501_vm12 = vcmp.ge.f32.partialorder %v437_v30, 0.0 }
 0x10f   :  { %v533_v36 = vmul.f32 0.2, %v437_v30 }
 0x110   :  { %v549_v37 = vsel %vm485_vm11, %v373_v29, %v517_v35  ;;  %v377_v39 = vpop.f32.mrb[12].mxu0  ;;  %v441_v40 = vpop.f32.mrb[12].mxu1 }
 0x111   :  { %v565_v38 = vsel %vm501_vm12, %v437_v30, %v533_v36  ;;  %581 = vst [vmem:[%s1042_s3 + $0x28] sm:$0xff] %v549_v37  ;;  %v378_v41 = vadd.f32 %v909_v42, %v377_v39  ;;  %v442_v43 = vadd.f32 %v909_v42, %v441_v40  ;;  %v379_v44 = vpop.f32.mrb[13].mxu0  ;;  %v443_v45 = vpop.f32.mrb[13].mxu1 }
 0x112   :  { %597 = vst [vmem:[%s1042_s3 + $0xa8] sm:$0xff] %v565_v38  ;;  %v380_v46 = vpop.f32.mrb[14].mxu0  ;;  %v444_v47 = vpop.f32.mrb[14].mxu1 }
 0x113   :  { %vm486_vm13 = vcmp.ge.f32.partialorder %v378_v41, 0.0  ;;  %v518_v48 = vmul.f32 0.2, %v378_v41  ;;  %vm502_vm14 = vcmp.ge.f32.partialorder %v442_v43, 0.0  ;;  %v534_v49 = vmul.f32 0.2, %v442_v43 }
 0x114   :  { %v381_v50 = vadd.f32 %v909_v42, %v380_v46  ;;  %v445_v51 = vadd.f32 %v909_v42, %v444_v47  ;;  %v382_v52 = vpop.f32.mrb[15].mxu0  ;;  %v446_v53 = vpop.f32.mrb[15].mxu1 }
 0x115   :  { %v550_v54 = vsel %vm486_vm13, %v378_v41, %v518_v48  ;;  %v566_v55 = vsel %vm502_vm14, %v442_v43, %v534_v49 }
 0x116   :  { %582 = vst [vmem:[%s1042_s3 + $0x30] sm:$0xff] %v550_v54  ;;  %598 = vst [vmem:[%s1042_s3 + $0xb0] sm:$0xff] %v566_v55  ;;  %vm487_vm15 = vcmp.ge.f32.partialorder %v381_v50, 0.0  ;;  %v519_v56 = vmul.f32 0.2, %v381_v50  ;;  %vm503_vm0 = vcmp.ge.f32.partialorder %v445_v51, 0.0 }
 0x117   :  { %v535_v57 = vmul.f32 0.2, %v445_v51 }
 0x118   :  { %v551_v58 = vsel %vm487_vm15, %v381_v50, %v519_v56  ;;  %v385_v60 = vpop.f32.mrb[16].mxu0  ;;  %v449_v61 = vpop.f32.mrb[16].mxu1 }
 0x119   :  { %v567_v59 = vsel %vm503_vm0, %v445_v51, %v535_v57  ;;  %583 = vst [vmem:[%s1042_s3 + $0x38] sm:$0xff] %v551_v58  ;;  %v386_v62 = vadd.f32 %v909_v42, %v385_v60  ;;  %v450_v63 = vadd.f32 %v909_v42, %v449_v61  ;;  %v387_v0 = vpop.f32.mrb[17].mxu0  ;;  %v451_v1 = vpop.f32.mrb[17].mxu1 }
 0x11a   :  { %599 = vst [vmem:[%s1042_s3 + $0xb8] sm:$0xff] %v567_v59  ;;  %v388_v2 = vpop.f32.mrb[18].mxu0  ;;  %v452_v3 = vpop.f32.mrb[18].mxu1 }
 0x11b   :  { %vm488_vm1 = vcmp.ge.f32.partialorder %v386_v62, 0.0  ;;  %v520_v4 = vmul.f32 0.2, %v386_v62  ;;  %vm504_vm2 = vcmp.ge.f32.partialorder %v450_v63, 0.0  ;;  %v536_v5 = vmul.f32 0.2, %v450_v63 }
 0x11c   :  { %v389_v6 = vadd.f32 %v909_v42, %v388_v2  ;;  %v453_v7 = vadd.f32 %v909_v42, %v452_v3  ;;  %v390_v8 = vpop.f32.mrb[19].mxu0  ;;  %v454_v9 = vpop.f32.mrb[19].mxu1 }
 0x11d   :  { %v552_v10 = vsel %vm488_vm1, %v386_v62, %v520_v4  ;;  %v568_v11 = vsel %vm504_vm2, %v450_v63, %v536_v5 }
 0x11e   :  { %584 = vst [vmem:[%s1042_s3 + $0x40] sm:$0xff] %v552_v10  ;;  %600 = vst [vmem:[%s1042_s3 + $0xc0] sm:$0xff] %v568_v11  ;;  %vm489_vm3 = vcmp.ge.f32.partialorder %v389_v6, 0.0  ;;  %v521_v12 = vmul.f32 0.2, %v389_v6  ;;  %vm505_vm4 = vcmp.ge.f32.partialorder %v453_v7, 0.0 }
 0x11f   :  { %v537_v13 = vmul.f32 0.2, %v453_v7 }
 0x120   :  { %v553_v14 = vsel %vm489_vm3, %v389_v6, %v521_v12  ;;  %v393_v16 = vpop.f32.mrb[20].mxu0  ;;  %v457_v17 = vpop.f32.mrb[20].mxu1 }
 0x121   :  { %v569_v15 = vsel %vm505_vm4, %v453_v7, %v537_v13  ;;  %585 = vst [vmem:[%s1042_s3 + $0x48] sm:$0xff] %v553_v14  ;;  %v394_v18 = vadd.f32 %v909_v42, %v393_v16  ;;  %v458_v19 = vadd.f32 %v909_v42, %v457_v17  ;;  %v395_v20 = vpop.f32.mrb[21].mxu0  ;;  %v459_v21 = vpop.f32.mrb[21].mxu1 }
 0x122   :  { %601 = vst [vmem:[%s1042_s3 + $0xc8] sm:$0xff] %v569_v15  ;;  %v396_v22 = vpop.f32.mrb[22].mxu0  ;;  %v460_v23 = vpop.f32.mrb[22].mxu1 }
 0x123   :  { %vm490_vm5 = vcmp.ge.f32.partialorder %v394_v18, 0.0  ;;  %v522_v24 = vmul.f32 0.2, %v394_v18  ;;  %vm506_vm6 = vcmp.ge.f32.partialorder %v458_v19, 0.0  ;;  %v538_v25 = vmul.f32 0.2, %v458_v19 }
 0x124   :  { %v397_v26 = vadd.f32 %v909_v42, %v396_v22  ;;  %v461_v27 = vadd.f32 %v909_v42, %v460_v23  ;;  %v398_v28 = vpop.f32.mrb[23].mxu0  ;;  %v462_v29 = vpop.f32.mrb[23].mxu1 }
 0x125   :  { %v554_v30 = vsel %vm490_vm5, %v394_v18, %v522_v24  ;;  %v570_v31 = vsel %vm506_vm6, %v458_v19, %v538_v25 }
 0x126   :  { %586 = vst [vmem:[%s1042_s3 + $0x50] sm:$0xff] %v554_v30  ;;  %602 = vst [vmem:[%s1042_s3 + $0xd0] sm:$0xff] %v570_v31  ;;  %vm491_vm7 = vcmp.ge.f32.partialorder %v397_v26, 0.0  ;;  %v523_v32 = vmul.f32 0.2, %v397_v26  ;;  %vm507_vm8 = vcmp.ge.f32.partialorder %v461_v27, 0.0 }
 0x127   :  { %v539_v33 = vmul.f32 0.2, %v461_v27 }
 0x128   :  { %v555_v34 = vsel %vm491_vm7, %v397_v26, %v523_v32  ;;  %v401_v36 = vpop.f32.mrb[24].mxu0  ;;  %v465_v37 = vpop.f32.mrb[24].mxu1 }
 0x129   :  { %v571_v35 = vsel %vm507_vm8, %v461_v27, %v539_v33  ;;  %587 = vst [vmem:[%s1042_s3 + $0x58] sm:$0xff] %v555_v34  ;;  %v402_v38 = vadd.f32 %v909_v42, %v401_v36  ;;  %v466_v39 = vadd.f32 %v909_v42, %v465_v37  ;;  %v403_v40 = vpop.f32.mrb[25].mxu0  ;;  %v467_v41 = vpop.f32.mrb[25].mxu1 }
 0x12a   :  { %603 = vst [vmem:[%s1042_s3 + $0xd8] sm:$0xff] %v571_v35  ;;  %v404_v43 = vpop.f32.mrb[26].mxu0  ;;  %v468_v44 = vpop.f32.mrb[26].mxu1 }
 0x12b   :  { %vm492_vm9 = vcmp.ge.f32.partialorder %v402_v38, 0.0  ;;  %v524_v45 = vmul.f32 0.2, %v402_v38  ;;  %vm508_vm10 = vcmp.ge.f32.partialorder %v466_v39, 0.0  ;;  %v540_v46 = vmul.f32 0.2, %v466_v39 }
 0x12c   :  { %v405_v47 = vadd.f32 %v909_v42, %v404_v43  ;;  %v469_v48 = vadd.f32 %v909_v42, %v468_v44  ;;  %v406_v49 = vpop.f32.mrb[27].mxu0  ;;  %v470_v50 = vpop.f32.mrb[27].mxu1 }
 0x12d   :  { %v556_v51 = vsel %vm492_vm9, %v402_v38, %v524_v45  ;;  %v572_v52 = vsel %vm508_vm10, %v466_v39, %v540_v46 }
 0x12e   :  { %588 = vst [vmem:[%s1042_s3 + $0x60] sm:$0xff] %v556_v51  ;;  %604 = vst [vmem:[%s1042_s3 + $0xe0] sm:$0xff] %v572_v52  ;;  %vm493_vm11 = vcmp.ge.f32.partialorder %v405_v47, 0.0  ;;  %v525_v53 = vmul.f32 0.2, %v405_v47  ;;  %vm509_vm12 = vcmp.ge.f32.partialorder %v469_v48, 0.0 }
 0x12f   :  { %v541_v54 = vmul.f32 0.2, %v469_v48 }
 0x130   :  { %v557_v55 = vsel %vm493_vm11, %v405_v47, %v525_v53  ;;  %v409_v57 = vpop.f32.mrb[28].mxu0  ;;  %v473_v58 = vpop.f32.mrb[28].mxu1 }
 0x131   :  { %v573_v56 = vsel %vm509_vm12, %v469_v48, %v541_v54  ;;  %589 = vst [vmem:[%s1042_s3 + $0x68] sm:$0xff] %v557_v55  ;;  %v410_v59 = vadd.f32 %v909_v42, %v409_v57  ;;  %v474_v60 = vadd.f32 %v909_v42, %v473_v58  ;;  %v411_v61 = vpop.f32.mrb[29].mxu0  ;;  %v475_v62 = vpop.f32.mrb[29].mxu1 }
 0x132   :  { %605 = vst [vmem:[%s1042_s3 + $0xe8] sm:$0xff] %v573_v56  ;;  %v412_v63 = vpop.f32.mrb[30].mxu0  ;;  %v476_v0 = vpop.f32.mrb[30].mxu1 }
 0x133   :  { %vm494_vm13 = vcmp.ge.f32.partialorder %v410_v59, 0.0  ;;  %v526_v1 = vmul.f32 0.2, %v410_v59  ;;  %vm510_vm14 = vcmp.ge.f32.partialorder %v474_v60, 0.0  ;;  %v542_v2 = vmul.f32 0.2, %v474_v60 }
 0x134   :  { %v413_v3 = vadd.f32 %v909_v42, %v412_v63  ;;  %v477_v4 = vadd.f32 %v909_v42, %v476_v0  ;;  %v414_v5 = vpop.f32.mrb[31].mxu0  ;;  %v478_v6 = vpop.f32.mrb[31].mxu1 }
 0x135   :  { %v558_v7 = vsel %vm494_vm13, %v410_v59, %v526_v1  ;;  %v574_v8 = vsel %vm510_vm14, %v474_v60, %v542_v2 }
 0x136   :  { %590 = vst [vmem:[%s1042_s3 + $0x70] sm:$0xff] %v558_v7  ;;  %606 = vst [vmem:[%s1042_s3 + $0xf0] sm:$0xff] %v574_v8  ;;  %vm495_vm15 = vcmp.ge.f32.partialorder %v413_v3, 0.0  ;;  %v527_v9 = vmul.f32 0.2, %v413_v3  ;;  %vm511_vm0 = vcmp.ge.f32.partialorder %v477_v4, 0.0 }
 0x137   :  { %v543_v10 = vmul.f32 0.2, %v477_v4 }
 0x138   :  { %v559_v11 = vsel %vm495_vm15, %v413_v3, %v527_v9 }
 0x139   :  { %v575_v12 = vsel %vm511_vm0, %v477_v4, %v543_v10  ;;  %591 = vst [vmem:[%s1042_s3 + $0x78] sm:$0xff] %v559_v11 }
 0x13a   :  { %607 = vst [vmem:[%s1042_s3 + $0xf8] sm:$0xff] %v575_v12 }

// kernel: discriminator_r_forward.13
= control target key start
LH: loop header
LB: loop body
LE: loop exit
PB: predicated region body
PF: predicated region fallthrough
CT: control target
= control target key end

     0   :  { %vm470_vm0 = vcmask 261120   ;;  %s1621_s1 = inlined_call_operand.vmem [shape: bf16[288,128], index: 1, kind: input, shape index: {}]   ;;  %s1622_s0 = inlined_call_operand.vmem [shape: bf16[256,288], index: 0, kind: input, shape index: {}]   ;;  %s1623_s2 = inlined_call_operand.vmem [shape: f32[1,128], index: 2, kind: input, shape index: {}]   ;;  %s1624_s3 = inlined_call_operand.vmem [shape: f32[256,128], index: 3, kind: output, shape index: {}]  }
   0x1   :  { %v1142_v0 = vld [vmem:[%s1621_s1 + $0x40] sm:$0xff]   ;;  %v1144_v2 = vld [vmem:[%s1621_s1 + $0x48] sm:$0xff]   ;;  %v1146_v4 = vld [vmem:[%s1621_s1 + $0x50] sm:$0xff]  }
   0x2   :  { %v1143_v1 = vld [vmem:[%s1621_s1] sm:$0xff]   ;;  %960 = vmatprep.subr.bf16.mxu0 %v1142_v0  ;;  %1126 = vmatprep.subr.bf16.mxu1 %v1142_v0  ;;  %v1145_v3 = vld [vmem:[%s1621_s1 + $0x8] sm:$0xff]   ;;  %v1147_v5 = vld [vmem:[%s1621_s1 + $0x10] sm:$0xff]  }
   0x3   :  { %961 = vmatpush3.bf16.msra.mxu0 %v1143_v1  ;;  %1134 = vmatpush3.bf16.msra.mxu1 %v1143_v1  ;;  %v1148_v6 = vld [vmem:[%s1621_s1 + $0x58] sm:$0xff]   ;;  %v1150_v8 = vld [vmem:[%s1621_s1 + $0x60] sm:$0xff]   ;;  %v1152_v10 = vld [vmem:[%s1621_s1 + $0x68] sm:$0xff]  }
   0x4   :  { %962 = vmatprep.subr.bf16.mxu0 %v1144_v2  ;;  %1127 = vmatprep.subr.bf16.mxu1 %v1144_v2  ;;  %v1149_v7 = vld [vmem:[%s1621_s1 + $0x18] sm:$0xff]   ;;  %v1151_v9 = vld [vmem:[%s1621_s1 + $0x20] sm:$0xff]   ;;  %v1153_v13 = vld [vmem:[%s1621_s1 + $0x28] sm:$0xff]  }
   0x5   :  { %v1160_v11 = vld [vmem:[%s1622_s0 + $0x4] ss:$12 sps:$4 sm:$0xff]   ;;  %v1156_v16 = vld [vmem:[%s1621_s1 + $0x78] sm:$0xff]   ;;  %v1158_v19 = vld [vmem:[%s1622_s0] ss:$12 sps:$4 sm:$0xff]  }
   0x6   :  { %v1163_v12 = vld [vmem:[%s1622_s0 + $0x124] ss:$12 sps:$4 sm:$0xff]   ;;  %551 = vmatprep.mubr.bf16.mxu0 %v1160_v11  ;;  %v1157_v17 = vld [vmem:[%s1621_s1 + $0x38] sm:$0xff]   ;;  %v1161_v20 = vld [vmem:[%s1622_s0 + $0x120] ss:$12 sps:$4 sm:$0xff]  }
   0x7   :  { %963 = vmatpush3.bf16.msra.mxu0 %v1145_v3  ;;  %1135 = vmatpush3.bf16.msra.mxu1 %v1145_v3  ;;  %v1154_v14 = vld [vmem:[%s1621_s1 + $0x70] sm:$0xff]   ;;  %v1164_v18 = vld [vmem:[%s1621_s1 + $0x80] sm:$0xff]   ;;  %v1165_v21 = vld [vmem:[%s1622_s0 + $0x1c] ss:$12 sps:$4 sm:$0xff]  }
   0x8   :  { %964 = vmatprep.subr.bf16.mxu0 %v1146_v4  ;;  %1128 = vmatprep.subr.bf16.mxu1 %v1146_v4  ;;  %v1155_v15 = vld [vmem:[%s1621_s1 + $0x30] sm:$0xff]   ;;  %v1167_v22 = vld [vmem:[%s1622_s0 + $0x13c] ss:$12 sps:$4 sm:$0xff]   ;;  %v1169_v24 = vld [vmem:[%s1622_s0 + $0x18] ss:$12 sps:$4 sm:$0xff]  }
   0x9   :  { %647 = vmatprep.mubr.bf16.mxu1 %v1163_v12  ;;  %v1177_v23 = vld [vmem:[%s1621_s1 + $0x88] sm:$0xff]   ;;  %v1170_v25 = vld [vmem:[%s1622_s0 + $0x138] ss:$12 sps:$4 sm:$0xff]   ;;  %v1171_v26 = vld [vmem:[%s1622_s0 + $0x34] ss:$12 sps:$4 sm:$0xff]  }
   0xa   :  { %v1173_v27 = vld [vmem:[%s1622_s0 + $0x154] ss:$12 sps:$4 sm:$0xff]   ;;  %v1175_v28 = vld [vmem:[%s1622_s0 + $0x30] ss:$12 sps:$4 sm:$0xff]   ;;  %v1178_v30 = vld [vmem:[%s1622_s0 + $0x4c] ss:$12 sps:$4 sm:$0xff]  }
   0xb   :  { %965 = vmatpush3.bf16.msra.mxu0 %v1147_v5  ;;  %1136 = vmatpush3.bf16.msra.mxu1 %v1147_v5  ;;  %v1176_v29 = vld [vmem:[%s1622_s0 + $0x150] ss:$12 sps:$4 sm:$0xff]   ;;  %v1180_v31 = vld [vmem:[%s1622_s0 + $0x16c] ss:$12 sps:$4 sm:$0xff]   ;;  %v1182_v32 = vld [vmem:[%s1622_s0 + $0x48] ss:$12 sps:$4 sm:$0xff]  }
   0xc   :  { %966 = vmatprep.subr.bf16.mxu0 %v1148_v6  ;;  %1129 = vmatprep.subr.bf16.mxu1 %v1148_v6  ;;  %v1183_v33 = vld [vmem:[%s1622_s0 + $0x168] ss:$12 sps:$4 sm:$0xff]   ;;  %v1184_v34 = vld [vmem:[%s1622_s0 + $0x64] ss:$12 sps:$4 sm:$0xff]   ;;  %v1187_v36 = vld [vmem:[%s1622_s0 + $0x60] ss:$12 sps:$4 sm:$0xff]  }
   0xd   :  { %v1186_v35 = vld [vmem:[%s1622_s0 + $0x8] ss:$12 sps:$4 sm:$0xff]   ;;  %v1188_v37 = vld [vmem:[%s1622_s0 + $0x20] ss:$12 sps:$4 sm:$0xff]   ;;  %v1191_v39 = vld [vmem:[%s1622_s0 + $0x38] ss:$12 sps:$4 sm:$0xff]  }
   0xe   :  { %v1189_v38 = vld [vmem:[%s1622_s0 + $0x7c] ss:$12 sps:$4 sm:$0xff]   ;;  %v1192_v40 = vld [vmem:[%s1622_s0 + $0x78] ss:$12 sps:$4 sm:$0xff]   ;;  %v1194_v42 = vld [vmem:[%s1622_s0 + $0x94] ss:$12 sps:$4 sm:$0xff]  }
   0xf   :  { %967 = vmatpush3.bf16.msra.mxu0 %v1149_v7  ;;  %1137 = vmatpush3.bf16.msra.mxu1 %v1149_v7  ;;  %v1193_v41 = vld [vmem:[%s1622_s0 + $0x50] ss:$12 sps:$4 sm:$0xff]   ;;  %v1196_v43 = vld [vmem:[%s1622_s0 + $0x68] ss:$12 sps:$4 sm:$0xff]   ;;  %v1198_v45 = vld [vmem:[%s1622_s0 + $0x80] ss:$12 sps:$4 sm:$0xff]  }
  0x10   :  { %968 = vmatprep.subr.bf16.mxu0 %v1150_v8  ;;  %1130 = vmatprep.subr.bf16.mxu1 %v1150_v8  ;;  %v1197_v44 = vld [vmem:[%s1622_s0 + $0x90] ss:$12 sps:$4 sm:$0xff]   ;;  %v1199_v46 = vld [vmem:[%s1622_s0 + $0xac] ss:$12 sps:$4 sm:$0xff]   ;;  %v1202_v48 = vld [vmem:[%s1622_s0 + $0xa8] ss:$12 sps:$4 sm:$0xff]  }
  0x11   :  { %v1201_v47 = vld [vmem:[%s1622_s0 + $0x98] ss:$12 sps:$4 sm:$0xff]   ;;  %v1203_v49 = vld [vmem:[%s1622_s0 + $0xb0] ss:$12 sps:$4 sm:$0xff]   ;;  %v1206_v51 = vld [vmem:[%s1622_s0 + $0xc8] ss:$12 sps:$4 sm:$0xff]  }
  0x12   :  { %v1204_v50 = vld [vmem:[%s1622_s0 + $0xc4] ss:$12 sps:$4 sm:$0xff]   ;;  %v1207_v52 = vld [vmem:[%s1622_s0 + $0xc0] ss:$12 sps:$4 sm:$0xff]   ;;  %v1209_v54 = vld [vmem:[%s1622_s0 + $0xdc] ss:$12 sps:$4 sm:$0xff]  }
  0x13   :  { %969 = vmatpush3.bf16.msra.mxu0 %v1151_v9  ;;  %1138 = vmatpush3.bf16.msra.mxu1 %v1151_v9  ;;  %v1208_v53 = vld [vmem:[%s1622_s0 + $0xe0] ss:$12 sps:$4 sm:$0xff]   ;;  %v1211_v55 = vld [vmem:[%s1622_s0 + $0xf8] ss:$12 sps:$4 sm:$0xff]   ;;  %v1213_v57 = vld [vmem:[%s1622_s0 + $0x110] ss:$12 sps:$4 sm:$0xff]  }
  0x14   :  { %970 = vmatprep.subr.bf16.mxu0 %v1152_v10  ;;  %1131 = vmatprep.subr.bf16.mxu1 %v1152_v10  ;;  %v1212_v56 = vld [vmem:[%s1622_s0 + $0xd8] ss:$12 sps:$4 sm:$0xff]   ;;  %v1214_v58 = vld [vmem:[%s1622_s0 + $0xf4] ss:$12 sps:$4 sm:$0xff]   ;;  %v1217_v60 = vld [vmem:[%s1622_s0 + $0xf0] ss:$12 sps:$4 sm:$0xff]  }
  0x15   :  { %v1216_v59 = vld [vmem:[%s1622_s0 + $0x128] ss:$12 sps:$4 sm:$0xff]   ;;  %v1218_v61 = vld [vmem:[%s1622_s0 + $0x140] ss:$12 sps:$4 sm:$0xff]   ;;  %v1221_v63 = vld [vmem:[%s1622_s0 + $0x158] ss:$12 sps:$4 sm:$0xff]  }
  0x16   :  { %v1219_v62 = vld [vmem:[%s1622_s0 + $0x10c] ss:$12 sps:$4 sm:$0xff]   ;;  %v1222_v0 = vld [vmem:[%s1622_s0 + $0x108] ss:$12 sps:$4 sm:$0xff]   ;;  %v1223_v1 = vld [vmem:[%s1622_s0 + $0x170] ss:$12 sps:$4 sm:$0xff]  }
  0x17   :  { %971 = vmatpush3.bf16.msra.mxu0 %v1153_v13  ;;  %1139 = vmatpush3.bf16.msra.mxu1 %v1153_v13 }
  0x18   :  { %972 = vmatprep.subr.bf16.mxu0 %v1154_v14  ;;  %1132 = vmatprep.subr.bf16.mxu1 %v1154_v14 }
  0x1b   :  { %973 = vmatpush3.bf16.msra.mxu0 %v1155_v15  ;;  %1140 = vmatpush3.bf16.msra.mxu1 %v1155_v15 }
  0x1c   :  { %974 = vmatprep.subr.bf16.mxu0 %v1156_v16  ;;  %1133 = vmatprep.subr.bf16.mxu1 %v1156_v16 }
  0x1f   :  { %975 = vmatpush3.bf16.msra.mxu0 %v1157_v17  ;;  %1141 = vmatpush3.bf16.msra.mxu1 %v1157_v17 }
  0x20   :  { %1090 = vmatprep.subr.bf16.mxu1 %v1164_v18 }
  0x22   :  { %552 = vmatmul.mubr.bf16.vlgmr.msra.gmra.mrb[0].mxu0 %v1158_v19  ;;  %648 = vmatmul.mubr.bf16.vlgmr.msra.gmra.mrb[0].mxu1 %v1161_v20 }
  0x23   :  { %1091 = vmatpush3.bf16.msra.mxu1 %v1164_v18  ;;  %559 = vmatprep.mubr.bf16.mxu0 %v1165_v21 }
  0x24   :  { %655 = vmatprep.mubr.bf16.mxu1 %v1167_v22  ;;  %1092 = vmatprep.subr.bf16.mxu1 %v1177_v23 }
  0x27   :  { %1093 = vmatpush3.bf16.msra.mxu1 %v1177_v23 }
  0x2a   :  { %560 = vmatmul.mubr.bf16.gmra.mrb[4].mxu0 %v1169_v24  ;;  %656 = vmatmul.mubr.bf16.gmra.mrb[4].mxu1 %v1170_v25 }
  0x2b   :  { %567 = vmatprep.mubr.bf16.mxu0 %v1171_v26  ;;  %663 = vmatprep.mubr.bf16.mxu1 %v1173_v27 }
  0x32   :  { %568 = vmatmul.mubr.bf16.gmra.mrb[8].mxu0 %v1175_v28  ;;  %664 = vmatmul.mubr.bf16.gmra.mrb[8].mxu1 %v1176_v29 }
  0x33   :  { %575 = vmatprep.mubr.bf16.mxu0 %v1178_v30  ;;  %671 = vmatprep.mubr.bf16.mxu1 %v1180_v31 }
  0x3a   :  { %576 = vmatmul.mubr.bf16.gmra.mrb[12].mxu0 %v1182_v32  ;;  %672 = vmatmul.mubr.bf16.gmra.mrb[12].mxu1 %v1183_v33 }
  0x3b   :  { %583 = vmatprep.mubr.bf16.mxu0 %v1184_v34  ;;  %1094 = vmatprep.mubr.msk.bf16.mxu1 %vm470_vm0, %v1186_v35 }
  0x42   :  { %584 = vmatmul.mubr.bf16.gmra.mrb[16].mxu0 %v1187_v36  ;;  %1095 = vmatmul.mubr.msk.bf16.vlgmr.msra.gmra.mrb[16].mxu1 %vm470_vm0, %v1188_v37 }
  0x43   :  { %591 = vmatprep.mubr.bf16.mxu0 %v1189_v38  ;;  %1098 = vmatprep.mubr.msk.bf16.mxu1 %vm470_vm0, %v1191_v39 }
  0x4a   :  { %592 = vmatmul.mubr.bf16.gmra.mrb[20].mxu0 %v1192_v40  ;;  %1099 = vmatmul.mubr.msk.bf16.gmra.mrb[20].mxu1 %vm470_vm0, %v1193_v41 }
  0x4b   :  { %599 = vmatprep.mubr.bf16.mxu0 %v1194_v42  ;;  %1102 = vmatprep.mubr.msk.bf16.mxu1 %vm470_vm0, %v1196_v43 }
  0x52   :  { %600 = vmatmul.mubr.bf16.gmra.mrb[24].mxu0 %v1197_v44  ;;  %1103 = vmatmul.mubr.msk.bf16.gmra.mrb[24].mxu1 %vm470_vm0, %v1198_v45 }
  0x53   :  { %607 = vmatprep.mubr.bf16.mxu0 %v1199_v46  ;;  %1106 = vmatprep.mubr.msk.bf16.mxu1 %vm470_vm0, %v1201_v47 }
  0x5a   :  { %608 = vmatmul.mubr.bf16.gmra.mrb[28].mxu0 %v1202_v48  ;;  %1107 = vmatmul.mubr.msk.bf16.gmra.mrb[28].mxu1 %vm470_vm0, %v1203_v49 }
  0x5b   :  { %615 = vmatprep.mubr.bf16.mxu0 %v1204_v50  ;;  %1110 = vmatprep.mubr.msk.bf16.mxu1 %vm470_vm0, %v1206_v51  ;;  %v1477_v50 = vld [vmem:[%s1623_s2] ss:$0 sm:$0xff] }
  0x62   :  { %616 = vmatmul.mubr.bf16.gmra.mrb[32].mxu0 %v1207_v52  ;;  %1111 = vmatmul.mubr.msk.bf16.gmra.mrb[32].mxu1 %vm470_vm0, %v1208_v53 }
  0x63   :  { %623 = vmatprep.mubr.bf16.mxu0 %v1209_v54  ;;  %1114 = vmatprep.mubr.msk.bf16.mxu1 %vm470_vm0, %v1211_v55 }
  0x6a   :  { %624 = vmatmul.mubr.bf16.gmra.mrb[36].mxu0 %v1212_v56  ;;  %1115 = vmatmul.mubr.msk.bf16.gmra.mrb[36].mxu1 %vm470_vm0, %v1213_v57 }
  0x6b   :  { %631 = vmatprep.mubr.bf16.mxu0 %v1214_v58  ;;  %1118 = vmatprep.mubr.msk.bf16.mxu1 %vm470_vm0, %v1216_v59 }
  0x72   :  { %632 = vmatmul.mubr.bf16.gmra.mrb[40].mxu0 %v1217_v60  ;;  %1119 = vmatmul.mubr.msk.bf16.gmra.mrb[40].mxu1 %vm470_vm0, %v1218_v61 }
  0x73   :  { %639 = vmatprep.mubr.bf16.mxu0 %v1219_v62  ;;  %1122 = vmatprep.mubr.msk.bf16.mxu1 %vm470_vm0, %v1221_v63 }
  0x7a   :  { %640 = vmatmul.mubr.bf16.gmra.mrb[44].mxu0 %v1222_v0  ;;  %1123 = vmatmul.mubr.msk.bf16.gmra.mrb[44].mxu1 %vm470_vm0, %v1223_v1 }
  0xf5   :  { %v976_v2 = vpop.f32.mrb[0].mxu0  ;;  %v1048_v3 = vpop.f32.mrb[0].mxu1 }
  0xf6   :  { %v977_v4 = vpop.f32.mrb[1].mxu0  ;;  %v1049_v5 = vpop.f32.mrb[1].mxu1 }
  0xf7   :  { %v978_v6 = vadd.f32 %v977_v4, %v976_v2  ;;  %v979_v7 = vpop.f32.mrb[2].mxu0  ;;  %v1458_v8 = vadd.f32 %v1049_v5, %v1048_v3  ;;  %v1051_v9 = vpop.f32.mrb[2].mxu1 }
  0xf8   :  { %v980_v10 = vpop.f32.mrb[3].mxu0  ;;  %v1052_v11 = vpop.f32.mrb[3].mxu1 }
  0xf9   :  { %v981_v12 = vadd.f32 %v980_v10, %v979_v7  ;;  %v1460_v13 = vadd.f32 %v1052_v11, %v1051_v9  ;;  %v554_v54 = vadd.f32 %v978_v6, %v1477_v50 }
  0xfb   :  { %v557_v63 = vadd.f32 %v981_v12, %v1477_v50 }
  0xfd   :  { %v982_v14 = vpop.f32.mrb[4].mxu0  ;;  %v1054_v15 = vpop.f32.mrb[4].mxu1 }
  0xfe   :  { %v983_v16 = vpop.f32.mrb[5].mxu0  ;;  %v1055_v17 = vpop.f32.mrb[5].mxu1 }
  0xff   :  { %v984_v18 = vadd.f32 %v983_v16, %v982_v14  ;;  %v985_v19 = vpop.f32.mrb[6].mxu0  ;;  %v1462_v20 = vadd.f32 %v1055_v17, %v1054_v15  ;;  %v1057_v21 = vpop.f32.mrb[6].mxu1 }
 0x100   :  { %v986_v22 = vpop.f32.mrb[7].mxu0  ;;  %v1058_v23 = vpop.f32.mrb[7].mxu1 }
 0x101   :  { %v987_v24 = vadd.f32 %v986_v22, %v985_v19  ;;  %v1464_v25 = vadd.f32 %v1058_v23, %v1057_v21  ;;  %v562_v51 = vadd.f32 %v984_v18, %v1477_v50 }
 0x103   :  { %v565_v58 = vadd.f32 %v987_v24, %v1477_v50 }
 0x105   :  { %v988_v26 = vpop.f32.mrb[8].mxu0  ;;  %v1060_v27 = vpop.f32.mrb[8].mxu1 }
 0x106   :  { %v989_v28 = vpop.f32.mrb[9].mxu0  ;;  %v1061_v29 = vpop.f32.mrb[9].mxu1 }
 0x107   :  { %v990_v30 = vadd.f32 %v989_v28, %v988_v26  ;;  %v991_v31 = vpop.f32.mrb[10].mxu0  ;;  %v1466_v32 = vadd.f32 %v1061_v29, %v1060_v27  ;;  %v1063_v33 = vpop.f32.mrb[10].mxu1 }
 0x108   :  { %v992_v34 = vpop.f32.mrb[11].mxu0  ;;  %v1064_v35 = vpop.f32.mrb[11].mxu1 }
 0x109   :  { %v993_v36 = vadd.f32 %v992_v34, %v991_v31  ;;  %v1468_v37 = vadd.f32 %v1064_v35, %v1063_v33  ;;  %v570_v9 = vadd.f32 %v990_v30, %v1477_v50 }
 0x10b   :  { %v573_v19 = vadd.f32 %v993_v36, %v1477_v50 }
 0x10d   :  { %v994_v38 = vpop.f32.mrb[12].mxu0  ;;  %v1066_v39 = vpop.f32.mrb[12].mxu1 }
 0x10e   :  { %v995_v40 = vpop.f32.mrb[13].mxu0  ;;  %v1067_v41 = vpop.f32.mrb[13].mxu1 }
 0x10f   :  { %v996_v42 = vadd.f32 %v995_v40, %v994_v38  ;;  %v997_v43 = vpop.f32.mrb[14].mxu0  ;;  %v1470_v44 = vadd.f32 %v1067_v41, %v1066_v39  ;;  %v1069_v45 = vpop.f32.mrb[14].mxu1 }
 0x110   :  { %v998_v46 = vpop.f32.mrb[15].mxu0  ;;  %v1070_v47 = vpop.f32.mrb[15].mxu1 }
 0x111   :  { %v999_v48 = vadd.f32 %v998_v46, %v997_v43  ;;  %v1472_v49 = vadd.f32 %v1070_v47, %v1069_v45  ;;  %v578_v5 = vadd.f32 %v996_v42, %v1477_v50 }
 0x113   :  { %v581_v14 = vadd.f32 %v999_v48, %v1477_v50 }
 0x115   :  { %v1000_v52 = vpop.f32.mrb[16].mxu0  ;;  %v1096_v53 = vpop.f32.mrb[16].mxu1 }
 0x116   :  { %v723_v55 = vadd.f32 %v1096_v53, %v562_v51  ;;  %v1001_v56 = vpop.f32.mrb[17].mxu0  ;;  %v714_v57 = vpop.f32.mrb[17].mxu1 }
 0x117   :  { %v1002_v59 = vadd.f32 %v1001_v56, %v1000_v52  ;;  %v715_v60 = vadd.f32 %v714_v57, %v554_v54  ;;  %v1003_v61 = vpop.f32.mrb[18].mxu0  ;;  %v1097_v62 = vpop.f32.mrb[18].mxu1 }
 0x118   :  { %843 = vst [vmem:[%s1624_s3 + $0x10] sm:$0xff] %v723_v55  ;;  %v726_v0 = vadd.f32 %v1097_v62, %v565_v58  ;;  %v1004_v1 = vpop.f32.mrb[19].mxu0  ;;  %v717_v2 = vpop.f32.mrb[19].mxu1 }
 0x119   :  { %841 = vst [vmem:[%s1624_s3] sm:$0xff] %v715_v60  ;;  %v1005_v3 = vadd.f32 %v1004_v1, %v1003_v61  ;;  %v718_v4 = vadd.f32 %v717_v2, %v557_v63  ;;  %v586_v30 = vadd.f32 %v1002_v59, %v1477_v50 }
 0x11a   :  { %844 = vst [vmem:[%s1624_s3 + $0x18] sm:$0xff] %v726_v0 }
 0x11b   :  { %842 = vst [vmem:[%s1624_s3 + $0x8] sm:$0xff] %v718_v4  ;;  %v589_v41 = vadd.f32 %v1005_v3, %v1477_v50 }
 0x11d   :  { %v1006_v6 = vpop.f32.mrb[20].mxu0  ;;  %v1100_v7 = vpop.f32.mrb[20].mxu1 }
 0x11e   :  { %v739_v10 = vadd.f32 %v1100_v7, %v578_v5  ;;  %v1007_v11 = vpop.f32.mrb[21].mxu0  ;;  %v730_v12 = vpop.f32.mrb[21].mxu1 }
 0x11f   :  { %v1008_v15 = vadd.f32 %v1007_v11, %v1006_v6  ;;  %v731_v16 = vadd.f32 %v730_v12, %v570_v9  ;;  %v1009_v17 = vpop.f32.mrb[22].mxu0  ;;  %v1101_v18 = vpop.f32.mrb[22].mxu1 }
 0x120   :  { %847 = vst [vmem:[%s1624_s3 + $0x30] sm:$0xff] %v739_v10  ;;  %v742_v21 = vadd.f32 %v1101_v18, %v581_v14  ;;  %v1010_v22 = vpop.f32.mrb[23].mxu0  ;;  %v733_v23 = vpop.f32.mrb[23].mxu1 }
 0x121   :  { %845 = vst [vmem:[%s1624_s3 + $0x20] sm:$0xff] %v731_v16  ;;  %v1011_v24 = vadd.f32 %v1010_v22, %v1009_v17  ;;  %v734_v26 = vadd.f32 %v733_v23, %v573_v19  ;;  %v594_v27 = vadd.f32 %v1008_v15, %v1477_v50 }
 0x122   :  { %848 = vst [vmem:[%s1624_s3 + $0x38] sm:$0xff] %v742_v21 }
 0x123   :  { %846 = vst [vmem:[%s1624_s3 + $0x28] sm:$0xff] %v734_v26  ;;  %v597_v35 = vadd.f32 %v1011_v24, %v1477_v50 }
 0x125   :  { %v1012_v28 = vpop.f32.mrb[24].mxu0  ;;  %v1104_v29 = vpop.f32.mrb[24].mxu1 }
 0x126   :  { %v755_v31 = vadd.f32 %v1104_v29, %v594_v27  ;;  %v1013_v33 = vpop.f32.mrb[25].mxu0  ;;  %v746_v34 = vpop.f32.mrb[25].mxu1 }
 0x127   :  { %v1014_v36 = vadd.f32 %v1013_v33, %v1012_v28  ;;  %v747_v38 = vadd.f32 %v746_v34, %v586_v30  ;;  %v1015_v39 = vpop.f32.mrb[26].mxu0  ;;  %v1105_v40 = vpop.f32.mrb[26].mxu1 }
 0x128   :  { %851 = vst [vmem:[%s1624_s3 + $0x50] sm:$0xff] %v755_v31  ;;  %v758_v42 = vadd.f32 %v1105_v40, %v597_v35  ;;  %v1016_v43 = vpop.f32.mrb[27].mxu0  ;;  %v749_v45 = vpop.f32.mrb[27].mxu1 }
 0x129   :  { %849 = vst [vmem:[%s1624_s3 + $0x40] sm:$0xff] %v747_v38  ;;  %v1017_v46 = vadd.f32 %v1016_v43, %v1015_v39  ;;  %v750_v47 = vadd.f32 %v749_v45, %v589_v41  ;;  %v602_v52 = vadd.f32 %v1014_v36, %v1477_v50  ;;  %v658_v36 = vadd.f32 %v1462_v20, %v1477_v50 }
 0x12a   :  { %852 = vst [vmem:[%s1624_s3 + $0x58] sm:$0xff] %v758_v42  ;;  %v650_v41 = vadd.f32 %v1458_v8, %v1477_v50 }
 0x12b   :  { %850 = vst [vmem:[%s1624_s3 + $0x48] sm:$0xff] %v750_v47  ;;  %v605_v59 = vadd.f32 %v1017_v46, %v1477_v50  ;;  %v661_v46 = vadd.f32 %v1464_v25, %v1477_v50 }
 0x12d   :  { %v1018_v48 = vpop.f32.mrb[28].mxu0  ;;  %v1108_v51 = vpop.f32.mrb[28].mxu1 }
 0x12e   :  { %v1019_v53 = vpop.f32.mrb[29].mxu0  ;;  %v762_v54 = vpop.f32.mrb[29].mxu1 }
 0x12f   :  { %v1020_v55 = vadd.f32 %v1019_v53, %v1018_v48  ;;  %v763_v56 = vadd.f32 %v762_v54, %v602_v52  ;;  %v1021_v57 = vpop.f32.mrb[30].mxu0  ;;  %v1109_v58 = vpop.f32.mrb[30].mxu1  ;;  %v653_v52 = vadd.f32 %v1460_v13, %v1477_v50 }
 0x130   :  { %v1022_v60 = vpop.f32.mrb[31].mxu0  ;;  %v765_v61 = vpop.f32.mrb[31].mxu1 }
 0x131   :  { %v610_v62 = vadd.f32 %v1020_v55, %v1477_v50  ;;  %853 = vst [vmem:[%s1624_s3 + $0x60] sm:$0xff] %v763_v56  ;;  %v1023_v63 = vadd.f32 %v1022_v60, %v1021_v57  ;;  %v766_v0 = vadd.f32 %v765_v61, %v605_v59 }
 0x133   :  { %v771_v1 = vadd.f32 %v1108_v51, %v610_v62  ;;  %v613_v2 = vadd.f32 %v1023_v63, %v1477_v50  ;;  %854 = vst [vmem:[%s1624_s3 + $0x68] sm:$0xff] %v766_v0  ;;  %v666_v62 = vadd.f32 %v1466_v32, %v1477_v50 }
 0x135   :  { %855 = vst [vmem:[%s1624_s3 + $0x70] sm:$0xff] %v771_v1  ;;  %v774_v3 = vadd.f32 %v1109_v58, %v613_v2  ;;  %v1024_v4 = vpop.f32.mrb[32].mxu0  ;;  %v1112_v5 = vpop.f32.mrb[32].mxu1  ;;  %v674_v58 = vadd.f32 %v1470_v44, %v1477_v50  ;;  %v677_v2 = vadd.f32 %v1472_v49, %v1477_v50 }
 0x136   :  { %v1025_v6 = vpop.f32.mrb[33].mxu0  ;;  %v778_v7 = vpop.f32.mrb[33].mxu1 }
 0x137   :  { %856 = vst [vmem:[%s1624_s3 + $0x78] sm:$0xff] %v774_v3  ;;  %v1026_v9 = vadd.f32 %v1025_v6, %v1024_v4  ;;  %v1027_v10 = vpop.f32.mrb[34].mxu0  ;;  %v1113_v11 = vpop.f32.mrb[34].mxu1  ;;  %v669_v6 = vadd.f32 %v1468_v37, %v1477_v50 }
 0x138   :  { %v1028_v12 = vpop.f32.mrb[35].mxu0  ;;  %v781_v14 = vpop.f32.mrb[35].mxu1 }
 0x139   :  { %v618_v15 = vadd.f32 %v1026_v9, %v1477_v50  ;;  %v1029_v16 = vadd.f32 %v1028_v12, %v1027_v10 }
 0x13b   :  { %v779_v17 = vadd.f32 %v778_v7, %v618_v15  ;;  %v621_v18 = vadd.f32 %v1029_v16, %v1477_v50 }
 0x13d   :  { %857 = vst [vmem:[%s1624_s3 + $0x80] sm:$0xff] %v779_v17  ;;  %v782_v19 = vadd.f32 %v781_v14, %v621_v18  ;;  %v1030_v21 = vpop.f32.mrb[36].mxu0  ;;  %v1548_v22 = vpop.f32.mrb[36].mxu1 }
 0x13e   :  { %v1031_v23 = vpop.f32.mrb[37].mxu0  ;;  %v794_v24 = vpop.f32.mrb[37].mxu1 }
 0x13f   :  { %858 = vst [vmem:[%s1624_s3 + $0x88] sm:$0xff] %v782_v19  ;;  %v1032_v26 = vadd.f32 %v1031_v23, %v1030_v21  ;;  %v1033_v27 = vpop.f32.mrb[38].mxu0  ;;  %v1553_v28 = vpop.f32.mrb[38].mxu1 }
 0x140   :  { %v1034_v29 = vpop.f32.mrb[39].mxu0  ;;  %v797_v30 = vpop.f32.mrb[39].mxu1 }
 0x141   :  { %v626_v31 = vadd.f32 %v1032_v26, %v1477_v50  ;;  %v1035_v33 = vadd.f32 %v1034_v29, %v1033_v27 }
 0x143   :  { %v787_v34 = vadd.f32 %v1112_v5, %v626_v31  ;;  %v629_v35 = vadd.f32 %v1035_v33, %v1477_v50 }
 0x145   :  { %859 = vst [vmem:[%s1624_s3 + $0x90] sm:$0xff] %v787_v34  ;;  %v790_v38 = vadd.f32 %v1113_v11, %v629_v35  ;;  %v1036_v39 = vpop.f32.mrb[40].mxu0  ;;  %v1120_v40 = vpop.f32.mrb[40].mxu1 }
 0x146   :  { %v819_v42 = vadd.f32 %v1120_v40, %v658_v36  ;;  %v1037_v43 = vpop.f32.mrb[41].mxu0  ;;  %v810_v45 = vpop.f32.mrb[41].mxu1 }
 0x147   :  { %860 = vst [vmem:[%s1624_s3 + $0x98] sm:$0xff] %v790_v38  ;;  %v1038_v20 = vadd.f32 %v1037_v43, %v1036_v39  ;;  %v811_v47 = vadd.f32 %v810_v45, %v650_v41  ;;  %v1039_v48 = vpop.f32.mrb[42].mxu0  ;;  %v1121_v51 = vpop.f32.mrb[42].mxu1 }
 0x148   :  { %867 = vst [vmem:[%s1624_s3 + $0xd0] sm:$0xff] %v819_v42  ;;  %v822_v8 = vadd.f32 %v1121_v51, %v661_v46  ;;  %v1040_v53 = vpop.f32.mrb[43].mxu0  ;;  %v813_v54 = vpop.f32.mrb[43].mxu1 }
 0x149   :  { %v634_v25 = vadd.f32 %v1038_v20, %v1477_v50  ;;  %865 = vst [vmem:[%s1624_s3 + $0xc0] sm:$0xff] %v811_v47  ;;  %v1041_v55 = vadd.f32 %v1040_v53, %v1039_v48  ;;  %v814_v56 = vadd.f32 %v813_v54, %v653_v52 }
 0x14a   :  { %868 = vst [vmem:[%s1624_s3 + $0xd8] sm:$0xff] %v822_v8 }
 0x14b   :  { %v795_v13 = vadd.f32 %v794_v24, %v634_v25  ;;  %v637_v57 = vadd.f32 %v1041_v55, %v1477_v50  ;;  %866 = vst [vmem:[%s1624_s3 + $0xc8] sm:$0xff] %v814_v56 }
 0x14d   :  { %861 = vst [vmem:[%s1624_s3 + $0xa0] sm:$0xff] %v795_v13  ;;  %v798_v59 = vadd.f32 %v797_v30, %v637_v57  ;;  %v1042_v60 = vpop.f32.mrb[44].mxu0  ;;  %v1124_v61 = vpop.f32.mrb[44].mxu1 }
 0x14e   :  { %v835_v63 = vadd.f32 %v1124_v61, %v674_v58  ;;  %v1043_v0 = vpop.f32.mrb[45].mxu0  ;;  %v826_v1 = vpop.f32.mrb[45].mxu1 }
 0x14f   :  { %862 = vst [vmem:[%s1624_s3 + $0xa8] sm:$0xff] %v798_v59  ;;  %v1044_v44 = vadd.f32 %v1043_v0, %v1042_v60  ;;  %v827_v3 = vadd.f32 %v826_v1, %v666_v62  ;;  %v1045_v4 = vpop.f32.mrb[46].mxu0  ;;  %v1125_v5 = vpop.f32.mrb[46].mxu1 }
 0x150   :  { %871 = vst [vmem:[%s1624_s3 + $0xf0] sm:$0xff] %v835_v63  ;;  %v838_v32 = vadd.f32 %v1125_v5, %v677_v2  ;;  %v1046_v7 = vpop.f32.mrb[47].mxu0  ;;  %v829_v9 = vpop.f32.mrb[47].mxu1 }
 0x151   :  { %v642_v49 = vadd.f32 %v1044_v44, %v1477_v50  ;;  %869 = vst [vmem:[%s1624_s3 + $0xe0] sm:$0xff] %v827_v3  ;;  %v1047_v10 = vadd.f32 %v1046_v7, %v1045_v4  ;;  %v830_v11 = vadd.f32 %v829_v9, %v669_v6 }
 0x152   :  { %872 = vst [vmem:[%s1624_s3 + $0xf8] sm:$0xff] %v838_v32 }
 0x153   :  { %v803_v37 = vadd.f32 %v1548_v22, %v642_v49  ;;  %v645_v12 = vadd.f32 %v1047_v10, %v1477_v50  ;;  %870 = vst [vmem:[%s1624_s3 + $0xe8] sm:$0xff] %v830_v11 }
 0x155   :  { %863 = vst [vmem:[%s1624_s3 + $0xb0] sm:$0xff] %v803_v37  ;;  %v806_v14 = vadd.f32 %v1553_v28, %v645_v12 }
 0x157   :  { %864 = vst [vmem:[%s1624_s3 + $0xb8] sm:$0xff] %v806_v14 }

</bundles_post_ra>
